<compile_context>
chip_gen: v7x
topology: tpu7x:2x2x1
jax: 0.10.0
libtpu: 0.0.40
codegen_flags: <defaults>
</compile_context>

<pallas_src>
import functools

import jax
import jax.numpy as jnp
from jax.experimental import pallas as pl
from jax.experimental.pallas import tpu as pltpu

_BN_EPS = 1e-5

# (input_dim, output_dim, context_size, dilation) for layers 1..6
_LAYER_CFG = (
    (16,   512,  5, 1),
    (512,  512,  3, 2),
    (512,  512,  3, 3),
    (512,  512,  1, 1),
    (512,  1500, 1, 1),
    (1500, 7,    1, 1),
)


def _out_len(t_in, ctx, dil):
    return t_in - dil * (ctx - 1)


# ---------------------------------------------------------------------------
# Fused kernel: whole network for one batch element
# ---------------------------------------------------------------------------
def _net_kernel(x_ref, *refs, kcfg):
    """refs = (w1, b1, ..., w6, b6, scale_last, shift_last, o_ref).

    x_ref: (1, T1, ctx1*D_in1)  -- layer-1 input, already unfolded over context
    w_i:   (K_i, N_i) bf16      -- Linear weight, context flattened into K
    b_i:   (1, N_i)  f32        -- bias (previous layer's BN already folded in)
    scale_last/shift_last: (1, 7) f32 -- layer-6 BN affine (inference)
    o_ref: (1, T_out, 7)
    kcfg:  static tuple of (t_out, context, dilation) per layer
    """
    n = len(kcfg)
    w_refs = refs[0:2 * n:2]
    b_refs = refs[1:2 * n:2]
    scale_ref = refs[2 * n]
    shift_ref = refs[2 * n + 1]
    o_ref = refs[2 * n + 2]

    h = x_ref[0]                                            # (T, K1) f32
    for i, (t_out, ctx, dil) in enumerate(kcfg):
        if ctx == 1:
            xu = h                                          # no context to gather
        else:
            # unfold: concat shifted time slices along the (lane) feature axis;
            # chunks are 512-wide -> lane aligned.
            xu = jnp.concatenate(
                [h[j * dil: j * dil + t_out, :] for j in range(ctx)], axis=-1)
        z = jnp.dot(xu.astype(jnp.bfloat16), w_refs[i][...],
                    preferred_element_type=jnp.float32)     # (t_out, N_i) f32 acc
        z = z + b_refs[i][...]                              # bias
        h = jnp.maximum(z, 0.0)                             # ReLU

    # layer-6 BatchNorm affine (cannot be folded forward: softmax follows)
    h = h * scale_ref[...] + shift_ref[...]

    # Softmax over features (dim=2), f32 epilogue
    m = jnp.max(h, axis=-1, keepdims=True)
    e = jnp.exp(h - m)
    h = e * pl.reciprocal(jnp.sum(e, axis=-1, keepdims=True), approx=True)

    o_ref[0] = h.astype(o_ref.dtype)


# ---------------------------------------------------------------------------
# Parameter construction (PyTorch-default-style init) + BN folding
# ---------------------------------------------------------------------------
def init_params(key):
    """Returns dict(ws=[...bf16...], bs=[...f32...], scale_last, shift_last)."""
    raw = []
    for (d_in, d_out, ctx, dil) in _LAYER_CFG:
        key, kw, kb = jax.random.split(key, 3)
        fan_in = d_in * ctx
        bound = float(fan_in) ** -0.5
        # nn.Linear weight: (d_out, ctx*d_in); column j*d_in + d == (tap j, feature d),
        # matching F.unfold ordering.  Kernel wants its transpose: (ctx*d_in, d_out).
        w_lin = jax.random.uniform(kw, (d_out, ctx * d_in), jnp.float32, -bound, bound)
        bias = jax.random.uniform(kb, (d_out,), jnp.float32, -bound, bound)
        # BatchNorm1d defaults (eval mode): gamma=1, beta=0, mean=0, var=1
        gamma = jnp.ones((d_out,), jnp.float32)
        beta = jnp.zeros((d_out,), jnp.float32)
        r_mean = jnp.zeros((d_out,), jnp.float32)
        r_var = jnp.ones((d_out,), jnp.float32)
        scale = gamma / jnp.sqrt(r_var + _BN_EPS)
        shift = beta - r_mean * scale
        raw.append(dict(w=jnp.transpose(w_lin), b=bias, scale=scale, shift=shift))

    ws, bs = [], []
    for i, ((d_in, d_out, ctx, dil), p) in enumerate(zip(_LAYER_CFG, raw)):
        w = p["w"]                       # (ctx*d_in, d_out) f32
        b = p["b"]                       # (d_out,)
        if i > 0:
            # Fold previous layer's post-ReLU BN affine into this layer's linear:
            #   W @ unfold(s*h + t) = (diag(tile(s)) W) applied to unfold(h)  + tile(t) @ W
            prev_scale = jnp.tile(raw[i - 1]["scale"], ctx)   # (ctx*d_in,)
            prev_shift = jnp.tile(raw[i - 1]["shift"], ctx)
            b = b + prev_shift @ w
            w = w * prev_scale[:, None]
        ws.append(w.astype(jnp.bfloat16))
        bs.append(b.reshape(1, d_out).astype(jnp.float32))
    return dict(ws=ws, bs=bs,
                scale_last=raw[-1]["scale"].reshape(1, -1),
                shift_last=raw[-1]["shift"].reshape(1, -1))


# ---------------------------------------------------------------------------
# Forward pass: one fused pallas_call
# ---------------------------------------------------------------------------
def net_forward(params, x):
    """x: (B, T, 16) -> (B, T_out, 7) softmax probabilities."""
    B, T0, D0 = x.shape
    d_in0, d_out0, ctx0, dil0 = _LAYER_CFG[0]
    assert D0 == d_in0, (D0, d_in0)

    # Wrapper-side unfold of the raw (tiny) input for layer 1 -> (B, T1, ctx0*d_in0),
    # so every in-kernel layer is one lane-dense matmul.
    t1 = _out_len(T0, ctx0, dil0)
    assert t1 >= 1, "sequence too short for layer-1 context"
    x_unf = jnp.concatenate(
        [x[:, j * dil0: j * dil0 + t1, :] for j in range(ctx0)], axis=-1)

    # Static per-layer schedule (t_out, context, dilation); layer 1 is pre-unfolded.
    kcfg = [(t1, 1, 1)]
    t = t1
    for (d_in, d_out, ctx, dil) in _LAYER_CFG[1:]:
        t = _out_len(t, ctx, dil)
        assert t >= 1, "sequence too short for this context/dilation"
        kcfg.append((t, ctx, dil))
    t_final = t
    d_final = _LAYER_CFG[-1][1]

    in_specs = [pl.BlockSpec((1, t1, ctx0 * d_in0), lambda bi: (bi, 0, 0))]
    flat_args = [x_unf]
    for i in range(len(_LAYER_CFG)):
        w = params["ws"][i]
        bias = params["bs"][i]
        in_specs.append(pl.BlockSpec(w.shape, lambda bi: (0, 0)))
        in_specs.append(pl.BlockSpec(bias.shape, lambda bi: (0, 0)))
        flat_args += [w, bias]
    in_specs += [pl.BlockSpec(params["scale_last"].shape, lambda bi: (0, 0)),
                 pl.BlockSpec(params["shift_last"].shape, lambda bi: (0, 0))]
    flat_args += [params["scale_last"], params["shift_last"]]

    return pl.pallas_call(
        functools.partial(_net_kernel, kcfg=tuple(kcfg)),
        out_shape=jax.ShapeDtypeStruct((B, t_final, d_final), jnp.float32),
        grid=(B,),
        in_specs=in_specs,
        out_specs=pl.BlockSpec((1, t_final, d_final), lambda bi: (bi, 0, 0)),
        compiler_params=pltpu.CompilerParams(
            dimension_semantics=("parallel",),
            # ~10.6 MB of (double-buffered) bf16 weights + tiny activations;
            # 32 MiB leaves headroom and stays well under v7x's 64 MiB VMEM.
            vmem_limit_bytes=32 * 1024 * 1024),
    )(*flat_args)


if __name__ == "__main__":
    key = jax.random.PRNGKey(0)
    key, kx = jax.random.split(key)

    # input: (batch, seq_len, input_features); seq_len=20 so every context fits
    B, T, D = 2, 20, 16
    x = jax.random.normal(kx, (B, T, D), jnp.float32)

    params = init_params(key)
    out = jax.block_until_ready(jax.jit(net_forward)(params, x))

    # sanity: shape (2, 6, 7), rows are softmax distributions over dim=2
    assert out.shape == (2, 6, 7), out.shape
    assert bool(jnp.all(jnp.isfinite(out)))
    assert bool(jnp.all(out >= 0.0))
    assert bool(jnp.allclose(jnp.sum(out, axis=-1), 1.0, atol=1e-2))

    print("KERNEL_OK")
</pallas_src>

<mosaic_0001>
module attributes {stable_mosaic.version = 11 : i64} {
  func.func @_net_kernel(%arg0: i32, %arg1: memref<1x16x80xf32, #tpu.memory_space<vmem>>, %arg2: memref<80x512xbf16, #tpu.memory_space<vmem>>, %arg3: memref<1x512xf32, #tpu.memory_space<vmem>>, %arg4: memref<1536x512xbf16, #tpu.memory_space<vmem>>, %arg5: memref<1x512xf32, #tpu.memory_space<vmem>>, %arg6: memref<1536x512xbf16, #tpu.memory_space<vmem>>, %arg7: memref<1x512xf32, #tpu.memory_space<vmem>>, %arg8: memref<512x512xbf16, #tpu.memory_space<vmem>>, %arg9: memref<1x512xf32, #tpu.memory_space<vmem>>, %arg10: memref<512x1500xbf16, #tpu.memory_space<vmem>>, %arg11: memref<1x1500xf32, #tpu.memory_space<vmem>>, %arg12: memref<1500x7xbf16, #tpu.memory_space<vmem>>, %arg13: memref<1x7xf32, #tpu.memory_space<vmem>>, %arg14: memref<1x7xf32, #tpu.memory_space<vmem>>, %arg15: memref<1x7xf32, #tpu.memory_space<vmem>>, %arg16: memref<1x6x7xf32, #tpu.memory_space<vmem>>) attributes {dimension_semantics = [#tpu.dimension_semantics<parallel>], iteration_bounds = array<i64: 2>, scalar_prefetch = 0 : i64, scratch_operands = 0 : i64, tpu.core_type = #tpu.core_type<tc>, window_params = [{transform_indices = @transform_0, window_bounds = array<i64: 1, 16, 80>}, {pipeline_mode = #tpu.pipeline_mode<synchronous>, transform_indices = @transform_1, window_bounds = array<i64: 80, 512>}, {pipeline_mode = #tpu.pipeline_mode<synchronous>, transform_indices = @transform_2, window_bounds = array<i64: 1, 512>}, {pipeline_mode = #tpu.pipeline_mode<synchronous>, transform_indices = @transform_3, window_bounds = array<i64: 1536, 512>}, {pipeline_mode = #tpu.pipeline_mode<synchronous>, transform_indices = @transform_4, window_bounds = array<i64: 1, 512>}, {pipeline_mode = #tpu.pipeline_mode<synchronous>, transform_indices = @transform_5, window_bounds = array<i64: 1536, 512>}, {pipeline_mode = #tpu.pipeline_mode<synchronous>, transform_indices = @transform_6, window_bounds = array<i64: 1, 512>}, {pipeline_mode = #tpu.pipeline_mode<synchronous>, transform_indices = @transform_7, window_bounds = array<i64: 512, 512>}, {pipeline_mode = #tpu.pipeline_mode<synchronous>, transform_indices = @transform_8, window_bounds = array<i64: 1, 512>}, {pipeline_mode = #tpu.pipeline_mode<synchronous>, transform_indices = @transform_9, window_bounds = array<i64: 512, 1500>}, {pipeline_mode = #tpu.pipeline_mode<synchronous>, transform_indices = @transform_10, window_bounds = array<i64: 1, 1500>}, {pipeline_mode = #tpu.pipeline_mode<synchronous>, transform_indices = @transform_11, window_bounds = array<i64: 1500, 7>}, {pipeline_mode = #tpu.pipeline_mode<synchronous>, transform_indices = @transform_12, window_bounds = array<i64: 1, 7>}, {pipeline_mode = #tpu.pipeline_mode<synchronous>, transform_indices = @transform_13, window_bounds = array<i64: 1, 7>}, {pipeline_mode = #tpu.pipeline_mode<synchronous>, transform_indices = @transform_14, window_bounds = array<i64: 1, 7>}, {transform_indices = @transform_15, window_bounds = array<i64: 1, 6, 7>}]} {
    %c0 = arith.constant 0 : index
    %c0_0 = arith.constant 0 : index
    %c0_1 = arith.constant 0 : index
    %0 = vector.load %arg1[%c0, %c0_0, %c0_1] : memref<1x16x80xf32, #tpu.memory_space<vmem>>, vector<1x16x80xf32>
    %1 = vector.shape_cast %0 : vector<1x16x80xf32> to vector<16x80xf32>
    %2 = arith.truncf %1 : vector<16x80xf32> to vector<16x80xbf16>
    %c0_2 = arith.constant 0 : index
    %c0_3 = arith.constant 0 : index
    %3 = vector.load %arg2[%c0_2, %c0_3] : memref<80x512xbf16, #tpu.memory_space<vmem>>, vector<80x512xbf16>
    %cst = arith.constant dense<0.000000e+00> : vector<16x512xf32>
    %4 = tpu.matmul %2, %3, %cst {dimension_numbers = #tpu.dot_dimension_numbers<[1], [0], [0], [1], [0, 0, 1, 1], [], []>} : vector<16x80xbf16>, vector<80x512xbf16>, vector<16x512xf32> -> vector<16x512xf32>
    %c0_4 = arith.constant 0 : index
    %c0_5 = arith.constant 0 : index
    %5 = vector.load %arg3[%c0_4, %c0_5] : memref<1x512xf32, #tpu.memory_space<vmem>>, vector<1x512xf32>
    %6 = vector.broadcast %5 : vector<1x512xf32> to vector<16x512xf32>
    %7 = arith.addf %4, %6 : vector<16x512xf32>
    %cst_6 = arith.constant 0.000000e+00 : f32
    %8 = vector.broadcast %cst_6 : f32 to vector<16x512xf32>
    %9 = arith.maximumf %7, %8 : vector<16x512xf32>
    %10 = vector.extract_strided_slice %9 {offsets = [0, 0], sizes = [12, 512], strides = [1, 1]} : vector<16x512xf32> to vector<12x512xf32>
    %11 = vector.extract_strided_slice %9 {offsets = [2, 0], sizes = [12, 512], strides = [1, 1]} : vector<16x512xf32> to vector<12x512xf32>
    %12 = vector.extract_strided_slice %9 {offsets = [4, 0], sizes = [12, 512], strides = [1, 1]} : vector<16x512xf32> to vector<12x512xf32>
    %13 = tpu.concatenate %10, %11, %12 in 1 : vector<12x512xf32>, vector<12x512xf32>, vector<12x512xf32> -> vector<12x1536xf32>
    %14 = arith.truncf %13 : vector<12x1536xf32> to vector<12x1536xbf16>
    %c0_7 = arith.constant 0 : index
    %c0_8 = arith.constant 0 : index
    %15 = vector.load %arg4[%c0_7, %c0_8] : memref<1536x512xbf16, #tpu.memory_space<vmem>>, vector<1536x512xbf16>
    %cst_9 = arith.constant dense<0.000000e+00> : vector<12x512xf32>
    %16 = tpu.matmul %14, %15, %cst_9 {dimension_numbers = #tpu.dot_dimension_numbers<[1], [0], [0], [1], [0, 0, 1, 1], [], []>} : vector<12x1536xbf16>, vector<1536x512xbf16>, vector<12x512xf32> -> vector<12x512xf32>
    %c0_10 = arith.constant 0 : index
    %c0_11 = arith.constant 0 : index
    %17 = vector.load %arg5[%c0_10, %c0_11] : memref<1x512xf32, #tpu.memory_space<vmem>>, vector<1x512xf32>
    %18 = vector.broadcast %17 : vector<1x512xf32> to vector<12x512xf32>
    %19 = arith.addf %16, %18 : vector<12x512xf32>
    %cst_12 = arith.constant 0.000000e+00 : f32
    %20 = vector.broadcast %cst_12 : f32 to vector<12x512xf32>
    %21 = arith.maximumf %19, %20 : vector<12x512xf32>
    %22 = vector.extract_strided_slice %21 {offsets = [0, 0], sizes = [6, 512], strides = [1, 1]} : vector<12x512xf32> to vector<6x512xf32>
    %23 = vector.extract_strided_slice %21 {offsets = [3, 0], sizes = [6, 512], strides = [1, 1]} : vector<12x512xf32> to vector<6x512xf32>
    %24 = vector.extract_strided_slice %21 {offsets = [6, 0], sizes = [6, 512], strides = [1, 1]} : vector<12x512xf32> to vector<6x512xf32>
    %25 = tpu.concatenate %22, %23, %24 in 1 : vector<6x512xf32>, vector<6x512xf32>, vector<6x512xf32> -> vector<6x1536xf32>
    %26 = arith.truncf %25 : vector<6x1536xf32> to vector<6x1536xbf16>
    %c0_13 = arith.constant 0 : index
    %c0_14 = arith.constant 0 : index
    %27 = vector.load %arg6[%c0_13, %c0_14] : memref<1536x512xbf16, #tpu.memory_space<vmem>>, vector<1536x512xbf16>
    %cst_15 = arith.constant dense<0.000000e+00> : vector<6x512xf32>
    %28 = tpu.matmul %26, %27, %cst_15 {dimension_numbers = #tpu.dot_dimension_numbers<[1], [0], [0], [1], [0, 0, 1, 1], [], []>} : vector<6x1536xbf16>, vector<1536x512xbf16>, vector<6x512xf32> -> vector<6x512xf32>
    %c0_16 = arith.constant 0 : index
    %c0_17 = arith.constant 0 : index
    %29 = vector.load %arg7[%c0_16, %c0_17] : memref<1x512xf32, #tpu.memory_space<vmem>>, vector<1x512xf32>
    %30 = vector.broadcast %29 : vector<1x512xf32> to vector<6x512xf32>
    %31 = arith.addf %28, %30 : vector<6x512xf32>
    %cst_18 = arith.constant 0.000000e+00 : f32
    %32 = vector.broadcast %cst_18 : f32 to vector<6x512xf32>
    %33 = arith.maximumf %31, %32 : vector<6x512xf32>
    %34 = arith.truncf %33 : vector<6x512xf32> to vector<6x512xbf16>
    %c0_19 = arith.constant 0 : index
    %c0_20 = arith.constant 0 : index
    %35 = vector.load %arg8[%c0_19, %c0_20] : memref<512x512xbf16, #tpu.memory_space<vmem>>, vector<512x512xbf16>
    %cst_21 = arith.constant dense<0.000000e+00> : vector<6x512xf32>
    %36 = tpu.matmul %34, %35, %cst_21 {dimension_numbers = #tpu.dot_dimension_numbers<[1], [0], [0], [1], [0, 0, 1, 1], [], []>} : vector<6x512xbf16>, vector<512x512xbf16>, vector<6x512xf32> -> vector<6x512xf32>
    %c0_22 = arith.constant 0 : index
    %c0_23 = arith.constant 0 : index
    %37 = vector.load %arg9[%c0_22, %c0_23] : memref<1x512xf32, #tpu.memory_space<vmem>>, vector<1x512xf32>
    %38 = vector.broadcast %37 : vector<1x512xf32> to vector<6x512xf32>
    %39 = arith.addf %36, %38 : vector<6x512xf32>
    %cst_24 = arith.constant 0.000000e+00 : f32
    %40 = vector.broadcast %cst_24 : f32 to vector<6x512xf32>
    %41 = arith.maximumf %39, %40 : vector<6x512xf32>
    %42 = arith.truncf %41 : vector<6x512xf32> to vector<6x512xbf16>
    %c0_25 = arith.constant 0 : index
    %c0_26 = arith.constant 0 : index
    %43 = vector.load %arg10[%c0_25, %c0_26] : memref<512x1500xbf16, #tpu.memory_space<vmem>>, vector<512x1500xbf16>
    %cst_27 = arith.constant dense<0.000000e+00> : vector<6x1500xf32>
    %44 = tpu.matmul %42, %43, %cst_27 {dimension_numbers = #tpu.dot_dimension_numbers<[1], [0], [0], [1], [0, 0, 1, 1], [], []>} : vector<6x512xbf16>, vector<512x1500xbf16>, vector<6x1500xf32> -> vector<6x1500xf32>
    %c0_28 = arith.constant 0 : index
    %c0_29 = arith.constant 0 : index
    %45 = vector.load %arg11[%c0_28, %c0_29] : memref<1x1500xf32, #tpu.memory_space<vmem>>, vector<1x1500xf32>
    %46 = vector.broadcast %45 : vector<1x1500xf32> to vector<6x1500xf32>
    %47 = arith.addf %44, %46 : vector<6x1500xf32>
    %cst_30 = arith.constant 0.000000e+00 : f32
    %48 = vector.broadcast %cst_30 : f32 to vector<6x1500xf32>
    %49 = arith.maximumf %47, %48 : vector<6x1500xf32>
    %50 = arith.truncf %49 : vector<6x1500xf32> to vector<6x1500xbf16>
    %c0_31 = arith.constant 0 : index
    %c0_32 = arith.constant 0 : index
    %51 = vector.load %arg12[%c0_31, %c0_32] : memref<1500x7xbf16, #tpu.memory_space<vmem>>, vector<1500x7xbf16>
    %cst_33 = arith.constant dense<0.000000e+00> : vector<6x7xf32>
    %52 = tpu.matmul %50, %51, %cst_33 {dimension_numbers = #tpu.dot_dimension_numbers<[1], [0], [0], [1], [0, 0, 1, 1], [], []>} : vector<6x1500xbf16>, vector<1500x7xbf16>, vector<6x7xf32> -> vector<6x7xf32>
    %c0_34 = arith.constant 0 : index
    %c0_35 = arith.constant 0 : index
    %53 = vector.load %arg13[%c0_34, %c0_35] : memref<1x7xf32, #tpu.memory_space<vmem>>, vector<1x7xf32>
    %54 = vector.broadcast %53 : vector<1x7xf32> to vector<6x7xf32>
    %55 = arith.addf %52, %54 : vector<6x7xf32>
    %cst_36 = arith.constant 0.000000e+00 : f32
    %56 = vector.broadcast %cst_36 : f32 to vector<6x7xf32>
    %57 = arith.maximumf %55, %56 : vector<6x7xf32>
    %c0_37 = arith.constant 0 : index
    %c0_38 = arith.constant 0 : index
    %58 = vector.load %arg14[%c0_37, %c0_38] : memref<1x7xf32, #tpu.memory_space<vmem>>, vector<1x7xf32>
    %59 = vector.broadcast %58 : vector<1x7xf32> to vector<6x7xf32>
    %60 = arith.mulf %57, %59 : vector<6x7xf32>
    %c0_39 = arith.constant 0 : index
    %c0_40 = arith.constant 0 : index
    %61 = vector.load %arg15[%c0_39, %c0_40] : memref<1x7xf32, #tpu.memory_space<vmem>>, vector<1x7xf32>
    %62 = vector.broadcast %61 : vector<1x7xf32> to vector<6x7xf32>
    %63 = arith.addf %60, %62 : vector<6x7xf32>
    %cst_41 = arith.constant dense<0xFF800000> : vector<6xf32>
    %64 = vector.multi_reduction <maximumf>, %63, %cst_41 [1] : vector<6x7xf32> to vector<6xf32>
    %65 = vector.shape_cast %64 : vector<6xf32> to vector<6x1xf32>
    %66 = vector.broadcast %65 : vector<6x1xf32> to vector<6x7xf32>
    %67 = arith.subf %63, %66 : vector<6x7xf32>
    %68 = math.exp %67 : vector<6x7xf32>
    %cst_42 = arith.constant dense<0.000000e+00> : vector<6xf32>
    %69 = vector.multi_reduction <add>, %68, %cst_42 [1] : vector<6x7xf32> to vector<6xf32>
    %70 = vector.shape_cast %69 : vector<6xf32> to vector<6x1xf32>
    %71 = tpu.reciprocal %70 {approx = true} : vector<6x1xf32> -> vector<6x1xf32>
    %72 = vector.broadcast %71 : vector<6x1xf32> to vector<6x7xf32>
    %73 = arith.mulf %68, %72 : vector<6x7xf32>
    %c0_43 = arith.constant 0 : index
    %c0_44 = arith.constant 0 : index
    %c0_45 = arith.constant 0 : index
    %74 = vector.load %arg16[%c0_43, %c0_44, %c0_45] : memref<1x6x7xf32, #tpu.memory_space<vmem>>, vector<1x6x7xf32>
    %75 = vector.shape_cast %74 : vector<1x6x7xf32> to vector<6x7xf32>
    %76 = vector.shape_cast %73 : vector<6x7xf32> to vector<1x6x7xf32>
    tpu.vector_store %arg16[%c0_43, %c0_44, %c0_45], %76 {strides = array<i32>} : memref<1x6x7xf32, #tpu.memory_space<vmem>>, vector<1x6x7xf32>,
    return
  }
  func.func @transform_0(%arg0: i32) -> (i32, i32, i32) {
    %c0_i32 = arith.constant 0 : i32
    %c0_i32_0 = arith.constant 0 : i32
    %c0_i32_1 = arith.constant 0 : i32
    return %arg0, %c0_i32, %c0_i32_0 : i32, i32, i32
  }
  func.func @transform_1(%arg0: i32) -> (i32, i32) {
    %c0_i32 = arith.constant 0 : i32
    %c0_i32_0 = arith.constant 0 : i32
    %c0_i32_1 = arith.constant 0 : i32
    return %c0_i32, %c0_i32_0 : i32, i32
  }
  func.func @transform_2(%arg0: i32) -> (i32, i32) {
    %c0_i32 = arith.constant 0 : i32
    %c0_i32_0 = arith.constant 0 : i32
    %c0_i32_1 = arith.constant 0 : i32
    return %c0_i32, %c0_i32_0 : i32, i32
  }
  func.func @transform_3(%arg0: i32) -> (i32, i32) {
    %c0_i32 = arith.constant 0 : i32
    %c0_i32_0 = arith.constant 0 : i32
    %c0_i32_1 = arith.constant 0 : i32
    return %c0_i32, %c0_i32_0 : i32, i32
  }
  func.func @transform_4(%arg0: i32) -> (i32, i32) {
    %c0_i32 = arith.constant 0 : i32
    %c0_i32_0 = arith.constant 0 : i32
    %c0_i32_1 = arith.constant 0 : i32
    return %c0_i32, %c0_i32_0 : i32, i32
  }
  func.func @transform_5(%arg0: i32) -> (i32, i32) {
    %c0_i32 = arith.constant 0 : i32
    %c0_i32_0 = arith.constant 0 : i32
    %c0_i32_1 = arith.constant 0 : i32
    return %c0_i32, %c0_i32_0 : i32, i32
  }
  func.func @transform_6(%arg0: i32) -> (i32, i32) {
    %c0_i32 = arith.constant 0 : i32
    %c0_i32_0 = arith.constant 0 : i32
    %c0_i32_1 = arith.constant 0 : i32
    return %c0_i32, %c0_i32_0 : i32, i32
  }
  func.func @transform_7(%arg0: i32) -> (i32, i32) {
    %c0_i32 = arith.constant 0 : i32
    %c0_i32_0 = arith.constant 0 : i32
    %c0_i32_1 = arith.constant 0 : i32
    return %c0_i32, %c0_i32_0 : i32, i32
  }
  func.func @transform_8(%arg0: i32) -> (i32, i32) {
    %c0_i32 = arith.constant 0 : i32
    %c0_i32_0 = arith.constant 0 : i32
    %c0_i32_1 = arith.constant 0 : i32
    return %c0_i32, %c0_i32_0 : i32, i32
  }
  func.func @transform_9(%arg0: i32) -> (i32, i32) {
    %c0_i32 = arith.constant 0 : i32
    %c0_i32_0 = arith.constant 0 : i32
    %c0_i32_1 = arith.constant 0 : i32
    return %c0_i32, %c0_i32_0 : i32, i32
  }
  func.func @transform_10(%arg0: i32) -> (i32, i32) {
    %c0_i32 = arith.constant 0 : i32
    %c0_i32_0 = arith.constant 0 : i32
    %c0_i32_1 = arith.constant 0 : i32
    return %c0_i32, %c0_i32_0 : i32, i32
  }
  func.func @transform_11(%arg0: i32) -> (i32, i32) {
    %c0_i32 = arith.constant 0 : i32
    %c0_i32_0 = arith.constant 0 : i32
    %c0_i32_1 = arith.constant 0 : i32
    return %c0_i32, %c0_i32_0 : i32, i32
  }
  func.func @transform_12(%arg0: i32) -> (i32, i32) {
    %c0_i32 = arith.constant 0 : i32
    %c0_i32_0 = arith.constant 0 : i32
    %c0_i32_1 = arith.constant 0 : i32
    return %c0_i32, %c0_i32_0 : i32, i32
  }
  func.func @transform_13(%arg0: i32) -> (i32, i32) {
    %c0_i32 = arith.constant 0 : i32
    %c0_i32_0 = arith.constant 0 : i32
    %c0_i32_1 = arith.constant 0 : i32
    return %c0_i32, %c0_i32_0 : i32, i32
  }
  func.func @transform_14(%arg0: i32) -> (i32, i32) {
    %c0_i32 = arith.constant 0 : i32
    %c0_i32_0 = arith.constant 0 : i32
    %c0_i32_1 = arith.constant 0 : i32
    return %c0_i32, %c0_i32_0 : i32, i32
  }
  func.func @transform_15(%arg0: i32) -> (i32, i32, i32) {
    %c0_i32 = arith.constant 0 : i32
    %c0_i32_0 = arith.constant 0 : i32
    %c0_i32_1 = arith.constant 0 : i32
    return %arg0, %c0_i32, %c0_i32_0 : i32, i32, i32
  }
}

</mosaic_0001>

<bundles_post_ra>
// kernel: net_forward.1
= control target key start
LH: loop header
LB: loop body
LE: loop exit
PB: predicated region body
PF: predicated region fallthrough
CT: control target
= control target key end

     0   :  { %s15270_s18 = smov 0   ;;  %s19732_s0 = inlined_call_operand.vmem [shape: f32[2,16,80], index: 0, kind: input, shape index: {}]   ;;  %s19733_s1 = inlined_call_operand.vmem [shape: bf16[80,512], index: 1, kind: input, shape index: {}]   ;;  %s19734_s2 = inlined_call_operand.vmem [shape: f32[1,512], index: 2, kind: input, shape index: {}]   ;;  %s19735_s3 = inlined_call_operand.vmem [shape: bf16[1536,512], index: 3, kind: input, shape index: {}]   ;;  %s19736_s4 = inlined_call_operand.vmem [shape: f32[1,512], index: 4, kind: input, shape index: {}]   ;;  %s19737_s5 = inlined_call_operand.vmem [shape: bf16[1536,512], index: 5, kind: input, shape index: {}]   ;;  %s19738_s6 = inlined_call_operand.vmem [shape: f32[1,512], index: 6, kind: input, shape index: {}]   ;;  %s19739_s7 = inlined_call_operand.vmem [shape: bf16[512,512], index: 7, kind: input, shape index: {}]   ;;  %s19740_s8 = inlined_call_operand.vmem [shape: f32[1,512], index: 8, kind: input, shape index: {}]   ;;  %s19741_s9 = inlined_call_operand.vmem [shape: bf16[512,1500], index: 9, kind: input, shape index: {}]   ;;  %s19742_s10 = inlined_call_operand.vmem [shape: f32[1,1500], index: 10, kind: input, shape index: {}]   ;;  %s19743_s11 = inlined_call_operand.vmem [shape: bf16[1500,7], index: 11, kind: input, shape index: {}]   ;;  %s19744_s12 = inlined_call_operand.vmem [shape: f32[1,7], index: 12, kind: input, shape index: {}]   ;;  %s19745_s13 = inlined_call_operand.vmem [shape: f32[1,7], index: 13, kind: input, shape index: {}]   ;;  %s19746_s14 = inlined_call_operand.vmem [shape: f32[1,7], index: 14, kind: input, shape index: {}]   ;;  %s19747_s15 = inlined_call_operand.vmem [shape: f32[2,6,7], index: 15, kind: output, shape index: {}]  }
   0x1 LB: > { %s11463_s19 = sadd.s32 4294967295, %s15187_s18   ;;  %p11467_p0 = scmp.ge.s32.totalorder %s15187_s18, 1  ;;  %s15187_s18 = sphi %s15270_s18, %s25_s18  }
   0x2   : > { %p437_p1 = scmp.lt.s32.totalorder %s15187_s18, 3 }
   0x4   : > { %p438_p2 = pnand %p11467_p0, %p437_p1 }
   0x5   : > { %v13133_v0 = vld [vmem:[%s19733_s1 + $0x4] ss:$16 sps:$4 sm:$0xff] (!%p438_p2)   ;;  %p484_p3 = scmp.lt.s32.totalorder (!%p438_p2), %s11463_s19, 1  ;;  %v13135_v1 = vld [vmem:[%s19733_s1] ss:$16 sps:$4 sm:$0xff] (!%p438_p2)   ;;  %v15189_v2 = vmov (!%p438_p2), 0  }
   0x6   : > { %441 = sbr.rel (%p438_p2) target bundleno = 2693 (0xa85), region = 80  ;;  %675 = vmatprep.mubr.bf16.mxu0 (!%p438_p2), %v15189_v2  ;;  %643 = vmatprep.subr.bf16.mxu0 (!%p438_p2), %v13133_v0  ;;  %v13136_v3 = vld [vmem:[%s19733_s1 + $0x24] ss:$16 sps:$4 sm:$0xff] (!%p438_p2)   ;;  %v13138_v4 = vld [vmem:[%s19733_s1 + $0x20] ss:$16 sps:$4 sm:$0xff] (!%p438_p2)   ;;  %vm639_vm0 = vcmask (!%p438_p2), 654336  }
   0x7   : > { %644 = vmatpush1.bf16.msra.mxu0 (!%p438_p2), %v13135_v1  ;;  %v13139_v5 = vld [vmem:[%s19733_s1 + $0x44] ss:$16 sps:$4 sm:$0xff] (!%p438_p2)   ;;  %v13141_v6 = vld [vmem:[%s19733_s1 + $0x40] ss:$16 sps:$4 sm:$0xff] (!%p438_p2)   ;;  %v13150_v13 = vld [vmem:[%s19733_s1 + $0xc] ss:$16 sps:$4 sm:$0xff] (!%p438_p2)  }
   0x8   : > { %645 = vmatprep.subr.bf16.mxu0 (!%p438_p2), %v13136_v3  ;;  %v13142_v7 = vld [vmem:[%s19733_s1 + $0x64] ss:$16 sps:$4 sm:$0xff] (!%p438_p2)   ;;  %v13144_v8 = vld [vmem:[%s19733_s1 + $0x60] ss:$16 sps:$4 sm:$0xff] (!%p438_p2)   ;;  %v13166_v14 = vld [vmem:[%s19735_s3 + $0xc] ss:$16 sps:$4 sm:$0xff] (!%p438_p2)  }
   0x9   : > { %v13145_v9 = vld [vmem:[%s19733_s1 + $0x84] ss:$16 sps:$4 sm:$0xff] (!%p438_p2)   ;;  %v13147_v10 = vld [vmem:[%s19733_s1 + $0x80] ss:$16 sps:$4 sm:$0xff] (!%p438_p2)   ;;  %v13168_v15 = vld [vmem:[%s19735_s3 + $0x8] ss:$16 sps:$4 sm:$0xff] (!%p438_p2)   ;;  %3383 = vmatprep.subr.bf16.mxu1 (!%p438_p2), %v13166_v14 }
   0xa   : > { %v13172_v17 = vld [vmem:[%s19735_s3 + $0x2c] ss:$16 sps:$4 sm:$0xff] (!%p438_p2)   ;;  %v13148_v18 = vld [vmem:[%s19733_s1 + $0x8] ss:$16 sps:$4 sm:$0xff] (!%p438_p2)   ;;  %3384 = vmatpush1.bf16.msra.mxu1 (!%p438_p2), %v13168_v15  ;;  %v13165_v35 = vld [vmem:[%s19735_s3 + $0x4] ss:$16 sps:$4 sm:$0xff] (!%p438_p2)  }
   0xb   : > { %646 = vmatpush1.bf16.msra.mxu0 (!%p438_p2), %v13138_v4  ;;  %v13153_v19 = vld [vmem:[%s19733_s1 + $0x2c] ss:$16 sps:$4 sm:$0xff] (!%p438_p2)   ;;  %3385 = vmatprep.subr.bf16.mxu1 (!%p438_p2), %v13172_v17  ;;  %v13174_v20 = vld [vmem:[%s19735_s3 + $0x28] ss:$16 sps:$4 sm:$0xff] (!%p438_p2)   ;;  %v13163_v38 = vld [vmem:[%s19735_s3] ss:$16 sps:$4 sm:$0xff] (!%p438_p2)  }
   0xc   : > { %647 = vmatprep.subr.bf16.mxu0 (!%p438_p2), %v13139_v5  ;;  %v13178_v21 = vld [vmem:[%s19735_s3 + $0x4c] ss:$16 sps:$4 sm:$0xff] (!%p438_p2)   ;;  %v13151_v22 = vld [vmem:[%s19733_s1 + $0x28] ss:$16 sps:$4 sm:$0xff] (!%p438_p2)   ;;  %v13171_v39 = vld [vmem:[%s19735_s3 + $0x24] ss:$16 sps:$4 sm:$0xff] (!%p438_p2)  }
   0xd   : > { %s19749_s19 = smov (!%p484_p3, %s11463_s19), 1  ;;  %v13156_v23 = vld [vmem:[%s19733_s1 + $0x4c] ss:$16 sps:$4 sm:$0xff]   ;;  %v13180_v24 = vld [vmem:[%s19735_s3 + $0x48] ss:$16 sps:$4 sm:$0xff]   ;;  %vm745_vm1 = vcmask 1045504  }
   0xe   : > { %s12873_s17 = sshll.u32 %s19749_s19, 4  ;;  %3386 = vmatpush1.bf16.msra.mxu1 %v13174_v20  ;;  %v13184_v25 = vld [vmem:[%s19735_s3 + $0x6c] ss:$16 sps:$4 sm:$0xff]   ;;  %v13154_v26 = vld [vmem:[%s19733_s1 + $0x48] ss:$16 sps:$4 sm:$0xff]   ;;  %vm766_vm2 = vcmask 1043456  }
   0xf   : > { %s488_s24 = scalar_lea.vmem %s19732_s0, %s12873_s17  ;;  %648 = vmatpush1.bf16.msra.mxu0 %v13141_v6  ;;  %3387 = vmatprep.subr.bf16.mxu1 %v13178_v21  ;;  %v13159_v27 = vld [vmem:[%s19733_s1 + $0x6c] ss:$16 sps:$4 sm:$0xff]   ;;  %v13186_v28 = vld [vmem:[%s19735_s3 + $0x68] ss:$16 sps:$4 sm:$0xff]   ;;  %v13169_v42 = vld [vmem:[%s19735_s3 + $0x20] ss:$16 sps:$4 sm:$0xff]  }
  0x10   : > { %649 = vmatprep.subr.bf16.mxu0 %v13142_v7  ;;  %v494_v11 = vld [vmem:[%s488_s24] sm:$0xff]  ;;  %v495_v12 = vld [vmem:[%s488_s24 + $0x8] sm:$0xff]  ;;  %vm3657_vm3 = vcmask 1044480   ;;  %vm3674_vm4 = vcmask 1041408   ;;  %vm11133_vm5 = vcmask 752640   ;;  %vm11397_vm6 = vcmask 54272  }
  0x11   : > { %v496_v16 = vpack.c.bf16 %v495_v12, %v494_v11  ;;  %v13190_v29 = vld [vmem:[%s19735_s3 + $0x8c] ss:$16 sps:$4 sm:$0xff]   ;;  %v13157_v30 = vld [vmem:[%s19733_s1 + $0x68] ss:$16 sps:$4 sm:$0xff]   ;;  %v13177_v43 = vld [vmem:[%s19735_s3 + $0x44] ss:$16 sps:$4 sm:$0xff]  }
  0x12   : > { %3388 = vmatpush1.bf16.msra.mxu1 %v13180_v24  ;;  %v13162_v31 = vld [vmem:[%s19733_s1 + $0x8c] ss:$16 sps:$4 sm:$0xff]   ;;  %v13192_v32 = vld [vmem:[%s19735_s3 + $0x88] ss:$16 sps:$4 sm:$0xff]   ;;  %v13175_v46 = vld [vmem:[%s19735_s3 + $0x40] ss:$16 sps:$4 sm:$0xff]  }
  0x13   : > { %650 = vmatpush1.bf16.msra.mxu0 %v13144_v8  ;;  %3389 = vmatprep.subr.bf16.mxu1 %v13184_v25  ;;  %v13196_v33 = vld [vmem:[%s19735_s3 + $0xac] ss:$16 sps:$4 sm:$0xff]   ;;  %v13160_v34 = vld [vmem:[%s19733_s1 + $0x88] ss:$16 sps:$4 sm:$0xff]   ;;  %v13183_v47 = vld [vmem:[%s19735_s3 + $0x64] ss:$16 sps:$4 sm:$0xff]  }
  0x14   : > { %651 = vmatprep.subr.bf16.mxu0 %v13145_v9  ;;  %v13198_v36 = vld [vmem:[%s19735_s3 + $0xa8] ss:$16 sps:$4 sm:$0xff]   ;;  %v13202_v37 = vld [vmem:[%s19735_s3 + $0xcc] ss:$16 sps:$4 sm:$0xff]   ;;  %v13181_v49 = vld [vmem:[%s19735_s3 + $0x60] ss:$16 sps:$4 sm:$0xff]  }
  0x15   : > { %v13204_v40 = vld [vmem:[%s19735_s3 + $0xc8] ss:$16 sps:$4 sm:$0xff]   ;;  %v13208_v41 = vld [vmem:[%s19735_s3 + $0xec] ss:$16 sps:$4 sm:$0xff]   ;;  %v13189_v51 = vld [vmem:[%s19735_s3 + $0x84] ss:$16 sps:$4 sm:$0xff]  }
  0x16   : > { %3390 = vmatpush1.bf16.msra.mxu1 %v13186_v28  ;;  %v13210_v44 = vld [vmem:[%s19735_s3 + $0xe8] ss:$16 sps:$4 sm:$0xff]   ;;  %v13214_v45 = vld [vmem:[%s19735_s3 + $0x10c] ss:$16 sps:$4 sm:$0xff]   ;;  %v13187_v54 = vld [vmem:[%s19735_s3 + $0x80] ss:$16 sps:$4 sm:$0xff]  }
  0x17   : > { %652 = vmatpush1.bf16.msra.mxu0 %v13147_v10  ;;  %3391 = vmatprep.subr.bf16.mxu1 %v13190_v29  ;;  %v13216_v48 = vld [vmem:[%s19735_s3 + $0x108] ss:$16 sps:$4 sm:$0xff]   ;;  %v13220_v50 = vld [vmem:[%s19735_s3 + $0x12c] ss:$16 sps:$4 sm:$0xff]   ;;  %v13195_v55 = vld [vmem:[%s19735_s3 + $0xa4] ss:$16 sps:$4 sm:$0xff]  }
  0x18   : > { %686 = vmatprep.subr.bf16.mxu0 %v13150_v13  ;;  %v13222_v52 = vld [vmem:[%s19735_s3 + $0x128] ss:$16 sps:$4 sm:$0xff]   ;;  %v13226_v53 = vld [vmem:[%s19735_s3 + $0x14c] ss:$16 sps:$4 sm:$0xff]   ;;  %v13193_v58 = vld [vmem:[%s19735_s3 + $0xa0] ss:$16 sps:$4 sm:$0xff]  }
  0x19   : > { %v13228_v56 = vld [vmem:[%s19735_s3 + $0x148] ss:$16 sps:$4 sm:$0xff]   ;;  %v13232_v57 = vld [vmem:[%s19735_s3 + $0x16c] ss:$16 sps:$4 sm:$0xff]   ;;  %v13201_v59 = vld [vmem:[%s19735_s3 + $0xc4] ss:$16 sps:$4 sm:$0xff]  }
  0x1a   : > { %11491 = vmatmul.mubr.msk.bf16.vlgmr.msra.gmra.mrb[0].mxu0 %vm639_vm0, %v496_v16  ;;  %3392 = vmatpush1.bf16.msra.mxu1 %v13192_v32  ;;  %v13234_v60 = vld [vmem:[%s19735_s3 + $0x168] ss:$16 sps:$4 sm:$0xff]   ;;  %v13238_v61 = vld [vmem:[%s19735_s3 + $0x18c] ss:$16 sps:$4 sm:$0xff]   ;;  %v13199_v62 = vld [vmem:[%s19735_s3 + $0xc0] ss:$16 sps:$4 sm:$0xff]  }
  0x1b   : > { %687 = vmatpush1.bf16.msra.mxu0 %v13148_v18  ;;  %718 = vmatprep.mubr.bf16.mxu0 %v15189_v2  ;;  %v13207_v63 = vld [vmem:[%s19735_s3 + $0xe4] ss:$16 sps:$4 sm:$0xff]   ;;  %v13240_v0 = vld [vmem:[%s19735_s3 + $0x188] ss:$16 sps:$4 sm:$0xff]   ;;  %v13244_v1 = vld [vmem:[%s19735_s3 + $0x1ac] ss:$16 sps:$4 sm:$0xff]  }
  0x1c   : > { %688 = vmatprep.subr.bf16.mxu0 %v13153_v19  ;;  %3393 = vmatprep.subr.bf16.mxu1 %v13196_v33  ;;  %v13205_v3 = vld [vmem:[%s19735_s3 + $0xe0] ss:$16 sps:$4 sm:$0xff]   ;;  %v13213_v4 = vld [vmem:[%s19735_s3 + $0x104] ss:$16 sps:$4 sm:$0xff]   ;;  %v13246_v5 = vld [vmem:[%s19735_s3 + $0x1a8] ss:$16 sps:$4 sm:$0xff]  }
  0x1d   : > { %v13211_v6 = vld [vmem:[%s19735_s3 + $0x100] ss:$16 sps:$4 sm:$0xff]   ;;  %v13219_v7 = vld [vmem:[%s19735_s3 + $0x124] ss:$16 sps:$4 sm:$0xff]   ;;  %v13250_v18 = vld [vmem:[%s19735_s3 + $0x1cc] ss:$16 sps:$4 sm:$0xff]  }
  0x1e   : > { %3394 = vmatpush1.bf16.msra.mxu1 %v13198_v36  ;;  %v13217_v8 = vld [vmem:[%s19735_s3 + $0x120] ss:$16 sps:$4 sm:$0xff]   ;;  %v13225_v9 = vld [vmem:[%s19735_s3 + $0x144] ss:$16 sps:$4 sm:$0xff]   ;;  %v13252_v20 = vld [vmem:[%s19735_s3 + $0x1c8] ss:$16 sps:$4 sm:$0xff]  }
  0x1f   : > { %689 = vmatpush1.bf16.msra.mxu0 %v13151_v22  ;;  %3395 = vmatprep.subr.bf16.mxu1 %v13202_v37  ;;  %v13223_v10 = vld [vmem:[%s19735_s3 + $0x140] ss:$16 sps:$4 sm:$0xff]   ;;  %v13231_v11 = vld [vmem:[%s19735_s3 + $0x164] ss:$16 sps:$4 sm:$0xff]   ;;  %v13256_v22 = vld [vmem:[%s19735_s3 + $0x1ec] ss:$16 sps:$4 sm:$0xff]  }
  0x20   : > { %690 = vmatprep.subr.bf16.mxu0 %v13156_v23  ;;  %v13229_v12 = vld [vmem:[%s19735_s3 + $0x160] ss:$16 sps:$4 sm:$0xff]   ;;  %v13237_v13 = vld [vmem:[%s19735_s3 + $0x184] ss:$16 sps:$4 sm:$0xff]   ;;  %v13258_v24 = vld [vmem:[%s19735_s3 + $0x1e8] ss:$16 sps:$4 sm:$0xff]  }
  0x21   : > { %v13235_v14 = vld [vmem:[%s19735_s3 + $0x180] ss:$16 sps:$4 sm:$0xff]   ;;  %v13243_v15 = vld [vmem:[%s19735_s3 + $0x1a4] ss:$16 sps:$4 sm:$0xff]   ;;  %s11470_s22 = sshll.u32 %s19749_s19, 3 }
  0x22   : > { %3396 = vmatpush1.bf16.msra.mxu1 %v13204_v40  ;;  %v13249_v17 = vld [vmem:[%s19735_s3 + $0x1c4] ss:$16 sps:$4 sm:$0xff]   ;;  %v13247_v19 = vld [vmem:[%s19735_s3 + $0x1c0] ss:$16 sps:$4 sm:$0xff]   ;;  %s492_s26 = scalar_lea.vmem %s19747_s15, %s11470_s22 }
  0x23   : > { %691 = vmatpush1.bf16.msra.mxu0 %v13154_v26  ;;  %3397 = vmatprep.subr.bf16.mxu1 %v13208_v41  ;;  %v13255_v21 = vld [vmem:[%s19735_s3 + $0x1e4] ss:$16 sps:$4 sm:$0xff]   ;;  %v13253_v23 = vld [vmem:[%s19735_s3 + $0x1e0] ss:$16 sps:$4 sm:$0xff]   ;;  %v13264_v26 = vld [vmem:[%s19735_s3 + $0x20c] ss:$16 sps:$4 sm:$0xff]  }
  0x24   : > { %692 = vmatprep.subr.bf16.mxu0 %v13159_v27  ;;  %v13261_v25 = vld [vmem:[%s19735_s3 + $0x204] ss:$16 sps:$4 sm:$0xff]   ;;  %v519_v27 = vlaneseq }
  0x26   : > { %3398 = vmatpush1.bf16.msra.mxu1 %v13210_v44  ;;  %v15546_v28 = vshrl.u32 %v519_v27, 7 }
  0x27   : > { %693 = vmatpush1.bf16.msra.mxu0 %v13157_v30  ;;  %3399 = vmatprep.subr.bf16.mxu1 %v13214_v45  ;;  %v15554_v30 = vld [vmem:[%s19734_s2] sm:$0xf] }
  0x28   : > { %694 = vmatprep.subr.bf16.mxu0 %v13162_v31  ;;  %v15549_v29 = vsub.s32 0, %v15546_v28  ;;  %v15557_v31 = vsub.s32 1, %v15546_v28 }
  0x2a   : > { %3400 = vmatpush1.bf16.msra.mxu1 %v13216_v48  ;;  %v522_v32 = vrot.slane %v15554_v30, %v15549_v29  ;;  %v526_v33 = vrot.slane %v15554_v30, %v15557_v31  ;;  %v13259_v48 = vld [vmem:[%s19735_s3 + $0x200] ss:$16 sps:$4 sm:$0xff]  }
  0x2b   : > { %695 = vmatpush1.bf16.msra.mxu0 %v13160_v34  ;;  %3401 = vmatprep.subr.bf16.mxu1 %v13220_v50 }
  0x2c   : > { %3125 = vmatprep.subr.bf16.mxu0 %v13165_v35 }
  0x2e   : > { %11492 = vmatmul.mubr.msk.bf16.vlgmr.msra.gmra.mrb[4].mxu0 %vm639_vm0, %v496_v16  ;;  %3402 = vmatpush1.bf16.msra.mxu1 %v13222_v52  ;;  %v13241_v16 = vld [vmem:[%s19735_s3 + $0x1a0] ss:$16 sps:$4 sm:$0xff]  }
  0x2f   : > { %3126 = vmatpush1.bf16.msra.mxu0 %v13163_v38  ;;  %3403 = vmatprep.subr.bf16.mxu1 %v13226_v53 }
  0x30   : > { %3127 = vmatprep.subr.bf16.mxu0 %v13171_v39 }
  0x32   : > { %3404 = vmatpush1.bf16.msra.mxu1 %v13228_v56 }
  0x33   : > { %3128 = vmatpush1.bf16.msra.mxu0 %v13169_v42  ;;  %3405 = vmatprep.subr.bf16.mxu1 %v13232_v57 }
  0x34   : > { %3129 = vmatprep.subr.bf16.mxu0 %v13177_v43 }
  0x36   : > { %3406 = vmatpush1.bf16.msra.mxu1 %v13234_v60 }
  0x37   : > { %3130 = vmatpush1.bf16.msra.mxu0 %v13175_v46  ;;  %3407 = vmatprep.subr.bf16.mxu1 %v13238_v61 }
  0x38   : > { %3131 = vmatprep.subr.bf16.mxu0 %v13183_v47 }
  0x3a   : > { %3408 = vmatpush1.bf16.msra.mxu1 %v13240_v0 }
  0x3b   : > { %3132 = vmatpush1.bf16.msra.mxu0 %v13181_v49  ;;  %3409 = vmatprep.subr.bf16.mxu1 %v13244_v1  ;;  %v13262_v49 = vld [vmem:[%s19735_s3 + $0x208] ss:$16 sps:$4 sm:$0xff]  }
  0x3c   : > { %3133 = vmatprep.subr.bf16.mxu0 %v13189_v51 }
  0x3e   : > { %3410 = vmatpush1.bf16.msra.mxu1 %v13246_v5  ;;  %v13276_v5 = vld [vmem:[%s19735_s3 + $0x24c] ss:$16 sps:$4 sm:$0xff]  }
  0x3f   : > { %3134 = vmatpush1.bf16.msra.mxu0 %v13187_v54  ;;  %3411 = vmatprep.subr.bf16.mxu1 %v13250_v18  ;;  %v13267_v54 = vld [vmem:[%s19735_s3 + $0x224] ss:$16 sps:$4 sm:$0xff]  }
  0x40   : > { %3135 = vmatprep.subr.bf16.mxu0 %v13195_v55  ;;  %v13270_v55 = vld [vmem:[%s19735_s3 + $0x22c] ss:$16 sps:$4 sm:$0xff]  }
  0x42   : > { %3412 = vmatpush1.bf16.msra.mxu1 %v13252_v20  ;;  %v13285_v20 = vld [vmem:[%s19735_s3 + $0x284] ss:$16 sps:$4 sm:$0xff]  }
  0x43   : > { %3136 = vmatpush1.bf16.msra.mxu0 %v13193_v58  ;;  %3413 = vmatprep.subr.bf16.mxu1 %v13256_v22 }
  0x44   : > { %3137 = vmatprep.subr.bf16.mxu0 %v13201_v59 }
  0x46   : > { %3414 = vmatpush1.bf16.msra.mxu1 %v13258_v24  ;;  %v13283_v24 = vld [vmem:[%s19735_s3 + $0x280] ss:$16 sps:$4 sm:$0xff]  }
  0x47   : > { %3138 = vmatpush1.bf16.msra.mxu0 %v13199_v62  ;;  %3426 = vmatprep.subr.bf16.mxu1 %v13264_v26  ;;  %v13265_v62 = vld [vmem:[%s19735_s3 + $0x220] ss:$16 sps:$4 sm:$0xff]  }
  0x48   : > { %3139 = vmatprep.subr.bf16.mxu0 %v13207_v63  ;;  %v13268_v63 = vld [vmem:[%s19735_s3 + $0x228] ss:$16 sps:$4 sm:$0xff]  }
  0x4b   : > { %3140 = vmatpush1.bf16.msra.mxu0 %v13205_v3 }
  0x4c   : > { %3141 = vmatprep.subr.bf16.mxu0 %v13213_v4  ;;  %v13273_v4 = vld [vmem:[%s19735_s3 + $0x244] ss:$16 sps:$4 sm:$0xff]  }
  0x4f   : > { %3142 = vmatpush1.bf16.msra.mxu0 %v13211_v6 }
  0x50   : > { %3143 = vmatprep.subr.bf16.mxu0 %v13219_v7 }
  0x53   : > { %3144 = vmatpush1.bf16.msra.mxu0 %v13217_v8 }
  0x54   : > { %3145 = vmatprep.subr.bf16.mxu0 %v13225_v9  ;;  %v15600_v9 = vsub.s32 2, %v15546_v28 }
  0x57   : > { %3146 = vmatpush1.bf16.msra.mxu0 %v13223_v10  ;;  %v13271_v10 = vld [vmem:[%s19735_s3 + $0x240] ss:$16 sps:$4 sm:$0xff]  }
  0x58   : > { %3147 = vmatprep.subr.bf16.mxu0 %v13231_v11  ;;  %v15606_v11 = vsub.s32 3, %v15546_v28 }
  0x5a   : > { %v534_v18 = vrot.slane %v15554_v30, %v15606_v11 }
  0x5b   : > { %3148 = vmatpush1.bf16.msra.mxu0 %v13229_v12  ;;  %v13274_v12 = vld [vmem:[%s19735_s3 + $0x248] ss:$16 sps:$4 sm:$0xff]  }
  0x5c   : > { %3149 = vmatprep.subr.bf16.mxu0 %v13237_v13  ;;  %v13279_v13 = vld [vmem:[%s19735_s3 + $0x264] ss:$16 sps:$4 sm:$0xff]  }
  0x5f   : > { %3150 = vmatpush1.bf16.msra.mxu0 %v13235_v14  ;;  %v13282_v14 = vld [vmem:[%s19735_s3 + $0x26c] ss:$16 sps:$4 sm:$0xff]  }
  0x60   : > { %3151 = vmatprep.subr.bf16.mxu0 %v13243_v15  ;;  %v530_v15 = vrot.slane %v15554_v30, %v15600_v9  ;;  %v13291_v30 = vld [vmem:[%s19735_s3 + $0x2a4] ss:$16 sps:$4 sm:$0xff]  }
  0x63   : > { %3152 = vmatpush1.bf16.msra.mxu0 %v13241_v16  ;;  %v13277_v16 = vld [vmem:[%s19735_s3 + $0x260] ss:$16 sps:$4 sm:$0xff]  }
  0x64   : > { %3153 = vmatprep.subr.bf16.mxu0 %v13249_v17  ;;  %v13280_v17 = vld [vmem:[%s19735_s3 + $0x268] ss:$16 sps:$4 sm:$0xff]  }
  0x67   : > { %3154 = vmatpush1.bf16.msra.mxu0 %v13247_v19 }
  0x68   : > { %3155 = vmatprep.subr.bf16.mxu0 %v13255_v21  ;;  %v13288_v21 = vld [vmem:[%s19735_s3 + $0x28c] ss:$16 sps:$4 sm:$0xff]  }
  0x6b   : > { %3156 = vmatpush1.bf16.msra.mxu0 %v13253_v23 }
  0x6c   : > { %3168 = vmatprep.subr.bf16.mxu0 %v13261_v25  ;;  %v13286_v25 = vld [vmem:[%s19735_s3 + $0x288] ss:$16 sps:$4 sm:$0xff]  }
  0xed   : > { %v677_v34 = vpop.f32.mrb[0].mxu0 }
  0xee   : > { %v678_v35 = vadd.f32 %v677_v34, %v522_v32  ;;  %v679_v36 = vpop.f32.mrb[1].mxu0 }
  0xef   : > { %v680_v37 = vadd.f32 %v679_v36, %v526_v33  ;;  %v681_v38 = vpop.f32.mrb[2].mxu0 }
  0xf0   : > { %v729_v39 = vmax.f32 %v678_v35, 0.0  ;;  %v682_v40 = vadd.f32 %v681_v38, %v522_v32  ;;  %v683_v41 = vpop.f32.mrb[3].mxu0 }
  0xf1   : > { %v730_v42 = vmax.f32 %v680_v37, 0.0  ;;  %v684_v43 = vadd.f32 %v683_v41, %v526_v33  ;;  %v13294_v37 = vld [vmem:[%s19735_s3 + $0x2ac] ss:$16 sps:$4 sm:$0xff]  }
  0xf2   : > { %v733_v44 = vmax.f32 %v682_v40, 0.0  ;;  %v746_v45 = vrot.slane %v729_v39, 2  ;;  %v767_v46 = vrot.slane %v729_v39, 4 }
  0xf3   : > { %v734_v47 = vmax.f32 %v684_v43, 0.0  ;;  %v749_v50 = vrot.slane %v730_v42, 2  ;;  %v770_v56 = vrot.slane %v730_v42, 4 }
  0xf4   : > { %v747_v51 = vrot.slane %v733_v44, 2  ;;  %v768_v52 = vrot.slane %v733_v44, 4  ;;  %v787_v53 = vpack.c.bf16 %v733_v44, %v729_v39  ;;  %v13289_v44 = vld [vmem:[%s19735_s3 + $0x2a0] ss:$16 sps:$4 sm:$0xff]  }
  0xf5   : > { %v750_v57 = vrot.slane %v734_v47, 2  ;;  %v771_v58 = vrot.slane %v734_v47, 4  ;;  %v788_v59 = vpack.c.bf16 %v734_v47, %v730_v42 }
  0xf6   : > { %v748_v60 = vsel %vm745_vm1, %v746_v45, %v747_v51  ;;  %v769_v61 = vsel %vm766_vm2, %v767_v46, %v768_v52  ;;  %v13292_v45 = vld [vmem:[%s19735_s3 + $0x2a8] ss:$16 sps:$4 sm:$0xff]  }
  0xf7   : > { %3157 = vmatprep.mubr.bf16.mxu0 %v788_v59  ;;  %3415 = vmatprep.mubr.bf16.mxu1 %v788_v59  ;;  %v751_v0 = vsel %vm745_vm1, %v749_v50, %v750_v57  ;;  %v15584_v1 = vpack.c.bf16 %v747_v51, %v748_v60  ;;  %v772_v3 = vsel %vm766_vm2, %v770_v56, %v771_v58  ;;  %v13295_v56 = vld [vmem:[%s19735_s3 + $0x2c0] ss:$16 sps:$4 sm:$0xff]  }
  0xf8   : > { %3158 = vmatmul.mubr.bf16.vlgmr.msra.gmra.mrb[8].mxu0 %v787_v53  ;;  %3416 = vmatmul.mubr.bf16.vlgmr.msra.gmra.mrb[0].mxu1 %v787_v53  ;;  %v15593_v6 = vpack.c.bf16 %v750_v57, %v751_v0  ;;  %v15595_v7 = vpack.c.bf16 %v771_v58, %v772_v3  ;;  %v15597_v8 = vpack.c.bf16 %v768_v52, %v769_v61  ;;  %v13297_v52 = vld [vmem:[%s19735_s3 + $0x2c4] ss:$16 sps:$4 sm:$0xff]   ;;  %v13300_v53 = vld [vmem:[%s19735_s3 + $0x2cc] ss:$16 sps:$4 sm:$0xff]   ;;  %v13298_v57 = vld [vmem:[%s19735_s3 + $0x2c8] ss:$16 sps:$4 sm:$0xff]  }
  0xf9   : > { %3169 = vmatpush1.bf16.msra.mxu0 %v13259_v48  ;;  %3427 = vmatpush1.bf16.msra.mxu1 %v13262_v49  ;;  %v13303_v0 = vld [vmem:[%s19735_s3 + $0x2e4] ss:$16 sps:$4 sm:$0xff]   ;;  %v13306_v3 = vld [vmem:[%s19735_s3 + $0x2ec] ss:$16 sps:$4 sm:$0xff]  }
  0xfa   : > { %3170 = vmatprep.subr.bf16.mxu0 %v13267_v54  ;;  %3428 = vmatprep.subr.bf16.mxu1 %v13270_v55 }
  0xfd   : > { %3171 = vmatpush1.bf16.msra.mxu0 %v13265_v62  ;;  %3429 = vmatpush1.bf16.msra.mxu1 %v13268_v63 }
  0xfe   : > { %3172 = vmatprep.subr.bf16.mxu0 %v13273_v4  ;;  %3430 = vmatprep.subr.bf16.mxu1 %v13276_v5  ;;  %v13301_v4 = vld [vmem:[%s19735_s3 + $0x2e0] ss:$16 sps:$4 sm:$0xff]   ;;  %v13304_v5 = vld [vmem:[%s19735_s3 + $0x2e8] ss:$16 sps:$4 sm:$0xff]  }
 0x101   : > { %3173 = vmatpush1.bf16.msra.mxu0 %v13271_v10  ;;  %3431 = vmatpush1.bf16.msra.mxu1 %v13274_v12  ;;  %v720_v19 = vpop.f32.mrb[4].mxu0  ;;  %v13309_v10 = vld [vmem:[%s19735_s3 + $0x304] ss:$16 sps:$4 sm:$0xff]   ;;  %v13312_v12 = vld [vmem:[%s19735_s3 + $0x30c] ss:$16 sps:$4 sm:$0xff]  }
 0x102   : > { %3174 = vmatprep.subr.bf16.mxu0 %v13279_v13  ;;  %3432 = vmatprep.subr.bf16.mxu1 %v13282_v14  ;;  %v721_v22 = vadd.f32 %v720_v19, %v530_v15  ;;  %v722_v23 = vpop.f32.mrb[5].mxu0  ;;  %v13307_v13 = vld [vmem:[%s19735_s3 + $0x300] ss:$16 sps:$4 sm:$0xff]   ;;  %v13310_v14 = vld [vmem:[%s19735_s3 + $0x308] ss:$16 sps:$4 sm:$0xff]  }
 0x103   : > { %v723_v26 = vadd.f32 %v722_v23, %v534_v18  ;;  %v724_v27 = vpop.f32.mrb[6].mxu0  ;;  %v13321_v19 = vld [vmem:[%s19735_s3 + $0x344] ss:$16 sps:$4 sm:$0xff]  }
 0x104   : > { %v731_v32 = vmax.f32 %v721_v22, 0.0  ;;  %v725_v33 = vadd.f32 %v724_v27, %v530_v15  ;;  %v726_v34 = vpop.f32.mrb[7].mxu0  ;;  %v13315_v15 = vld [vmem:[%s19735_s3 + $0x324] ss:$16 sps:$4 sm:$0xff]   ;;  %v13322_v22 = vld [vmem:[%s19735_s3 + $0x348] ss:$16 sps:$4 sm:$0xff]  }
 0x105   : > { %3175 = vmatpush1.bf16.msra.mxu0 %v13277_v16  ;;  %3433 = vmatpush1.bf16.msra.mxu1 %v13280_v17  ;;  %v732_v35 = vmax.f32 %v723_v26, 0.0  ;;  %v727_v36 = vadd.f32 %v726_v34, %v534_v18  ;;  %v13318_v16 = vld [vmem:[%s19735_s3 + $0x32c] ss:$16 sps:$4 sm:$0xff]   ;;  %v13313_v17 = vld [vmem:[%s19735_s3 + $0x320] ss:$16 sps:$4 sm:$0xff]  }
 0x106   : > { %3176 = vmatprep.subr.bf16.mxu0 %v13285_v20  ;;  %3434 = vmatprep.subr.bf16.mxu1 %v13288_v21  ;;  %v752_v38 = vrot.slane %v731_v32, 2  ;;  %v773_v39 = vrot.slane %v731_v32, 4  ;;  %v735_v40 = vmax.f32 %v725_v33, 0.0  ;;  %v13316_v18 = vld [vmem:[%s19735_s3 + $0x328] ss:$16 sps:$4 sm:$0xff]  }
 0x107   : > { %v755_v41 = vrot.slane %v732_v35, 2  ;;  %v776_v42 = vrot.slane %v732_v35, 4  ;;  %v736_v43 = vmax.f32 %v727_v36, 0.0  ;;  %v13324_v20 = vld [vmem:[%s19735_s3 + $0x34c] ss:$16 sps:$4 sm:$0xff]  }
 0x108   : > { %v753_v46 = vrot.slane %v735_v40, 2  ;;  %v774_v47 = vrot.slane %v735_v40, 4  ;;  %v15651_v48 = vpack.c.bf16 %v735_v40, %v731_v32  ;;  %v13319_v21 = vld [vmem:[%s19735_s3 + $0x340] ss:$16 sps:$4 sm:$0xff]   ;;  %v13327_v23 = vld [vmem:[%s19735_s3 + $0x364] ss:$16 sps:$4 sm:$0xff]  }
 0x109   : > { %3177 = vmatpush1.bf16.msra.mxu0 %v13283_v24  ;;  %3435 = vmatpush1.bf16.msra.mxu1 %v13286_v25  ;;  %v756_v49 = vrot.slane %v736_v43, 2  ;;  %v777_v50 = vrot.slane %v736_v43, 4  ;;  %v790_v51 = vpack.c.bf16 %v736_v43, %v732_v35  ;;  %v13330_v24 = vld [vmem:[%s19735_s3 + $0x36c] ss:$16 sps:$4 sm:$0xff]   ;;  %v13325_v25 = vld [vmem:[%s19735_s3 + $0x360] ss:$16 sps:$4 sm:$0xff]  }
 0x10a   : > { %3178 = vmatprep.subr.bf16.mxu0 %v13291_v30  ;;  %3436 = vmatprep.subr.bf16.mxu1 %v13294_v37  ;;  %v754_v54 = vsel %vm745_vm1, %v752_v38, %v753_v46  ;;  %v775_v55 = vsel %vm766_vm2, %v773_v39, %v774_v47  ;;  %v13328_v26 = vld [vmem:[%s19735_s3 + $0x368] ss:$16 sps:$4 sm:$0xff]   ;;  %v13333_v27 = vld [vmem:[%s19735_s3 + $0x384] ss:$16 sps:$4 sm:$0xff]   ;;  %v13336_v30 = vld [vmem:[%s19735_s3 + $0x38c] ss:$16 sps:$4 sm:$0xff]  }
 0x10b   : > { %3200 = vmatprep.mubr.bf16.mxu0 %v790_v51  ;;  %3458 = vmatprep.mubr.bf16.mxu1 %v790_v51  ;;  %v757_v58 = vsel %vm745_vm1, %v755_v41, %v756_v49  ;;  %v15668_v59 = vpack.c.bf16 %v753_v46, %v754_v54  ;;  %v778_v60 = vsel %vm766_vm2, %v776_v42, %v777_v50  ;;  %v13331_v32 = vld [vmem:[%s19735_s3 + $0x380] ss:$16 sps:$4 sm:$0xff]   ;;  %v13334_v33 = vld [vmem:[%s19735_s3 + $0x388] ss:$16 sps:$4 sm:$0xff]   ;;  %v13339_v34 = vld [vmem:[%s19735_s3 + $0x3a4] ss:$16 sps:$4 sm:$0xff]  }
 0x10c   : > { %v15671_v61 = vpack.c.bf16 %v756_v49, %v757_v58  ;;  %v15673_v62 = vpack.c.bf16 %v777_v50, %v778_v60  ;;  %v15675_v63 = vpack.c.bf16 %v774_v47, %v775_v55  ;;  %v13342_v35 = vld [vmem:[%s19735_s3 + $0x3ac] ss:$16 sps:$4 sm:$0xff]   ;;  %v13337_v36 = vld [vmem:[%s19735_s3 + $0x3a0] ss:$16 sps:$4 sm:$0xff]   ;;  %v13340_v37 = vld [vmem:[%s19735_s3 + $0x3a8] ss:$16 sps:$4 sm:$0xff]  }
 0x10d   : > { %3179 = vmatpush1.bf16.msra.mxu0 %v13289_v44  ;;  %3437 = vmatpush1.bf16.msra.mxu1 %v13292_v45  ;;  %v13345_v38 = vld [vmem:[%s19735_s3 + $0x3c4] ss:$16 sps:$4 sm:$0xff]   ;;  %v13348_v39 = vld [vmem:[%s19735_s3 + $0x3cc] ss:$16 sps:$4 sm:$0xff]   ;;  %v13343_v40 = vld [vmem:[%s19735_s3 + $0x3c0] ss:$16 sps:$4 sm:$0xff]  }
 0x10e   : > { %3180 = vmatprep.subr.bf16.mxu0 %v13297_v52  ;;  %3438 = vmatprep.subr.bf16.mxu1 %v13300_v53  ;;  %v13346_v41 = vld [vmem:[%s19735_s3 + $0x3c8] ss:$16 sps:$4 sm:$0xff]   ;;  %v13351_v42 = vld [vmem:[%s19735_s3 + $0x3e4] ss:$16 sps:$4 sm:$0xff]   ;;  %v13354_v43 = vld [vmem:[%s19735_s3 + $0x3ec] ss:$16 sps:$4 sm:$0xff]  }
 0x10f   : > { %v13349_v44 = vld [vmem:[%s19735_s3 + $0x3e0] ss:$16 sps:$4 sm:$0xff]   ;;  %v13352_v45 = vld [vmem:[%s19735_s3 + $0x3e8] ss:$16 sps:$4 sm:$0xff]   ;;  %v13357_v46 = vld [vmem:[%s19735_s3 + $0x404] ss:$16 sps:$4 sm:$0xff]  }
 0x110   : > { %v13360_v47 = vld [vmem:[%s19735_s3 + $0x40c] ss:$16 sps:$4 sm:$0xff]   ;;  %v13355_v49 = vld [vmem:[%s19735_s3 + $0x400] ss:$16 sps:$4 sm:$0xff]   ;;  %v13358_v50 = vld [vmem:[%s19735_s3 + $0x408] ss:$16 sps:$4 sm:$0xff]  }
 0x111   : > { %3181 = vmatpush1.bf16.msra.mxu0 %v13295_v56  ;;  %3439 = vmatpush1.bf16.msra.mxu1 %v13298_v57  ;;  %v13363_v51 = vld [vmem:[%s19735_s3 + $0x424] ss:$16 sps:$4 sm:$0xff]   ;;  %v13366_v52 = vld [vmem:[%s19735_s3 + $0x42c] ss:$16 sps:$4 sm:$0xff]   ;;  %v13361_v53 = vld [vmem:[%s19735_s3 + $0x420] ss:$16 sps:$4 sm:$0xff]  }
 0x112   : > { %3182 = vmatprep.subr.bf16.mxu0 %v13303_v0  ;;  %3440 = vmatprep.subr.bf16.mxu1 %v13306_v3  ;;  %v13364_v54 = vld [vmem:[%s19735_s3 + $0x428] ss:$16 sps:$4 sm:$0xff]   ;;  %v13369_v55 = vld [vmem:[%s19735_s3 + $0x444] ss:$16 sps:$4 sm:$0xff]   ;;  %v13367_v56 = vld [vmem:[%s19735_s3 + $0x440] ss:$16 sps:$4 sm:$0xff]  }
 0x113   : > { %v13370_v57 = vld [vmem:[%s19735_s3 + $0x448] ss:$16 sps:$4 sm:$0xff]   ;;  %v13373_v58 = vld [vmem:[%s19735_s3 + $0x460] ss:$16 sps:$4 sm:$0xff]   ;;  %v13378_v60 = vld [vmem:[%s19735_s3 + $0x46c] ss:$16 sps:$4 sm:$0xff]  }
 0x114   : > { %v13376_v0 = vld [vmem:[%s19735_s3 + $0x468] ss:$16 sps:$4 sm:$0xff]   ;;  %v13381_v3 = vld [vmem:[%s19735_s3 + $0x484] ss:$16 sps:$4 sm:$0xff]  }
 0x115   : > { %3183 = vmatpush1.bf16.msra.mxu0 %v13301_v4  ;;  %3441 = vmatpush1.bf16.msra.mxu1 %v13304_v5  ;;  %v13379_v4 = vld [vmem:[%s19735_s3 + $0x480] ss:$16 sps:$4 sm:$0xff]   ;;  %v13384_v5 = vld [vmem:[%s19735_s3 + $0x48c] ss:$16 sps:$4 sm:$0xff]  }
 0x116   : > { %3184 = vmatprep.subr.bf16.mxu0 %v13309_v10  ;;  %3442 = vmatprep.subr.bf16.mxu1 %v13312_v12  ;;  %v13382_v10 = vld [vmem:[%s19735_s3 + $0x488] ss:$16 sps:$4 sm:$0xff]   ;;  %v13387_v12 = vld [vmem:[%s19735_s3 + $0x4a4] ss:$16 sps:$4 sm:$0xff]  }
 0x119   : > { %3185 = vmatpush1.bf16.msra.mxu0 %v13307_v13  ;;  %3443 = vmatpush1.bf16.msra.mxu1 %v13310_v14  ;;  %v13385_v13 = vld [vmem:[%s19735_s3 + $0x4a0] ss:$16 sps:$4 sm:$0xff]   ;;  %v13390_v14 = vld [vmem:[%s19735_s3 + $0x4ac] ss:$16 sps:$4 sm:$0xff]  }
 0x11a   : > { %3186 = vmatprep.subr.bf16.mxu0 %v13315_v15  ;;  %3444 = vmatprep.subr.bf16.mxu1 %v13318_v16  ;;  %v13388_v15 = vld [vmem:[%s19735_s3 + $0x4a8] ss:$16 sps:$4 sm:$0xff]   ;;  %v13393_v16 = vld [vmem:[%s19735_s3 + $0x4c4] ss:$16 sps:$4 sm:$0xff]  }
 0x11d   : > { %3187 = vmatpush1.bf16.msra.mxu0 %v13313_v17  ;;  %3445 = vmatpush1.bf16.msra.mxu1 %v13316_v18  ;;  %v13391_v17 = vld [vmem:[%s19735_s3 + $0x4c0] ss:$16 sps:$4 sm:$0xff]   ;;  %v13396_v18 = vld [vmem:[%s19735_s3 + $0x4cc] ss:$16 sps:$4 sm:$0xff]  }
 0x11e   : > { %3188 = vmatprep.subr.bf16.mxu0 %v13321_v19  ;;  %3446 = vmatprep.subr.bf16.mxu1 %v13324_v20  ;;  %v13394_v19 = vld [vmem:[%s19735_s3 + $0x4c8] ss:$16 sps:$4 sm:$0xff]   ;;  %v13399_v20 = vld [vmem:[%s19735_s3 + $0x4e4] ss:$16 sps:$4 sm:$0xff]  }
 0x121   : > { %3189 = vmatpush1.bf16.msra.mxu0 %v13319_v21  ;;  %3447 = vmatpush1.bf16.msra.mxu1 %v13322_v22  ;;  %v13397_v21 = vld [vmem:[%s19735_s3 + $0x4e0] ss:$16 sps:$4 sm:$0xff]   ;;  %v13402_v22 = vld [vmem:[%s19735_s3 + $0x4ec] ss:$16 sps:$4 sm:$0xff]  }
 0x122   : > { %3190 = vmatprep.subr.bf16.mxu0 %v13327_v23  ;;  %3448 = vmatprep.subr.bf16.mxu1 %v13330_v24  ;;  %v13400_v23 = vld [vmem:[%s19735_s3 + $0x4e8] ss:$16 sps:$4 sm:$0xff]   ;;  %v13405_v24 = vld [vmem:[%s19735_s3 + $0x504] ss:$16 sps:$4 sm:$0xff]  }
 0x125   : > { %3191 = vmatpush1.bf16.msra.mxu0 %v13325_v25  ;;  %3449 = vmatpush1.bf16.msra.mxu1 %v13328_v26  ;;  %v13403_v25 = vld [vmem:[%s19735_s3 + $0x500] ss:$16 sps:$4 sm:$0xff]   ;;  %v13408_v26 = vld [vmem:[%s19735_s3 + $0x50c] ss:$16 sps:$4 sm:$0xff]  }
 0x126   : > { %3192 = vmatprep.subr.bf16.mxu0 %v13333_v27  ;;  %3450 = vmatprep.subr.bf16.mxu1 %v13336_v30  ;;  %v13406_v27 = vld [vmem:[%s19735_s3 + $0x508] ss:$16 sps:$4 sm:$0xff]   ;;  %v13411_v30 = vld [vmem:[%s19735_s3 + $0x524] ss:$16 sps:$4 sm:$0xff]  }
 0x129   : > { %3193 = vmatpush1.bf16.msra.mxu0 %v13331_v32  ;;  %3451 = vmatpush1.bf16.msra.mxu1 %v13334_v33  ;;  %v13409_v32 = vld [vmem:[%s19735_s3 + $0x520] ss:$16 sps:$4 sm:$0xff]   ;;  %v13414_v33 = vld [vmem:[%s19735_s3 + $0x52c] ss:$16 sps:$4 sm:$0xff]  }
 0x12a   : > { %3194 = vmatprep.subr.bf16.mxu0 %v13339_v34  ;;  %3452 = vmatprep.subr.bf16.mxu1 %v13342_v35  ;;  %v13412_v34 = vld [vmem:[%s19735_s3 + $0x528] ss:$16 sps:$4 sm:$0xff]   ;;  %v13417_v35 = vld [vmem:[%s19735_s3 + $0x544] ss:$16 sps:$4 sm:$0xff]  }
 0x12d   : > { %3195 = vmatpush1.bf16.msra.mxu0 %v13337_v36  ;;  %3453 = vmatpush1.bf16.msra.mxu1 %v13340_v37  ;;  %v13415_v36 = vld [vmem:[%s19735_s3 + $0x540] ss:$16 sps:$4 sm:$0xff]   ;;  %v13420_v37 = vld [vmem:[%s19735_s3 + $0x54c] ss:$16 sps:$4 sm:$0xff]  }
 0x12e   : > { %3196 = vmatprep.subr.bf16.mxu0 %v13345_v38  ;;  %3454 = vmatprep.subr.bf16.mxu1 %v13348_v39  ;;  %v13418_v38 = vld [vmem:[%s19735_s3 + $0x548] ss:$16 sps:$4 sm:$0xff]   ;;  %v13423_v39 = vld [vmem:[%s19735_s3 + $0x564] ss:$16 sps:$4 sm:$0xff]  }
 0x131   : > { %3197 = vmatpush1.bf16.msra.mxu0 %v13343_v40  ;;  %3455 = vmatpush1.bf16.msra.mxu1 %v13346_v41  ;;  %v13421_v40 = vld [vmem:[%s19735_s3 + $0x560] ss:$16 sps:$4 sm:$0xff]   ;;  %v13426_v41 = vld [vmem:[%s19735_s3 + $0x56c] ss:$16 sps:$4 sm:$0xff]  }
 0x132   : > { %3198 = vmatprep.subr.bf16.mxu0 %v13351_v42  ;;  %3456 = vmatprep.subr.bf16.mxu1 %v13354_v43  ;;  %v13424_v42 = vld [vmem:[%s19735_s3 + $0x568] ss:$16 sps:$4 sm:$0xff]   ;;  %v13429_v43 = vld [vmem:[%s19735_s3 + $0x584] ss:$16 sps:$4 sm:$0xff]  }
 0x135   : > { %3199 = vmatpush1.bf16.msra.mxu0 %v13349_v44  ;;  %3457 = vmatpush1.bf16.msra.mxu1 %v13352_v45  ;;  %v13427_v44 = vld [vmem:[%s19735_s3 + $0x580] ss:$16 sps:$4 sm:$0xff]   ;;  %v13432_v45 = vld [vmem:[%s19735_s3 + $0x58c] ss:$16 sps:$4 sm:$0xff]  }
 0x136   : > { %3211 = vmatprep.subr.bf16.mxu0 %v13357_v46  ;;  %3469 = vmatprep.subr.bf16.mxu1 %v13360_v47  ;;  %v13430_v46 = vld [vmem:[%s19735_s3 + $0x588] ss:$16 sps:$4 sm:$0xff]   ;;  %v13435_v47 = vld [vmem:[%s19735_s3 + $0x5a4] ss:$16 sps:$4 sm:$0xff]  }
 0x138   : > { %3201 = vmatmul.mubr.bf16.vlgmr.msra.gmra.mrb[8].mxu0 %v15651_v48  ;;  %3459 = vmatmul.mubr.bf16.vlgmr.msra.gmra.mrb[0].mxu1 %v15651_v48  ;;  %v13372_v48 = vld [vmem:[%s19735_s3 + $0x44c] ss:$16 sps:$4 sm:$0xff]  }
 0x139   : > { %3212 = vmatpush1.bf16.msra.mxu0 %v13355_v49  ;;  %3243 = vmatprep.mubr.bf16.mxu0 %v15593_v6  ;;  %v13433_v49 = vld [vmem:[%s19735_s3 + $0x5a0] ss:$16 sps:$4 sm:$0xff]  }
 0x13a   : > { %3470 = vmatpush1.bf16.msra.mxu1 %v13358_v50  ;;  %3501 = vmatprep.mubr.bf16.mxu1 %v15593_v6  ;;  %v13375_v6 = vld [vmem:[%s19735_s3 + $0x464] ss:$16 sps:$4 sm:$0xff]   ;;  %v13438_v50 = vld [vmem:[%s19735_s3 + $0x5ac] ss:$16 sps:$4 sm:$0xff]  }
 0x13b   : > { %3213 = vmatprep.subr.bf16.mxu0 %v13363_v51  ;;  %3471 = vmatprep.subr.bf16.mxu1 %v13366_v52  ;;  %v13436_v51 = vld [vmem:[%s19735_s3 + $0x5a8] ss:$16 sps:$4 sm:$0xff]   ;;  %v13441_v52 = vld [vmem:[%s19735_s3 + $0x5c4] ss:$16 sps:$4 sm:$0xff]  }
 0x13d   : > { %3214 = vmatpush1.bf16.msra.mxu0 %v13361_v53  ;;  %v13439_v53 = vld [vmem:[%s19735_s3 + $0x5c0] ss:$16 sps:$4 sm:$0xff]  }
 0x13e   : > { %3472 = vmatpush1.bf16.msra.mxu1 %v13364_v54  ;;  %3215 = vmatprep.subr.bf16.mxu0 %v13369_v55  ;;  %v13444_v54 = vld [vmem:[%s19735_s3 + $0x5cc] ss:$16 sps:$4 sm:$0xff]   ;;  %v13442_v55 = vld [vmem:[%s19735_s3 + $0x5c8] ss:$16 sps:$4 sm:$0xff]  }
 0x13f   : > { %3473 = vmatprep.subr.bf16.mxu1 %v13372_v48  ;;  %v13447_v48 = vld [vmem:[%s19735_s3 + $0x5e4] ss:$16 sps:$4 sm:$0xff]  }
 0x141   : > { %3216 = vmatpush1.bf16.msra.mxu0 %v13367_v56  ;;  %v13445_v56 = vld [vmem:[%s19735_s3 + $0x5e0] ss:$16 sps:$4 sm:$0xff]  }
 0x142   : > { %3474 = vmatpush1.bf16.msra.mxu1 %v13370_v57  ;;  %3217 = vmatprep.subr.bf16.mxu0 %v13375_v6  ;;  %v13450_v57 = vld [vmem:[%s19735_s3 + $0x5ec] ss:$16 sps:$4 sm:$0xff]   ;;  %v13448_v6 = vld [vmem:[%s19735_s3 + $0x5e8] ss:$16 sps:$4 sm:$0xff]  }
 0x143   : > { %3475 = vmatprep.subr.bf16.mxu1 %v13378_v60  ;;  %v13456_v60 = vld [vmem:[%s19735_s3 + $0x60c] ss:$16 sps:$4 sm:$0xff]  }
 0x145   : > { %3218 = vmatpush1.bf16.msra.mxu0 %v13373_v58  ;;  %v13453_v58 = vld [vmem:[%s19735_s3 + $0x604] ss:$16 sps:$4 sm:$0xff]  }
 0x146   : > { %3476 = vmatpush1.bf16.msra.mxu1 %v13376_v0  ;;  %3219 = vmatprep.subr.bf16.mxu0 %v13381_v3  ;;  %v13451_v0 = vld [vmem:[%s19735_s3 + $0x600] ss:$16 sps:$4 sm:$0xff]   ;;  %v13454_v3 = vld [vmem:[%s19735_s3 + $0x608] ss:$16 sps:$4 sm:$0xff]  }
 0x147   : > { %3477 = vmatprep.subr.bf16.mxu1 %v13384_v5  ;;  %v13457_v5 = vld [vmem:[%s19735_s3 + $0x620] ss:$16 sps:$4 sm:$0xff]  }
 0x149   : > { %3220 = vmatpush1.bf16.msra.mxu0 %v13379_v4  ;;  %v13459_v4 = vld [vmem:[%s19735_s3 + $0x624] ss:$16 sps:$4 sm:$0xff]  }
 0x14a   : > { %3478 = vmatpush1.bf16.msra.mxu1 %v13382_v10  ;;  %3221 = vmatprep.subr.bf16.mxu0 %v13387_v12  ;;  %v13460_v10 = vld [vmem:[%s19735_s3 + $0x628] ss:$16 sps:$4 sm:$0xff]   ;;  %v13462_v12 = vld [vmem:[%s19735_s3 + $0x62c] ss:$16 sps:$4 sm:$0xff]  }
 0x14b   : > { %3479 = vmatprep.subr.bf16.mxu1 %v13390_v14  ;;  %v13468_v14 = vld [vmem:[%s19735_s3 + $0x64c] ss:$16 sps:$4 sm:$0xff]  }
 0x14d   : > { %3222 = vmatpush1.bf16.msra.mxu0 %v13385_v13  ;;  %v13465_v13 = vld [vmem:[%s19735_s3 + $0x644] ss:$16 sps:$4 sm:$0xff]  }
 0x14e   : > { %3480 = vmatpush1.bf16.msra.mxu1 %v13388_v15  ;;  %3223 = vmatprep.subr.bf16.mxu0 %v13393_v16  ;;  %v13466_v15 = vld [vmem:[%s19735_s3 + $0x648] ss:$16 sps:$4 sm:$0xff]   ;;  %v13469_v16 = vld [vmem:[%s19735_s3 + $0x660] ss:$16 sps:$4 sm:$0xff]  }
 0x14f   : > { %3481 = vmatprep.subr.bf16.mxu1 %v13396_v18  ;;  %v13472_v18 = vld [vmem:[%s19735_s3 + $0x668] ss:$16 sps:$4 sm:$0xff]  }
 0x151   : > { %3224 = vmatpush1.bf16.msra.mxu0 %v13391_v17  ;;  %v13474_v17 = vld [vmem:[%s19735_s3 + $0x66c] ss:$16 sps:$4 sm:$0xff]  }
 0x152   : > { %3482 = vmatpush1.bf16.msra.mxu1 %v13394_v19  ;;  %3225 = vmatprep.subr.bf16.mxu0 %v13399_v20  ;;  %v13477_v19 = vld [vmem:[%s19735_s3 + $0x684] ss:$16 sps:$4 sm:$0xff]   ;;  %v13475_v20 = vld [vmem:[%s19735_s3 + $0x680] ss:$16 sps:$4 sm:$0xff]  }
 0x153   : > { %3483 = vmatprep.subr.bf16.mxu1 %v13402_v22  ;;  %v13478_v22 = vld [vmem:[%s19735_s3 + $0x688] ss:$16 sps:$4 sm:$0xff]  }
 0x155   : > { %3226 = vmatpush1.bf16.msra.mxu0 %v13397_v21  ;;  %v13480_v21 = vld [vmem:[%s19735_s3 + $0x68c] ss:$16 sps:$4 sm:$0xff]  }
 0x156   : > { %3484 = vmatpush1.bf16.msra.mxu1 %v13400_v23  ;;  %3227 = vmatprep.subr.bf16.mxu0 %v13405_v24  ;;  %v13483_v23 = vld [vmem:[%s19735_s3 + $0x6a4] ss:$16 sps:$4 sm:$0xff]   ;;  %v13481_v24 = vld [vmem:[%s19735_s3 + $0x6a0] ss:$16 sps:$4 sm:$0xff]  }
 0x157   : > { %3485 = vmatprep.subr.bf16.mxu1 %v13408_v26  ;;  %v13484_v26 = vld [vmem:[%s19735_s3 + $0x6a8] ss:$16 sps:$4 sm:$0xff]  }
 0x159   : > { %3228 = vmatpush1.bf16.msra.mxu0 %v13403_v25  ;;  %v13486_v25 = vld [vmem:[%s19735_s3 + $0x6ac] ss:$16 sps:$4 sm:$0xff]  }
 0x15a   : > { %3486 = vmatpush1.bf16.msra.mxu1 %v13406_v27  ;;  %3229 = vmatprep.subr.bf16.mxu0 %v13411_v30  ;;  %v13489_v27 = vld [vmem:[%s19735_s3 + $0x6c4] ss:$16 sps:$4 sm:$0xff]   ;;  %v13487_v30 = vld [vmem:[%s19735_s3 + $0x6c0] ss:$16 sps:$4 sm:$0xff]  }
 0x15b   : > { %3487 = vmatprep.subr.bf16.mxu1 %v13414_v33  ;;  %v13490_v33 = vld [vmem:[%s19735_s3 + $0x6c8] ss:$16 sps:$4 sm:$0xff]  }
 0x15d   : > { %3230 = vmatpush1.bf16.msra.mxu0 %v13409_v32  ;;  %v13492_v32 = vld [vmem:[%s19735_s3 + $0x6cc] ss:$16 sps:$4 sm:$0xff]  }
 0x15e   : > { %3488 = vmatpush1.bf16.msra.mxu1 %v13412_v34  ;;  %3231 = vmatprep.subr.bf16.mxu0 %v13417_v35  ;;  %v13495_v34 = vld [vmem:[%s19735_s3 + $0x6e4] ss:$16 sps:$4 sm:$0xff]   ;;  %v13493_v35 = vld [vmem:[%s19735_s3 + $0x6e0] ss:$16 sps:$4 sm:$0xff]  }
 0x15f   : > { %3489 = vmatprep.subr.bf16.mxu1 %v13420_v37  ;;  %v13496_v37 = vld [vmem:[%s19735_s3 + $0x6e8] ss:$16 sps:$4 sm:$0xff]  }
 0x161   : > { %3232 = vmatpush1.bf16.msra.mxu0 %v13415_v36  ;;  %v13498_v36 = vld [vmem:[%s19735_s3 + $0x6ec] ss:$16 sps:$4 sm:$0xff]  }
 0x162   : > { %3490 = vmatpush1.bf16.msra.mxu1 %v13418_v38  ;;  %3233 = vmatprep.subr.bf16.mxu0 %v13423_v39  ;;  %v13501_v38 = vld [vmem:[%s19735_s3 + $0x704] ss:$16 sps:$4 sm:$0xff]   ;;  %v13499_v39 = vld [vmem:[%s19735_s3 + $0x700] ss:$16 sps:$4 sm:$0xff]  }
 0x163   : > { %3491 = vmatprep.subr.bf16.mxu1 %v13426_v41  ;;  %v13502_v41 = vld [vmem:[%s19735_s3 + $0x708] ss:$16 sps:$4 sm:$0xff]  }
 0x165   : > { %3234 = vmatpush1.bf16.msra.mxu0 %v13421_v40  ;;  %v13504_v40 = vld [vmem:[%s19735_s3 + $0x70c] ss:$16 sps:$4 sm:$0xff]  }
 0x166   : > { %3492 = vmatpush1.bf16.msra.mxu1 %v13424_v42  ;;  %3235 = vmatprep.subr.bf16.mxu0 %v13429_v43  ;;  %v13507_v42 = vld [vmem:[%s19735_s3 + $0x724] ss:$16 sps:$4 sm:$0xff]   ;;  %v13505_v43 = vld [vmem:[%s19735_s3 + $0x720] ss:$16 sps:$4 sm:$0xff]  }
 0x167   : > { %3493 = vmatprep.subr.bf16.mxu1 %v13432_v45  ;;  %v13508_v45 = vld [vmem:[%s19735_s3 + $0x728] ss:$16 sps:$4 sm:$0xff]  }
 0x169   : > { %3236 = vmatpush1.bf16.msra.mxu0 %v13427_v44  ;;  %v13510_v44 = vld [vmem:[%s19735_s3 + $0x72c] ss:$16 sps:$4 sm:$0xff]  }
 0x16a   : > { %3494 = vmatpush1.bf16.msra.mxu1 %v13430_v46  ;;  %3237 = vmatprep.subr.bf16.mxu0 %v13435_v47  ;;  %v13513_v46 = vld [vmem:[%s19735_s3 + $0x744] ss:$16 sps:$4 sm:$0xff]   ;;  %v13511_v47 = vld [vmem:[%s19735_s3 + $0x740] ss:$16 sps:$4 sm:$0xff]  }
 0x16b   : > { %3495 = vmatprep.subr.bf16.mxu1 %v13438_v50  ;;  %v13514_v50 = vld [vmem:[%s19735_s3 + $0x748] ss:$16 sps:$4 sm:$0xff]  }
 0x16d   : > { %3238 = vmatpush1.bf16.msra.mxu0 %v13433_v49  ;;  %v13516_v49 = vld [vmem:[%s19735_s3 + $0x74c] ss:$16 sps:$4 sm:$0xff]  }
 0x16e   : > { %3496 = vmatpush1.bf16.msra.mxu1 %v13436_v51  ;;  %3239 = vmatprep.subr.bf16.mxu0 %v13441_v52  ;;  %v13519_v51 = vld [vmem:[%s19735_s3 + $0x764] ss:$16 sps:$4 sm:$0xff]   ;;  %v13517_v52 = vld [vmem:[%s19735_s3 + $0x760] ss:$16 sps:$4 sm:$0xff]  }
 0x16f   : > { %3497 = vmatprep.subr.bf16.mxu1 %v13444_v54  ;;  %v13520_v54 = vld [vmem:[%s19735_s3 + $0x768] ss:$16 sps:$4 sm:$0xff]  }
 0x171   : > { %3240 = vmatpush1.bf16.msra.mxu0 %v13439_v53  ;;  %v13522_v53 = vld [vmem:[%s19735_s3 + $0x76c] ss:$16 sps:$4 sm:$0xff]  }
 0x172   : > { %3498 = vmatpush1.bf16.msra.mxu1 %v13442_v55  ;;  %3241 = vmatprep.subr.bf16.mxu0 %v13447_v48  ;;  %v13525_v55 = vld [vmem:[%s19735_s3 + $0x784] ss:$16 sps:$4 sm:$0xff]   ;;  %v13523_v48 = vld [vmem:[%s19735_s3 + $0x780] ss:$16 sps:$4 sm:$0xff]  }
 0x173   : > { %3499 = vmatprep.subr.bf16.mxu1 %v13450_v57  ;;  %v13526_v57 = vld [vmem:[%s19735_s3 + $0x788] ss:$16 sps:$4 sm:$0xff]  }
 0x175   : > { %3242 = vmatpush1.bf16.msra.mxu0 %v13445_v56  ;;  %v13528_v56 = vld [vmem:[%s19735_s3 + $0x78c] ss:$16 sps:$4 sm:$0xff]  }
 0x176   : > { %3500 = vmatpush1.bf16.msra.mxu1 %v13448_v6  ;;  %3254 = vmatprep.subr.bf16.mxu0 %v13453_v58  ;;  %v13531_v6 = vld [vmem:[%s19735_s3 + $0x7a4] ss:$16 sps:$4 sm:$0xff]   ;;  %v13529_v58 = vld [vmem:[%s19735_s3 + $0x7a0] ss:$16 sps:$4 sm:$0xff]  }
 0x177   : > { %3512 = vmatprep.subr.bf16.mxu1 %v13456_v60  ;;  %v13534_v60 = vld [vmem:[%s19735_s3 + $0x7ac] ss:$16 sps:$4 sm:$0xff]  }
 0x178   : > { %3244 = vmatmul.mubr.bf16.vlgmr.msra.gmra.mrb[8].mxu0 %v15584_v1 }
 0x179   : > { %3502 = vmatmul.mubr.bf16.vlgmr.msra.gmra.mrb[0].mxu1 %v15584_v1  ;;  %3255 = vmatpush1.bf16.msra.mxu0 %v13451_v0  ;;  %v13463_v1 = vld [vmem:[%s19735_s3 + $0x640] ss:$16 sps:$4 sm:$0xff]   ;;  %v13532_v0 = vld [vmem:[%s19735_s3 + $0x7a8] ss:$16 sps:$4 sm:$0xff]  }
 0x17a   : > { %3286 = vmatprep.mubr.bf16.mxu0 %v15671_v61  ;;  %3513 = vmatpush1.bf16.msra.mxu1 %v13454_v3  ;;  %v13537_v3 = vld [vmem:[%s19735_s3 + $0x7c4] ss:$16 sps:$4 sm:$0xff]  }
 0x17b   : > { %3544 = vmatprep.mubr.bf16.mxu1 %v15671_v61  ;;  %3256 = vmatprep.subr.bf16.mxu0 %v13459_v4  ;;  %v13471_v61 = vld [vmem:[%s19735_s3 + $0x664] ss:$16 sps:$4 sm:$0xff]   ;;  %v13535_v4 = vld [vmem:[%s19735_s3 + $0x7c0] ss:$16 sps:$4 sm:$0xff]  }
 0x17c   : > { %3514 = vmatprep.subr.bf16.mxu1 %v13462_v12  ;;  %v13543_v12 = vld [vmem:[%s19735_s3 + $0x7e4] ss:$16 sps:$4 sm:$0xff]  }
 0x17d   : > { %3257 = vmatpush1.bf16.msra.mxu0 %v13457_v5  ;;  %v13540_v5 = vld [vmem:[%s19735_s3 + $0x7cc] ss:$16 sps:$4 sm:$0xff]  }
 0x17e   : > { %3515 = vmatpush1.bf16.msra.mxu1 %v13460_v10  ;;  %3258 = vmatprep.subr.bf16.mxu0 %v13465_v13  ;;  %v13538_v10 = vld [vmem:[%s19735_s3 + $0x7c8] ss:$16 sps:$4 sm:$0xff]   ;;  %v13541_v13 = vld [vmem:[%s19735_s3 + $0x7e0] ss:$16 sps:$4 sm:$0xff]  }
 0x17f   : > { %3516 = vmatprep.subr.bf16.mxu1 %v13468_v14  ;;  %v13546_v14 = vld [vmem:[%s19735_s3 + $0x7ec] ss:$16 sps:$4 sm:$0xff]  }
 0x181   : > { %3259 = vmatpush1.bf16.msra.mxu0 %v13463_v1  ;;  %v13544_v1 = vld [vmem:[%s19735_s3 + $0x7e8] ss:$16 sps:$4 sm:$0xff]  }
 0x182   : > { %3517 = vmatpush1.bf16.msra.mxu1 %v13466_v15  ;;  %3260 = vmatprep.subr.bf16.mxu0 %v13471_v61  ;;  %v13549_v15 = vld [vmem:[%s19735_s3 + $0x804] ss:$16 sps:$4 sm:$0xff]   ;;  %v13547_v61 = vld [vmem:[%s19735_s3 + $0x800] ss:$16 sps:$4 sm:$0xff]  }
 0x183   : > { %3518 = vmatprep.subr.bf16.mxu1 %v13474_v17  ;;  %v13550_v17 = vld [vmem:[%s19735_s3 + $0x808] ss:$16 sps:$4 sm:$0xff]  }
 0x185   : > { %3261 = vmatpush1.bf16.msra.mxu0 %v13469_v16  ;;  %v13552_v16 = vld [vmem:[%s19735_s3 + $0x80c] ss:$16 sps:$4 sm:$0xff]  }
 0x186   : > { %3519 = vmatpush1.bf16.msra.mxu1 %v13472_v18  ;;  %3262 = vmatprep.subr.bf16.mxu0 %v13477_v19  ;;  %v13555_v18 = vld [vmem:[%s19735_s3 + $0x824] ss:$16 sps:$4 sm:$0xff]   ;;  %v13558_v19 = vld [vmem:[%s19735_s3 + $0x82c] ss:$16 sps:$4 sm:$0xff]  }
 0x187   : > { %3520 = vmatprep.subr.bf16.mxu1 %v13480_v21  ;;  %v13556_v21 = vld [vmem:[%s19735_s3 + $0x828] ss:$16 sps:$4 sm:$0xff]  }
 0x189   : > { %3263 = vmatpush1.bf16.msra.mxu0 %v13475_v20  ;;  %v13553_v20 = vld [vmem:[%s19735_s3 + $0x820] ss:$16 sps:$4 sm:$0xff]  }
 0x18a   : > { %3521 = vmatpush1.bf16.msra.mxu1 %v13478_v22  ;;  %3264 = vmatprep.subr.bf16.mxu0 %v13483_v23  ;;  %v13561_v22 = vld [vmem:[%s19735_s3 + $0x844] ss:$16 sps:$4 sm:$0xff]   ;;  %v13564_v23 = vld [vmem:[%s19735_s3 + $0x84c] ss:$16 sps:$4 sm:$0xff]  }
 0x18b   : > { %3522 = vmatprep.subr.bf16.mxu1 %v13486_v25  ;;  %v13565_v25 = vld [vmem:[%s19735_s3 + $0x860] ss:$16 sps:$4 sm:$0xff]  }
 0x18d   : > { %3265 = vmatpush1.bf16.msra.mxu0 %v13481_v24  ;;  %v13562_v24 = vld [vmem:[%s19735_s3 + $0x848] ss:$16 sps:$4 sm:$0xff]  }
 0x18e   : > { %3523 = vmatpush1.bf16.msra.mxu1 %v13484_v26  ;;  %3266 = vmatprep.subr.bf16.mxu0 %v13489_v27  ;;  %v13570_v26 = vld [vmem:[%s19735_s3 + $0x86c] ss:$16 sps:$4 sm:$0xff]   ;;  %v13568_v27 = vld [vmem:[%s19735_s3 + $0x868] ss:$16 sps:$4 sm:$0xff]  }
 0x18f   : > { %3524 = vmatprep.subr.bf16.mxu1 %v13492_v32  ;;  %v13571_v32 = vld [vmem:[%s19735_s3 + $0x880] ss:$16 sps:$4 sm:$0xff]  }
 0x191   : > { %3267 = vmatpush1.bf16.msra.mxu0 %v13487_v30  ;;  %v13573_v30 = vld [vmem:[%s19735_s3 + $0x884] ss:$16 sps:$4 sm:$0xff]  }
 0x192   : > { %3525 = vmatpush1.bf16.msra.mxu1 %v13490_v33  ;;  %3268 = vmatprep.subr.bf16.mxu0 %v13495_v34  ;;  %v13576_v33 = vld [vmem:[%s19735_s3 + $0x88c] ss:$16 sps:$4 sm:$0xff]   ;;  %v13574_v34 = vld [vmem:[%s19735_s3 + $0x888] ss:$16 sps:$4 sm:$0xff]  }
 0x193   : > { %3526 = vmatprep.subr.bf16.mxu1 %v13498_v36  ;;  %v13577_v36 = vld [vmem:[%s19735_s3 + $0x8a0] ss:$16 sps:$4 sm:$0xff]  }
 0x195   : > { %3269 = vmatpush1.bf16.msra.mxu0 %v13493_v35  ;;  %v13579_v35 = vld [vmem:[%s19735_s3 + $0x8a4] ss:$16 sps:$4 sm:$0xff]  }
 0x196   : > { %3527 = vmatpush1.bf16.msra.mxu1 %v13496_v37  ;;  %3270 = vmatprep.subr.bf16.mxu0 %v13501_v38  ;;  %v13582_v37 = vld [vmem:[%s19735_s3 + $0x8ac] ss:$16 sps:$4 sm:$0xff]   ;;  %v13580_v38 = vld [vmem:[%s19735_s3 + $0x8a8] ss:$16 sps:$4 sm:$0xff]  }
 0x197   : > { %3528 = vmatprep.subr.bf16.mxu1 %v13504_v40  ;;  %v13583_v40 = vld [vmem:[%s19735_s3 + $0x8c0] ss:$16 sps:$4 sm:$0xff]  }
 0x199   : > { %3271 = vmatpush1.bf16.msra.mxu0 %v13499_v39  ;;  %v13585_v39 = vld [vmem:[%s19735_s3 + $0x8c4] ss:$16 sps:$4 sm:$0xff]  }
 0x19a   : > { %3529 = vmatpush1.bf16.msra.mxu1 %v13502_v41  ;;  %3272 = vmatprep.subr.bf16.mxu0 %v13507_v42  ;;  %v13588_v41 = vld [vmem:[%s19735_s3 + $0x8cc] ss:$16 sps:$4 sm:$0xff]   ;;  %v13586_v42 = vld [vmem:[%s19735_s3 + $0x8c8] ss:$16 sps:$4 sm:$0xff]  }
 0x19b   : > { %3530 = vmatprep.subr.bf16.mxu1 %v13510_v44  ;;  %v13589_v44 = vld [vmem:[%s19735_s3 + $0x8e0] ss:$16 sps:$4 sm:$0xff]  }
 0x19d   : > { %3273 = vmatpush1.bf16.msra.mxu0 %v13505_v43  ;;  %v13591_v43 = vld [vmem:[%s19735_s3 + $0x8e4] ss:$16 sps:$4 sm:$0xff]  }
 0x19e   : > { %3531 = vmatpush1.bf16.msra.mxu1 %v13508_v45  ;;  %3274 = vmatprep.subr.bf16.mxu0 %v13513_v46  ;;  %v13594_v45 = vld [vmem:[%s19735_s3 + $0x8ec] ss:$16 sps:$4 sm:$0xff]   ;;  %v13592_v46 = vld [vmem:[%s19735_s3 + $0x8e8] ss:$16 sps:$4 sm:$0xff]  }
 0x19f   : > { %3532 = vmatprep.subr.bf16.mxu1 %v13516_v49  ;;  %v13595_v49 = vld [vmem:[%s19735_s3 + $0x900] ss:$16 sps:$4 sm:$0xff]  }
 0x1a1   : > { %3275 = vmatpush1.bf16.msra.mxu0 %v13511_v47  ;;  %v13597_v47 = vld [vmem:[%s19735_s3 + $0x904] ss:$16 sps:$4 sm:$0xff]  }
 0x1a2   : > { %3533 = vmatpush1.bf16.msra.mxu1 %v13514_v50  ;;  %3276 = vmatprep.subr.bf16.mxu0 %v13519_v51  ;;  %v13600_v50 = vld [vmem:[%s19735_s3 + $0x90c] ss:$16 sps:$4 sm:$0xff]   ;;  %v13598_v51 = vld [vmem:[%s19735_s3 + $0x908] ss:$16 sps:$4 sm:$0xff]  }
 0x1a3   : > { %3534 = vmatprep.subr.bf16.mxu1 %v13522_v53  ;;  %v13601_v53 = vld [vmem:[%s19735_s3 + $0x920] ss:$16 sps:$4 sm:$0xff]  }
 0x1a5   : > { %3277 = vmatpush1.bf16.msra.mxu0 %v13517_v52  ;;  %v13603_v52 = vld [vmem:[%s19735_s3 + $0x924] ss:$16 sps:$4 sm:$0xff]  }
 0x1a6   : > { %3535 = vmatpush1.bf16.msra.mxu1 %v13520_v54  ;;  %3278 = vmatprep.subr.bf16.mxu0 %v13525_v55  ;;  %v13606_v54 = vld [vmem:[%s19735_s3 + $0x92c] ss:$16 sps:$4 sm:$0xff]   ;;  %v13604_v55 = vld [vmem:[%s19735_s3 + $0x928] ss:$16 sps:$4 sm:$0xff]  }
 0x1a7   : > { %3536 = vmatprep.subr.bf16.mxu1 %v13528_v56  ;;  %v13607_v56 = vld [vmem:[%s19735_s3 + $0x940] ss:$16 sps:$4 sm:$0xff]  }
 0x1a9   : > { %3279 = vmatpush1.bf16.msra.mxu0 %v13523_v48  ;;  %v13609_v48 = vld [vmem:[%s19735_s3 + $0x944] ss:$16 sps:$4 sm:$0xff]  }
 0x1aa   : > { %3537 = vmatpush1.bf16.msra.mxu1 %v13526_v57  ;;  %3280 = vmatprep.subr.bf16.mxu0 %v13531_v6  ;;  %v13612_v57 = vld [vmem:[%s19735_s3 + $0x94c] ss:$16 sps:$4 sm:$0xff]   ;;  %v13610_v6 = vld [vmem:[%s19735_s3 + $0x948] ss:$16 sps:$4 sm:$0xff]  }
 0x1ab   : > { %3538 = vmatprep.subr.bf16.mxu1 %v13534_v60  ;;  %v13613_v60 = vld [vmem:[%s19735_s3 + $0x960] ss:$16 sps:$4 sm:$0xff]  }
 0x1ad   : > { %3281 = vmatpush1.bf16.msra.mxu0 %v13529_v58  ;;  %v13615_v58 = vld [vmem:[%s19735_s3 + $0x964] ss:$16 sps:$4 sm:$0xff]  }
 0x1ae   : > { %3539 = vmatpush1.bf16.msra.mxu1 %v13532_v0  ;;  %3282 = vmatprep.subr.bf16.mxu0 %v13537_v3  ;;  %v13618_v0 = vld [vmem:[%s19735_s3 + $0x96c] ss:$16 sps:$4 sm:$0xff]   ;;  %v13616_v3 = vld [vmem:[%s19735_s3 + $0x968] ss:$16 sps:$4 sm:$0xff]  }
 0x1af   : > { %3540 = vmatprep.subr.bf16.mxu1 %v13540_v5  ;;  %v13619_v5 = vld [vmem:[%s19735_s3 + $0x980] ss:$16 sps:$4 sm:$0xff]  }
 0x1b1   : > { %3283 = vmatpush1.bf16.msra.mxu0 %v13535_v4  ;;  %v13621_v4 = vld [vmem:[%s19735_s3 + $0x984] ss:$16 sps:$4 sm:$0xff]  }
 0x1b2   : > { %3541 = vmatpush1.bf16.msra.mxu1 %v13538_v10  ;;  %3284 = vmatprep.subr.bf16.mxu0 %v13543_v12  ;;  %v13624_v10 = vld [vmem:[%s19735_s3 + $0x98c] ss:$16 sps:$4 sm:$0xff]   ;;  %v13622_v12 = vld [vmem:[%s19735_s3 + $0x988] ss:$16 sps:$4 sm:$0xff]  }
 0x1b3   : > { %3542 = vmatprep.subr.bf16.mxu1 %v13546_v14  ;;  %v13625_v14 = vld [vmem:[%s19735_s3 + $0x9a0] ss:$16 sps:$4 sm:$0xff]  }
 0x1b5   : > { %3285 = vmatpush1.bf16.msra.mxu0 %v13541_v13  ;;  %v13627_v13 = vld [vmem:[%s19735_s3 + $0x9a4] ss:$16 sps:$4 sm:$0xff]  }
 0x1b6   : > { %3543 = vmatpush1.bf16.msra.mxu1 %v13544_v1  ;;  %3297 = vmatprep.subr.bf16.mxu0 %v13549_v15  ;;  %v13630_v1 = vld [vmem:[%s19735_s3 + $0x9ac] ss:$16 sps:$4 sm:$0xff]   ;;  %v13628_v15 = vld [vmem:[%s19735_s3 + $0x9a8] ss:$16 sps:$4 sm:$0xff]  }
 0x1b7   : > { %3555 = vmatprep.subr.bf16.mxu1 %v13552_v16  ;;  %v13631_v16 = vld [vmem:[%s19735_s3 + $0x9c0] ss:$16 sps:$4 sm:$0xff]  }
 0x1b8   : > { %3287 = vmatmul.mubr.bf16.vlgmr.msra.gmra.mrb[8].mxu0 %v15668_v59 }
 0x1b9   : > { %3545 = vmatmul.mubr.bf16.vlgmr.msra.gmra.mrb[0].mxu1 %v15668_v59  ;;  %3298 = vmatpush1.bf16.msra.mxu0 %v13547_v61  ;;  %v13559_v59 = vld [vmem:[%s19735_s3 + $0x840] ss:$16 sps:$4 sm:$0xff]   ;;  %v13633_v61 = vld [vmem:[%s19735_s3 + $0x9c4] ss:$16 sps:$4 sm:$0xff]  }
 0x1ba   : > { %3329 = vmatprep.mubr.bf16.mxu0 %v15595_v7  ;;  %3556 = vmatpush1.bf16.msra.mxu1 %v13550_v17  ;;  %v13636_v17 = vld [vmem:[%s19735_s3 + $0x9cc] ss:$16 sps:$4 sm:$0xff]  }
 0x1bb   : > { %3587 = vmatprep.mubr.bf16.mxu1 %v15595_v7  ;;  %3299 = vmatprep.subr.bf16.mxu0 %v13555_v18  ;;  %v13567_v7 = vld [vmem:[%s19735_s3 + $0x864] ss:$16 sps:$4 sm:$0xff]   ;;  %v13634_v18 = vld [vmem:[%s19735_s3 + $0x9c8] ss:$16 sps:$4 sm:$0xff]  }
 0x1bc   : > { %3557 = vmatprep.subr.bf16.mxu1 %v13558_v19  ;;  %v13639_v19 = vld [vmem:[%s19735_s3 + $0x9e4] ss:$16 sps:$4 sm:$0xff]  }
 0x1bd   : > { %3300 = vmatpush1.bf16.msra.mxu0 %v13553_v20  ;;  %v13642_v20 = vld [vmem:[%s19735_s3 + $0x9ec] ss:$16 sps:$4 sm:$0xff]  }
 0x1be   : > { %3558 = vmatpush1.bf16.msra.mxu1 %v13556_v21  ;;  %3301 = vmatprep.subr.bf16.mxu0 %v13561_v22  ;;  %v13637_v21 = vld [vmem:[%s19735_s3 + $0x9e0] ss:$16 sps:$4 sm:$0xff]   ;;  %v13640_v22 = vld [vmem:[%s19735_s3 + $0x9e8] ss:$16 sps:$4 sm:$0xff]  }
 0x1bf   : > { %3559 = vmatprep.subr.bf16.mxu1 %v13564_v23  ;;  %v13648_v23 = vld [vmem:[%s19735_s3 + $0xa0c] ss:$16 sps:$4 sm:$0xff]  }
 0x1c1   : > { %3302 = vmatpush1.bf16.msra.mxu0 %v13559_v59  ;;  %v13645_v59 = vld [vmem:[%s19735_s3 + $0xa04] ss:$16 sps:$4 sm:$0xff]  }
 0x1c2   : > { %3560 = vmatpush1.bf16.msra.mxu1 %v13562_v24  ;;  %3303 = vmatprep.subr.bf16.mxu0 %v13567_v7  ;;  %v13643_v24 = vld [vmem:[%s19735_s3 + $0xa00] ss:$16 sps:$4 sm:$0xff]   ;;  %v13646_v7 = vld [vmem:[%s19735_s3 + $0xa08] ss:$16 sps:$4 sm:$0xff]  }
 0x1c3   : > { %3561 = vmatprep.subr.bf16.mxu1 %v13570_v26  ;;  %v13654_v26 = vld [vmem:[%s19735_s3 + $0xa2c] ss:$16 sps:$4 sm:$0xff]  }
 0x1c5   : > { %3304 = vmatpush1.bf16.msra.mxu0 %v13565_v25  ;;  %v13651_v25 = vld [vmem:[%s19735_s3 + $0xa24] ss:$16 sps:$4 sm:$0xff]  }
 0x1c6   : > { %3562 = vmatpush1.bf16.msra.mxu1 %v13568_v27  ;;  %3305 = vmatprep.subr.bf16.mxu0 %v13573_v30  ;;  %v13649_v27 = vld [vmem:[%s19735_s3 + $0xa20] ss:$16 sps:$4 sm:$0xff]   ;;  %v13652_v30 = vld [vmem:[%s19735_s3 + $0xa28] ss:$16 sps:$4 sm:$0xff]  }
 0x1c7   : > { %3563 = vmatprep.subr.bf16.mxu1 %v13576_v33  ;;  %v13660_v33 = vld [vmem:[%s19735_s3 + $0xa4c] ss:$16 sps:$4 sm:$0xff]  }
 0x1c9   : > { %3306 = vmatpush1.bf16.msra.mxu0 %v13571_v32  ;;  %v13657_v32 = vld [vmem:[%s19735_s3 + $0xa44] ss:$16 sps:$4 sm:$0xff]  }
 0x1ca   : > { %3564 = vmatpush1.bf16.msra.mxu1 %v13574_v34  ;;  %3307 = vmatprep.subr.bf16.mxu0 %v13579_v35  ;;  %v13655_v34 = vld [vmem:[%s19735_s3 + $0xa40] ss:$16 sps:$4 sm:$0xff]   ;;  %v13663_v35 = vld [vmem:[%s19735_s3 + $0xa64] ss:$16 sps:$4 sm:$0xff]  }
 0x1cb   : > { %3565 = vmatprep.subr.bf16.mxu1 %v13582_v37  ;;  %v13664_v37 = vld [vmem:[%s19735_s3 + $0xa68] ss:$16 sps:$4 sm:$0xff]  }
 0x1cd   : > { %3308 = vmatpush1.bf16.msra.mxu0 %v13577_v36  ;;  %v13666_v36 = vld [vmem:[%s19735_s3 + $0xa6c] ss:$16 sps:$4 sm:$0xff]  }
 0x1ce   : > { %3566 = vmatpush1.bf16.msra.mxu1 %v13580_v38  ;;  %3309 = vmatprep.subr.bf16.mxu0 %v13585_v39  ;;  %v13669_v38 = vld [vmem:[%s19735_s3 + $0xa84] ss:$16 sps:$4 sm:$0xff]   ;;  %v13672_v39 = vld [vmem:[%s19735_s3 + $0xa8c] ss:$16 sps:$4 sm:$0xff]  }
 0x1cf   : > { %3567 = vmatprep.subr.bf16.mxu1 %v13588_v41  ;;  %v13670_v41 = vld [vmem:[%s19735_s3 + $0xa88] ss:$16 sps:$4 sm:$0xff]  }
 0x1d1   : > { %3310 = vmatpush1.bf16.msra.mxu0 %v13583_v40  ;;  %v13667_v40 = vld [vmem:[%s19735_s3 + $0xa80] ss:$16 sps:$4 sm:$0xff]  }
 0x1d2   : > { %3568 = vmatpush1.bf16.msra.mxu1 %v13586_v42  ;;  %3311 = vmatprep.subr.bf16.mxu0 %v13591_v43  ;;  %v13675_v42 = vld [vmem:[%s19735_s3 + $0xaa4] ss:$16 sps:$4 sm:$0xff]   ;;  %v13678_v43 = vld [vmem:[%s19735_s3 + $0xaac] ss:$16 sps:$4 sm:$0xff]  }
 0x1d3   : > { %3569 = vmatprep.subr.bf16.mxu1 %v13594_v45  ;;  %v13676_v45 = vld [vmem:[%s19735_s3 + $0xaa8] ss:$16 sps:$4 sm:$0xff]  }
 0x1d5   : > { %3312 = vmatpush1.bf16.msra.mxu0 %v13589_v44  ;;  %v13673_v44 = vld [vmem:[%s19735_s3 + $0xaa0] ss:$16 sps:$4 sm:$0xff]  }
 0x1d6   : > { %3570 = vmatpush1.bf16.msra.mxu1 %v13592_v46  ;;  %3313 = vmatprep.subr.bf16.mxu0 %v13597_v47  ;;  %v13681_v46 = vld [vmem:[%s19735_s3 + $0xac4] ss:$16 sps:$4 sm:$0xff]   ;;  %v13684_v47 = vld [vmem:[%s19735_s3 + $0xacc] ss:$16 sps:$4 sm:$0xff]  }
 0x1d7   : > { %3571 = vmatprep.subr.bf16.mxu1 %v13600_v50  ;;  %v13682_v50 = vld [vmem:[%s19735_s3 + $0xac8] ss:$16 sps:$4 sm:$0xff]  }
 0x1d9   : > { %3314 = vmatpush1.bf16.msra.mxu0 %v13595_v49  ;;  %v13679_v49 = vld [vmem:[%s19735_s3 + $0xac0] ss:$16 sps:$4 sm:$0xff]  }
 0x1da   : > { %3572 = vmatpush1.bf16.msra.mxu1 %v13598_v51  ;;  %3315 = vmatprep.subr.bf16.mxu0 %v13603_v52  ;;  %v13687_v51 = vld [vmem:[%s19735_s3 + $0xae4] ss:$16 sps:$4 sm:$0xff]   ;;  %v13690_v52 = vld [vmem:[%s19735_s3 + $0xaec] ss:$16 sps:$4 sm:$0xff]  }
 0x1db   : > { %3573 = vmatprep.subr.bf16.mxu1 %v13606_v54  ;;  %v13688_v54 = vld [vmem:[%s19735_s3 + $0xae8] ss:$16 sps:$4 sm:$0xff]  }
 0x1dd   : > { %3316 = vmatpush1.bf16.msra.mxu0 %v13601_v53  ;;  %v13685_v53 = vld [vmem:[%s19735_s3 + $0xae0] ss:$16 sps:$4 sm:$0xff]  }
 0x1de   : > { %3574 = vmatpush1.bf16.msra.mxu1 %v13604_v55  ;;  %3317 = vmatprep.subr.bf16.mxu0 %v13609_v48  ;;  %v13693_v55 = vld [vmem:[%s19735_s3 + $0xb04] ss:$16 sps:$4 sm:$0xff]   ;;  %v13696_v48 = vld [vmem:[%s19735_s3 + $0xb0c] ss:$16 sps:$4 sm:$0xff]  }
 0x1df   : > { %3575 = vmatprep.subr.bf16.mxu1 %v13612_v57  ;;  %v13694_v57 = vld [vmem:[%s19735_s3 + $0xb08] ss:$16 sps:$4 sm:$0xff]  }
 0x1e1   : > { %3318 = vmatpush1.bf16.msra.mxu0 %v13607_v56  ;;  %v13691_v56 = vld [vmem:[%s19735_s3 + $0xb00] ss:$16 sps:$4 sm:$0xff]  }
 0x1e2   : > { %3576 = vmatpush1.bf16.msra.mxu1 %v13610_v6  ;;  %3319 = vmatprep.subr.bf16.mxu0 %v13615_v58  ;;  %v13699_v6 = vld [vmem:[%s19735_s3 + $0xb24] ss:$16 sps:$4 sm:$0xff]   ;;  %v13702_v58 = vld [vmem:[%s19735_s3 + $0xb2c] ss:$16 sps:$4 sm:$0xff]  }
 0x1e3   : > { %3577 = vmatprep.subr.bf16.mxu1 %v13618_v0  ;;  %v13700_v0 = vld [vmem:[%s19735_s3 + $0xb28] ss:$16 sps:$4 sm:$0xff]  }
 0x1e5   : > { %3320 = vmatpush1.bf16.msra.mxu0 %v13613_v60  ;;  %v13697_v60 = vld [vmem:[%s19735_s3 + $0xb20] ss:$16 sps:$4 sm:$0xff]  }
 0x1e6   : > { %3578 = vmatpush1.bf16.msra.mxu1 %v13616_v3  ;;  %3321 = vmatprep.subr.bf16.mxu0 %v13621_v4  ;;  %v13705_v3 = vld [vmem:[%s19735_s3 + $0xb44] ss:$16 sps:$4 sm:$0xff]   ;;  %v13708_v4 = vld [vmem:[%s19735_s3 + $0xb4c] ss:$16 sps:$4 sm:$0xff]  }
 0x1e7   : > { %3579 = vmatprep.subr.bf16.mxu1 %v13624_v10  ;;  %v13706_v10 = vld [vmem:[%s19735_s3 + $0xb48] ss:$16 sps:$4 sm:$0xff]  }
 0x1e9   : > { %3322 = vmatpush1.bf16.msra.mxu0 %v13619_v5  ;;  %v13703_v5 = vld [vmem:[%s19735_s3 + $0xb40] ss:$16 sps:$4 sm:$0xff]  }
 0x1ea   : > { %3580 = vmatpush1.bf16.msra.mxu1 %v13622_v12  ;;  %3323 = vmatprep.subr.bf16.mxu0 %v13627_v13  ;;  %v13711_v12 = vld [vmem:[%s19735_s3 + $0xb64] ss:$16 sps:$4 sm:$0xff]   ;;  %v13714_v13 = vld [vmem:[%s19735_s3 + $0xb6c] ss:$16 sps:$4 sm:$0xff]  }
 0x1eb   : > { %3581 = vmatprep.subr.bf16.mxu1 %v13630_v1  ;;  %v13712_v1 = vld [vmem:[%s19735_s3 + $0xb68] ss:$16 sps:$4 sm:$0xff]  }
 0x1ed   : > { %3324 = vmatpush1.bf16.msra.mxu0 %v13625_v14  ;;  %v13709_v14 = vld [vmem:[%s19735_s3 + $0xb60] ss:$16 sps:$4 sm:$0xff]  }
 0x1ee   : > { %3582 = vmatpush1.bf16.msra.mxu1 %v13628_v15  ;;  %3325 = vmatprep.subr.bf16.mxu0 %v13633_v61  ;;  %v13717_v15 = vld [vmem:[%s19735_s3 + $0xb84] ss:$16 sps:$4 sm:$0xff]   ;;  %v13720_v61 = vld [vmem:[%s19735_s3 + $0xb8c] ss:$16 sps:$4 sm:$0xff]  }
 0x1ef   : > { %3583 = vmatprep.subr.bf16.mxu1 %v13636_v17  ;;  %v13718_v17 = vld [vmem:[%s19735_s3 + $0xb88] ss:$16 sps:$4 sm:$0xff]  }
 0x1f1   : > { %3326 = vmatpush1.bf16.msra.mxu0 %v13631_v16  ;;  %v13715_v16 = vld [vmem:[%s19735_s3 + $0xb80] ss:$16 sps:$4 sm:$0xff]  }
 0x1f2   : > { %3584 = vmatpush1.bf16.msra.mxu1 %v13634_v18  ;;  %3327 = vmatprep.subr.bf16.mxu0 %v13639_v19  ;;  %v13723_v18 = vld [vmem:[%s19735_s3 + $0xba4] ss:$16 sps:$4 sm:$0xff]   ;;  %v13726_v19 = vld [vmem:[%s19735_s3 + $0xbac] ss:$16 sps:$4 sm:$0xff]  }
 0x1f3   : > { %3585 = vmatprep.subr.bf16.mxu1 %v13642_v20  ;;  %v13721_v20 = vld [vmem:[%s19735_s3 + $0xba0] ss:$16 sps:$4 sm:$0xff]  }
 0x1f5   : > { %3328 = vmatpush1.bf16.msra.mxu0 %v13637_v21  ;;  %v13724_v21 = vld [vmem:[%s19735_s3 + $0xba8] ss:$16 sps:$4 sm:$0xff]  }
 0x1f6   : > { %3586 = vmatpush1.bf16.msra.mxu1 %v13640_v22  ;;  %3340 = vmatprep.subr.bf16.mxu0 %v13645_v59  ;;  %v13729_v22 = vld [vmem:[%s19735_s3 + $0xbc4] ss:$16 sps:$4 sm:$0xff]   ;;  %v13732_v59 = vld [vmem:[%s19735_s3 + $0xbcc] ss:$16 sps:$4 sm:$0xff]  }
 0x1f7   : > { %3598 = vmatprep.subr.bf16.mxu1 %v13648_v23  ;;  %v13727_v23 = vld [vmem:[%s19735_s3 + $0xbc0] ss:$16 sps:$4 sm:$0xff]  }
 0x1f8   : > { %3330 = vmatmul.mubr.bf16.vlgmr.msra.gmra.mrb[8].mxu0 %v15597_v8 }
 0x1f9   : > { %3588 = vmatmul.mubr.bf16.vlgmr.msra.gmra.mrb[0].mxu1 %v15597_v8  ;;  %3341 = vmatpush1.bf16.msra.mxu0 %v13643_v24  ;;  %v13658_v8 = vld [vmem:[%s19735_s3 + $0xa48] ss:$16 sps:$4 sm:$0xff]  }
 0x1fa   : > { %3372 = vmatprep.mubr.bf16.mxu0 %v15673_v62  ;;  %3599 = vmatpush1.bf16.msra.mxu1 %v13646_v7  ;;  %v13730_v24 = vld [vmem:[%s19735_s3 + $0xbc8] ss:$16 sps:$4 sm:$0xff]   ;;  %v13735_v7 = vld [vmem:[%s19735_s3 + $0xbe4] ss:$16 sps:$4 sm:$0xff]  }
 0x1fb   : > { %3630 = vmatprep.mubr.bf16.mxu1 %v15673_v62  ;;  %3342 = vmatprep.subr.bf16.mxu0 %v13651_v25  ;;  %v13661_v62 = vld [vmem:[%s19735_s3 + $0xa60] ss:$16 sps:$4 sm:$0xff]   ;;  %v13738_v25 = vld [vmem:[%s19735_s3 + $0xbec] ss:$16 sps:$4 sm:$0xff]  }
 0x1fc   : > { %3600 = vmatprep.subr.bf16.mxu1 %v13654_v26  ;;  %v13733_v26 = vld [vmem:[%s19735_s3 + $0xbe0] ss:$16 sps:$4 sm:$0xff]  }
 0x1fd   : > { %3343 = vmatpush1.bf16.msra.mxu0 %v13649_v27  ;;  %v13736_v27 = vld [vmem:[%s19735_s3 + $0xbe8] ss:$16 sps:$4 sm:$0xff]  }
 0x1fe   : > { %3601 = vmatpush1.bf16.msra.mxu1 %v13652_v30  ;;  %3344 = vmatprep.subr.bf16.mxu0 %v13657_v32  ;;  %v13741_v30 = vld [vmem:[%s19737_s5 + $0x4] ss:$16 sps:$4 sm:$0xff]   ;;  %v13744_v32 = vld [vmem:[%s19737_s5 + $0xc] ss:$16 sps:$4 sm:$0xff]  }
 0x1ff   : > { %3602 = vmatprep.subr.bf16.mxu1 %v13660_v33  ;;  %v13739_v33 = vld [vmem:[%s19737_s5] ss:$16 sps:$4 sm:$0xff]  }
 0x201   : > { %3345 = vmatpush1.bf16.msra.mxu0 %v13655_v34  ;;  %v13742_v34 = vld [vmem:[%s19737_s5 + $0x8] ss:$16 sps:$4 sm:$0xff]  }
 0x202   : > { %3603 = vmatpush1.bf16.msra.mxu1 %v13658_v8  ;;  %3346 = vmatprep.subr.bf16.mxu0 %v13663_v35  ;;  %v13747_v8 = vld [vmem:[%s19737_s5 + $0x24] ss:$16 sps:$4 sm:$0xff]   ;;  %v13750_v35 = vld [vmem:[%s19737_s5 + $0x2c] ss:$16 sps:$4 sm:$0xff]  }
 0x203   : > { %3604 = vmatprep.subr.bf16.mxu1 %v13666_v36  ;;  %v13745_v36 = vld [vmem:[%s19737_s5 + $0x20] ss:$16 sps:$4 sm:$0xff]  }
 0x205   : > { %3347 = vmatpush1.bf16.msra.mxu0 %v13661_v62  ;;  %v13748_v62 = vld [vmem:[%s19737_s5 + $0x28] ss:$16 sps:$4 sm:$0xff]  }
 0x206   : > { %3605 = vmatpush1.bf16.msra.mxu1 %v13664_v37  ;;  %3348 = vmatprep.subr.bf16.mxu0 %v13669_v38  ;;  %v13753_v37 = vld [vmem:[%s19737_s5 + $0x44] ss:$16 sps:$4 sm:$0xff]   ;;  %v13756_v38 = vld [vmem:[%s19737_s5 + $0x4c] ss:$16 sps:$4 sm:$0xff]  }
 0x207   : > { %3606 = vmatprep.subr.bf16.mxu1 %v13672_v39  ;;  %v13751_v39 = vld [vmem:[%s19737_s5 + $0x40] ss:$16 sps:$4 sm:$0xff]  }
 0x209   : > { %3349 = vmatpush1.bf16.msra.mxu0 %v13667_v40  ;;  %v13754_v40 = vld [vmem:[%s19737_s5 + $0x48] ss:$16 sps:$4 sm:$0xff]  }
 0x20a   : > { %3607 = vmatpush1.bf16.msra.mxu1 %v13670_v41  ;;  %3350 = vmatprep.subr.bf16.mxu0 %v13675_v42  ;;  %v13762_v41 = vld [vmem:[%s19737_s5 + $0x6c] ss:$16 sps:$4 sm:$0xff]   ;;  %v13757_v42 = vld [vmem:[%s19737_s5 + $0x60] ss:$16 sps:$4 sm:$0xff]  }
 0x20b   : > { %3608 = vmatprep.subr.bf16.mxu1 %v13678_v43  ;;  %v13760_v43 = vld [vmem:[%s19737_s5 + $0x68] ss:$16 sps:$4 sm:$0xff]  }
 0x20d   : > { %3351 = vmatpush1.bf16.msra.mxu0 %v13673_v44  ;;  %v13765_v44 = vld [vmem:[%s19737_s5 + $0x84] ss:$16 sps:$4 sm:$0xff]  }
 0x20e   : > { %3609 = vmatpush1.bf16.msra.mxu1 %v13676_v45  ;;  %3352 = vmatprep.subr.bf16.mxu0 %v13681_v46  ;;  %v13768_v45 = vld [vmem:[%s19737_s5 + $0x8c] ss:$16 sps:$4 sm:$0xff]   ;;  %v13763_v46 = vld [vmem:[%s19737_s5 + $0x80] ss:$16 sps:$4 sm:$0xff]  }
 0x20f   : > { %3610 = vmatprep.subr.bf16.mxu1 %v13684_v47  ;;  %v13766_v47 = vld [vmem:[%s19737_s5 + $0x88] ss:$16 sps:$4 sm:$0xff]  }
 0x211   : > { %3353 = vmatpush1.bf16.msra.mxu0 %v13679_v49  ;;  %v13771_v49 = vld [vmem:[%s19737_s5 + $0xa4] ss:$16 sps:$4 sm:$0xff]  }
 0x212   : > { %3611 = vmatpush1.bf16.msra.mxu1 %v13682_v50  ;;  %3354 = vmatprep.subr.bf16.mxu0 %v13687_v51  ;;  %v13774_v50 = vld [vmem:[%s19737_s5 + $0xac] ss:$16 sps:$4 sm:$0xff]   ;;  %v13769_v51 = vld [vmem:[%s19737_s5 + $0xa0] ss:$16 sps:$4 sm:$0xff]  }
 0x213   : > { %3612 = vmatprep.subr.bf16.mxu1 %v13690_v52  ;;  %v13772_v52 = vld [vmem:[%s19737_s5 + $0xa8] ss:$16 sps:$4 sm:$0xff]  }
 0x215   : > { %3355 = vmatpush1.bf16.msra.mxu0 %v13685_v53  ;;  %v13777_v53 = vld [vmem:[%s19737_s5 + $0xc4] ss:$16 sps:$4 sm:$0xff]  }
 0x216   : > { %3613 = vmatpush1.bf16.msra.mxu1 %v13688_v54  ;;  %3356 = vmatprep.subr.bf16.mxu0 %v13693_v55  ;;  %v13780_v54 = vld [vmem:[%s19737_s5 + $0xcc] ss:$16 sps:$4 sm:$0xff]   ;;  %v13775_v55 = vld [vmem:[%s19737_s5 + $0xc0] ss:$16 sps:$4 sm:$0xff]  }
 0x217   : > { %3614 = vmatprep.subr.bf16.mxu1 %v13696_v48  ;;  %v13778_v48 = vld [vmem:[%s19737_s5 + $0xc8] ss:$16 sps:$4 sm:$0xff]  }
 0x219   : > { %3357 = vmatpush1.bf16.msra.mxu0 %v13691_v56  ;;  %v13783_v56 = vld [vmem:[%s19737_s5 + $0xe4] ss:$16 sps:$4 sm:$0xff]  }
 0x21a   : > { %3615 = vmatpush1.bf16.msra.mxu1 %v13694_v57  ;;  %3358 = vmatprep.subr.bf16.mxu0 %v13699_v6  ;;  %v13786_v57 = vld [vmem:[%s19737_s5 + $0xec] ss:$16 sps:$4 sm:$0xff]   ;;  %v13781_v6 = vld [vmem:[%s19737_s5 + $0xe0] ss:$16 sps:$4 sm:$0xff]  }
 0x21b   : > { %3616 = vmatprep.subr.bf16.mxu1 %v13702_v58  ;;  %v13784_v58 = vld [vmem:[%s19737_s5 + $0xe8] ss:$16 sps:$4 sm:$0xff]  }
 0x21d   : > { %3359 = vmatpush1.bf16.msra.mxu0 %v13697_v60  ;;  %v13789_v60 = vld [vmem:[%s19737_s5 + $0x104] ss:$16 sps:$4 sm:$0xff]  }
 0x21e   : > { %3617 = vmatpush1.bf16.msra.mxu1 %v13700_v0  ;;  %3360 = vmatprep.subr.bf16.mxu0 %v13705_v3  ;;  %v13792_v0 = vld [vmem:[%s19737_s5 + $0x10c] ss:$16 sps:$4 sm:$0xff]   ;;  %v13787_v3 = vld [vmem:[%s19737_s5 + $0x100] ss:$16 sps:$4 sm:$0xff]  }
 0x21f   : > { %3618 = vmatprep.subr.bf16.mxu1 %v13708_v4  ;;  %v13790_v4 = vld [vmem:[%s19737_s5 + $0x108] ss:$16 sps:$4 sm:$0xff]  }
 0x221   : > { %3361 = vmatpush1.bf16.msra.mxu0 %v13703_v5  ;;  %v13795_v5 = vld [vmem:[%s19737_s5 + $0x124] ss:$16 sps:$4 sm:$0xff]  }
 0x222   : > { %3619 = vmatpush1.bf16.msra.mxu1 %v13706_v10  ;;  %3362 = vmatprep.subr.bf16.mxu0 %v13711_v12  ;;  %v13798_v10 = vld [vmem:[%s19737_s5 + $0x12c] ss:$16 sps:$4 sm:$0xff]   ;;  %v13793_v12 = vld [vmem:[%s19737_s5 + $0x120] ss:$16 sps:$4 sm:$0xff]  }
 0x223   : > { %3620 = vmatprep.subr.bf16.mxu1 %v13714_v13  ;;  %v13796_v13 = vld [vmem:[%s19737_s5 + $0x128] ss:$16 sps:$4 sm:$0xff]  }
 0x225   : > { %3363 = vmatpush1.bf16.msra.mxu0 %v13709_v14  ;;  %v13801_v14 = vld [vmem:[%s19737_s5 + $0x144] ss:$16 sps:$4 sm:$0xff]  }
 0x226   : > { %3621 = vmatpush1.bf16.msra.mxu1 %v13712_v1  ;;  %3364 = vmatprep.subr.bf16.mxu0 %v13717_v15  ;;  %v13804_v1 = vld [vmem:[%s19737_s5 + $0x14c] ss:$16 sps:$4 sm:$0xff]   ;;  %v13799_v15 = vld [vmem:[%s19737_s5 + $0x140] ss:$16 sps:$4 sm:$0xff]  }
 0x227   : > { %3622 = vmatprep.subr.bf16.mxu1 %v13720_v61  ;;  %v13802_v61 = vld [vmem:[%s19737_s5 + $0x148] ss:$16 sps:$4 sm:$0xff]  }
 0x229   : > { %3365 = vmatpush1.bf16.msra.mxu0 %v13715_v16  ;;  %v13807_v16 = vld [vmem:[%s19737_s5 + $0x164] ss:$16 sps:$4 sm:$0xff]  }
 0x22a   : > { %3623 = vmatpush1.bf16.msra.mxu1 %v13718_v17  ;;  %3366 = vmatprep.subr.bf16.mxu0 %v13723_v18  ;;  %v13810_v17 = vld [vmem:[%s19737_s5 + $0x16c] ss:$16 sps:$4 sm:$0xff]   ;;  %v13805_v18 = vld [vmem:[%s19737_s5 + $0x160] ss:$16 sps:$4 sm:$0xff]  }
 0x22b   : > { %3624 = vmatprep.subr.bf16.mxu1 %v13726_v19  ;;  %v13808_v19 = vld [vmem:[%s19737_s5 + $0x168] ss:$16 sps:$4 sm:$0xff]  }
 0x22d   : > { %3367 = vmatpush1.bf16.msra.mxu0 %v13721_v20  ;;  %v13813_v20 = vld [vmem:[%s19737_s5 + $0x184] ss:$16 sps:$4 sm:$0xff]  }
 0x22e   : > { %3625 = vmatpush1.bf16.msra.mxu1 %v13724_v21  ;;  %3368 = vmatprep.subr.bf16.mxu0 %v13729_v22  ;;  %v13816_v21 = vld [vmem:[%s19737_s5 + $0x18c] ss:$16 sps:$4 sm:$0xff]   ;;  %v13811_v22 = vld [vmem:[%s19737_s5 + $0x180] ss:$16 sps:$4 sm:$0xff]  }
 0x22f   : > { %3626 = vmatprep.subr.bf16.mxu1 %v13732_v59  ;;  %v13814_v59 = vld [vmem:[%s19737_s5 + $0x188] ss:$16 sps:$4 sm:$0xff]  }
 0x231   : > { %3369 = vmatpush1.bf16.msra.mxu0 %v13727_v23  ;;  %v13819_v23 = vld [vmem:[%s19737_s5 + $0x1a4] ss:$16 sps:$4 sm:$0xff]  }
 0x232   : > { %3627 = vmatpush1.bf16.msra.mxu1 %v13730_v24  ;;  %3370 = vmatprep.subr.bf16.mxu0 %v13735_v7  ;;  %v13822_v24 = vld [vmem:[%s19737_s5 + $0x1ac] ss:$16 sps:$4 sm:$0xff]   ;;  %v13817_v7 = vld [vmem:[%s19737_s5 + $0x1a0] ss:$16 sps:$4 sm:$0xff]  }
 0x233   : > { %3628 = vmatprep.subr.bf16.mxu1 %v13738_v25  ;;  %v13820_v25 = vld [vmem:[%s19737_s5 + $0x1a8] ss:$16 sps:$4 sm:$0xff]  }
 0x235   : > { %3371 = vmatpush1.bf16.msra.mxu0 %v13733_v26  ;;  %v13825_v26 = vld [vmem:[%s19737_s5 + $0x1c4] ss:$16 sps:$4 sm:$0xff]  }
 0x236   : > { %3629 = vmatpush1.bf16.msra.mxu1 %v13736_v27  ;;  %6029 = vmatprep.subr.bf16.mxu0 %v13741_v30  ;;  %v13828_v27 = vld [vmem:[%s19737_s5 + $0x1cc] ss:$16 sps:$4 sm:$0xff]   ;;  %v13823_v30 = vld [vmem:[%s19737_s5 + $0x1c0] ss:$16 sps:$4 sm:$0xff]  }
 0x237   : > { %6275 = vmatprep.subr.bf16.mxu1 %v13744_v32  ;;  %v13826_v32 = vld [vmem:[%s19737_s5 + $0x1c8] ss:$16 sps:$4 sm:$0xff]  }
 0x238   : > { %3373 = vmatmul.mubr.bf16.vlgmr.msra.gmra.mrb[8].mxu0 %v15675_v63 }
 0x239   : > { %3631 = vmatmul.mubr.bf16.vlgmr.msra.gmra.mrb[0].mxu1 %v15675_v63  ;;  %6030 = vmatpush1.bf16.msra.mxu0 %v13739_v33  ;;  %v13759_v63 = vld [vmem:[%s19737_s5 + $0x64] ss:$16 sps:$4 sm:$0xff]  }
 0x23a   : > { %6276 = vmatpush1.bf16.msra.mxu1 %v13742_v34  ;;  %6031 = vmatprep.subr.bf16.mxu0 %v13747_v8  ;;  %v13831_v33 = vld [vmem:[%s19737_s5 + $0x1e4] ss:$16 sps:$4 sm:$0xff]   ;;  %v13834_v34 = vld [vmem:[%s19737_s5 + $0x1ec] ss:$16 sps:$4 sm:$0xff]   ;;  %v13829_v8 = vld [vmem:[%s19737_s5 + $0x1e0] ss:$16 sps:$4 sm:$0xff]  }
 0x23b   : > { %6277 = vmatprep.subr.bf16.mxu1 %v13750_v35  ;;  %v13832_v35 = vld [vmem:[%s19737_s5 + $0x1e8] ss:$16 sps:$4 sm:$0xff]  }
 0x23d   : > { %6032 = vmatpush1.bf16.msra.mxu0 %v13745_v36  ;;  %v13837_v36 = vld [vmem:[%s19737_s5 + $0x204] ss:$16 sps:$4 sm:$0xff]  }
 0x23e   : > { %6278 = vmatpush1.bf16.msra.mxu1 %v13748_v62  ;;  %6033 = vmatprep.subr.bf16.mxu0 %v13753_v37  ;;  %v13840_v62 = vld [vmem:[%s19737_s5 + $0x20c] ss:$16 sps:$4 sm:$0xff]   ;;  %v1183_v37 = vld [vmem:[%s19736_s4] sm:$0xf] }
 0x23f   : > { %6279 = vmatprep.subr.bf16.mxu1 %v13756_v38  ;;  %v1188_v38 = vrot.slane %v1183_v37, %v15549_v29 }
 0x241   : > { %6034 = vmatpush1.bf16.msra.mxu0 %v13751_v39  ;;  %v1196_v39 = vrot.slane %v1183_v37, %v15600_v9 }
 0x242   : > { %6280 = vmatpush1.bf16.msra.mxu1 %v13754_v40  ;;  %6035 = vmatprep.subr.bf16.mxu0 %v13759_v63  ;;  %v1192_v40 = vrot.slane %v1183_v37, %v15557_v31  ;;  %v1200_v63 = vrot.slane %v1183_v37, %v15606_v11 }
 0x243   : > { %6281 = vmatprep.subr.bf16.mxu1 %v13762_v41 }
 0x245   : > { %6036 = vmatpush1.bf16.msra.mxu0 %v13757_v42 }
 0x246   : > { %6282 = vmatpush1.bf16.msra.mxu1 %v13760_v43  ;;  %6037 = vmatprep.subr.bf16.mxu0 %v13765_v44 }
 0x247   : > { %6283 = vmatprep.subr.bf16.mxu1 %v13768_v45 }
 0x249   : > { %6038 = vmatpush1.bf16.msra.mxu0 %v13763_v46 }
 0x24a   : > { %6284 = vmatpush1.bf16.msra.mxu1 %v13766_v47  ;;  %6039 = vmatprep.subr.bf16.mxu0 %v13771_v49 }
 0x24b   : > { %6285 = vmatprep.subr.bf16.mxu1 %v13774_v50 }
 0x24d   : > { %6040 = vmatpush1.bf16.msra.mxu0 %v13769_v51 }
 0x24e   : > { %6286 = vmatpush1.bf16.msra.mxu1 %v13772_v52  ;;  %6041 = vmatprep.subr.bf16.mxu0 %v13777_v53 }
 0x24f   : > { %6287 = vmatprep.subr.bf16.mxu1 %v13780_v54 }
 0x251   : > { %6042 = vmatpush1.bf16.msra.mxu0 %v13775_v55 }
 0x252   : > { %6288 = vmatpush1.bf16.msra.mxu1 %v13778_v48  ;;  %6043 = vmatprep.subr.bf16.mxu0 %v13783_v56 }
 0x253   : > { %6289 = vmatprep.subr.bf16.mxu1 %v13786_v57 }
 0x255   : > { %6044 = vmatpush1.bf16.msra.mxu0 %v13781_v6 }
 0x256   : > { %6290 = vmatpush1.bf16.msra.mxu1 %v13784_v58  ;;  %6045 = vmatprep.subr.bf16.mxu0 %v13789_v60 }
 0x257   : > { %6291 = vmatprep.subr.bf16.mxu1 %v13792_v0 }
 0x259   : > { %6046 = vmatpush1.bf16.msra.mxu0 %v13787_v3 }
 0x25a   : > { %6292 = vmatpush1.bf16.msra.mxu1 %v13790_v4  ;;  %6047 = vmatprep.subr.bf16.mxu0 %v13795_v5 }
 0x25b   : > { %6293 = vmatprep.subr.bf16.mxu1 %v13798_v10 }
 0x25d   : > { %6048 = vmatpush1.bf16.msra.mxu0 %v13793_v12 }
 0x25e   : > { %6294 = vmatpush1.bf16.msra.mxu1 %v13796_v13  ;;  %6049 = vmatprep.subr.bf16.mxu0 %v13801_v14 }
 0x25f   : > { %6295 = vmatprep.subr.bf16.mxu1 %v13804_v1  ;;  %v13835_v1 = vld [vmem:[%s19737_s5 + $0x200] ss:$16 sps:$4 sm:$0xff]  }
 0x261   : > { %6050 = vmatpush1.bf16.msra.mxu0 %v13799_v15  ;;  %v13838_v15 = vld [vmem:[%s19737_s5 + $0x208] ss:$16 sps:$4 sm:$0xff]  }
 0x262   : > { %6296 = vmatpush1.bf16.msra.mxu1 %v13802_v61  ;;  %6051 = vmatprep.subr.bf16.mxu0 %v13807_v16 }
 0x263   : > { %6297 = vmatprep.subr.bf16.mxu1 %v13810_v17 }
 0x265   : > { %6052 = vmatpush1.bf16.msra.mxu0 %v13805_v18 }
 0x266   : > { %6298 = vmatpush1.bf16.msra.mxu1 %v13808_v19  ;;  %6053 = vmatprep.subr.bf16.mxu0 %v13813_v20  ;;  %v13843_v19 = vld [vmem:[%s19737_s5 + $0x224] ss:$16 sps:$4 sm:$0xff]  }
 0x267   : > { %6299 = vmatprep.subr.bf16.mxu1 %v13816_v21 }
 0x269   : > { %6054 = vmatpush1.bf16.msra.mxu0 %v13811_v22 }
 0x26a   : > { %6300 = vmatpush1.bf16.msra.mxu1 %v13814_v59  ;;  %6055 = vmatprep.subr.bf16.mxu0 %v13819_v23  ;;  %v13846_v23 = vld [vmem:[%s19737_s5 + $0x22c] ss:$16 sps:$4 sm:$0xff]  }
 0x26b   : > { %6301 = vmatprep.subr.bf16.mxu1 %v13822_v24 }
 0x26d   : > { %6056 = vmatpush1.bf16.msra.mxu0 %v13817_v7 }
 0x26e   : > { %6302 = vmatpush1.bf16.msra.mxu1 %v13820_v25  ;;  %6057 = vmatprep.subr.bf16.mxu0 %v13825_v26 }
 0x26f   : > { %6303 = vmatprep.subr.bf16.mxu1 %v13828_v27  ;;  %v13841_v27 = vld [vmem:[%s19737_s5 + $0x220] ss:$16 sps:$4 sm:$0xff]  }
 0x271   : > { %6058 = vmatpush1.bf16.msra.mxu0 %v13823_v30 }
 0x272   : > { %6304 = vmatpush1.bf16.msra.mxu1 %v13826_v32  ;;  %6059 = vmatprep.subr.bf16.mxu0 %v13831_v33 }
 0x273   : > { %6305 = vmatprep.subr.bf16.mxu1 %v13834_v34  ;;  %v13844_v34 = vld [vmem:[%s19737_s5 + $0x228] ss:$16 sps:$4 sm:$0xff]  }
 0x275   : > { %6060 = vmatpush1.bf16.msra.mxu0 %v13829_v8  ;;  %v13849_v8 = vld [vmem:[%s19737_s5 + $0x244] ss:$16 sps:$4 sm:$0xff]  }
 0x276   : > { %6306 = vmatpush1.bf16.msra.mxu1 %v13832_v35  ;;  %6070 = vmatprep.subr.bf16.mxu0 %v13837_v36 }
 0x277   : > { %6316 = vmatprep.subr.bf16.mxu1 %v13840_v62 }
 0x30b   : > { %v3374_v41 = vpop.f32.mrb[8].mxu0 }
 0x30c   : > { %v12984_v42 = vadd.f32 %v3374_v41, %v1188_v38  ;;  %v3632_v43 = vpop.f32.mrb[0].mxu1  ;;  %v3376_v44 = vpop.f32.mrb[9].mxu0 }
 0x30d   : > { %v12988_v45 = vadd.f32 %v3632_v43, %v1196_v39  ;;  %v12985_v46 = vadd.f32 %v3376_v44, %v1192_v40  ;;  %v3634_v47 = vpop.f32.mrb[1].mxu1  ;;  %v3378_v49 = vpop.f32.mrb[10].mxu0  ;;  %v13850_v43 = vld [vmem:[%s19737_s5 + $0x248] ss:$16 sps:$4 sm:$0xff]   ;;  %v13855_v44 = vld [vmem:[%s19737_s5 + $0x264] ss:$16 sps:$4 sm:$0xff]  }
 0x30e   : > { %v3641_v50 = vmax.f32 %v12984_v42, 0.0  ;;  %v12989_v51 = vadd.f32 %v3634_v47, %v1200_v63  ;;  %v12986_v52 = vadd.f32 %v3378_v49, %v1188_v38  ;;  %v3636_v53 = vpop.f32.mrb[2].mxu1  ;;  %v3380_v54 = vpop.f32.mrb[11].mxu0  ;;  %v13847_v42 = vld [vmem:[%s19737_s5 + $0x240] ss:$16 sps:$4 sm:$0xff]  }
 0x30f   : > { %v16776_v55 = vmax.f32 %v12988_v45, 0.0  ;;  %v3642_v48 = vmax.f32 %v12985_v46, 0.0  ;;  %v12990_v56 = vadd.f32 %v3636_v53, %v1196_v39  ;;  %v12987_v57 = vadd.f32 %v3380_v54, %v1192_v40  ;;  %v3638_v6 = vpop.f32.mrb[3].mxu1  ;;  %v13852_v39 = vld [vmem:[%s19737_s5 + $0x24c] ss:$16 sps:$4 sm:$0xff]  }
 0x310   : > { %v3658_v58 = vrot.slane %v3641_v50, 3  ;;  %v3675_v60 = vrot.slane %v3641_v50, 6  ;;  %v3691_v0 = vpack.c.bf16 %v3641_v50, %v3641_v50  ;;  %v3644_v4 = vmax.f32 %v12989_v51, 0.0  ;;  %v13858_v45 = vld [vmem:[%s19737_s5 + $0x26c] ss:$16 sps:$4 sm:$0xff]  }
 0x311   : > { %v3664_v3 = vrot.slane %v16776_v55, 3  ;;  %v3645_v5 = vmax.f32 %v12986_v52, 0.0  ;;  %v3647_v10 = vmax.f32 %v12990_v56, 0.0  ;;  %v3646_v12 = vmax.f32 %v12987_v57, 0.0  ;;  %v13853_v46 = vld [vmem:[%s19737_s5 + $0x260] ss:$16 sps:$4 sm:$0xff]  }
 0x312   : > { %v12991_v13 = vadd.f32 %v3638_v6, %v1200_v63  ;;  %v3692_v14 = vpack.c.bf16 %v3642_v48, %v3642_v48  ;;  %v3681_v61 = vrot.slane %v16776_v55, 6  ;;  %v3661_v16 = vrot.slane %v3642_v48, 3  ;;  %v13856_v47 = vld [vmem:[%s19737_s5 + $0x268] ss:$16 sps:$4 sm:$0xff]   ;;  %v13861_v49 = vld [vmem:[%s19737_s5 + $0x284] ss:$16 sps:$4 sm:$0xff]  }
 0x313   : > { %v3659_v17 = vrot.slane %v3645_v5, 3  ;;  %v3676_v18 = vrot.slane %v3645_v5, 6  ;;  %v3665_v20 = vrot.slane %v3647_v10, 3  ;;  %v3682_v21 = vrot.slane %v3647_v10, 6  ;;  %v13864_v50 = vld [vmem:[%s19737_s5 + $0x28c] ss:$16 sps:$4 sm:$0xff]  }
 0x314   : > { %v3662_v22 = vrot.slane %v3646_v12, 3  ;;  %v3679_v59 = vrot.slane %v3646_v12, 6  ;;  %6061 = vmatprep.mubr.bf16.mxu0 %v3692_v14  ;;  %6307 = vmatprep.mubr.bf16.mxu1 %v3692_v14  ;;  %v3648_v25 = vmax.f32 %v12991_v13, 0.0  ;;  %v3694_v26 = vpack.c.bf16 %v3644_v4, %v3644_v4  ;;  %v13859_v51 = vld [vmem:[%s19737_s5 + $0x280] ss:$16 sps:$4 sm:$0xff]  }
 0x315   : > { %v16793_v24 = vsel %vm3657_vm3, %v3658_v58, %v3659_v17  ;;  %v16796_v7 = vsel %vm3674_vm4, %v3675_v60, %v3676_v18  ;;  %6062 = vmatmul.mubr.bf16.vlgmr.msra.gmra.mrb[12].mxu0 %v3691_v0  ;;  %6308 = vmatmul.mubr.bf16.vlgmr.msra.gmra.mrb[4].mxu1 %v3691_v0  ;;  %v3678_v30 = vrot.slane %v3642_v48, 6  ;;  %v16802_v32 = vsel %vm3657_vm3, %v3664_v3, %v3665_v20  ;;  %v13862_v52 = vld [vmem:[%s19737_s5 + $0x288] ss:$16 sps:$4 sm:$0xff]   ;;  %v13867_v53 = vld [vmem:[%s19737_s5 + $0x2a4] ss:$16 sps:$4 sm:$0xff]  }
 0x316   : > { %v16805_v33 = vsel %vm3674_vm4, %v3681_v61, %v3682_v21  ;;  %6071 = vmatpush1.bf16.msra.mxu0 %v13835_v1  ;;  %6317 = vmatpush1.bf16.msra.mxu1 %v13838_v15  ;;  %v16814_v35 = vsel %vm3657_vm3, %v3661_v16, %v3662_v22  ;;  %v3667_v36 = vrot.slane %v3644_v4, 3  ;;  %v3684_v62 = vrot.slane %v3644_v4, 6  ;;  %v13870_v54 = vld [vmem:[%s19737_s5 + $0x2ac] ss:$16 sps:$4 sm:$0xff]   ;;  %v13865_v48 = vld [vmem:[%s19737_s5 + $0x2a0] ss:$16 sps:$4 sm:$0xff]  }
 0x317   : > { %v3668_v37 = vrot.slane %v3648_v25, 3  ;;  %v3685_v38 = vrot.slane %v3648_v25, 6  ;;  %6102 = vmatprep.mubr.bf16.mxu0 %v3694_v26  ;;  %6348 = vmatprep.mubr.bf16.mxu1 %v3694_v26  ;;  %v16820_v40 = vsel %vm3674_vm4, %v3678_v30, %v3679_v59  ;;  %v13868_v56 = vld [vmem:[%s19737_s5 + $0x2a8] ss:$16 sps:$4 sm:$0xff]   ;;  %v13873_v57 = vld [vmem:[%s19737_s5 + $0x2c4] ss:$16 sps:$4 sm:$0xff]  }
 0x318   : > { %6072 = vmatprep.subr.bf16.mxu0 %v13843_v19  ;;  %6318 = vmatprep.subr.bf16.mxu1 %v13846_v23  ;;  %v13876_v6 = vld [vmem:[%s19737_s5 + $0x2cc] ss:$16 sps:$4 sm:$0xff]   ;;  %v13871_v58 = vld [vmem:[%s19737_s5 + $0x2c0] ss:$16 sps:$4 sm:$0xff]   ;;  %v13874_v60 = vld [vmem:[%s19737_s5 + $0x2c8] ss:$16 sps:$4 sm:$0xff]  }
 0x319   : > { %v16823_v63 = vsel %vm3657_vm3, %v3667_v36, %v3668_v37  ;;  %v16826_v41 = vsel %vm3674_vm4, %v3684_v62, %v3685_v38  ;;  %v13879_v0 = vld [vmem:[%s19737_s5 + $0x2e4] ss:$16 sps:$4 sm:$0xff]   ;;  %v13882_v3 = vld [vmem:[%s19737_s5 + $0x2ec] ss:$16 sps:$4 sm:$0xff]   ;;  %v13877_v4 = vld [vmem:[%s19737_s5 + $0x2e0] ss:$16 sps:$4 sm:$0xff]  }
 0x31a   : > { %6073 = vmatpush1.bf16.msra.mxu0 %v13841_v27  ;;  %6319 = vmatpush1.bf16.msra.mxu1 %v13844_v34  ;;  %v13880_v5 = vld [vmem:[%s19737_s5 + $0x2e8] ss:$16 sps:$4 sm:$0xff]   ;;  %v13885_v10 = vld [vmem:[%s19737_s5 + $0x304] ss:$16 sps:$4 sm:$0xff]   ;;  %v13888_v12 = vld [vmem:[%s19737_s5 + $0x30c] ss:$16 sps:$4 sm:$0xff]  }
 0x31b   : > { %6074 = vmatprep.subr.bf16.mxu0 %v13849_v8  ;;  %6320 = vmatprep.subr.bf16.mxu1 %v13852_v39  ;;  %v13883_v13 = vld [vmem:[%s19737_s5 + $0x300] ss:$16 sps:$4 sm:$0xff]   ;;  %v13886_v14 = vld [vmem:[%s19737_s5 + $0x308] ss:$16 sps:$4 sm:$0xff]   ;;  %v13891_v1 = vld [vmem:[%s19737_s5 + $0x324] ss:$16 sps:$4 sm:$0xff]  }
 0x31c   : > { %v13894_v15 = vld [vmem:[%s19737_s5 + $0x32c] ss:$16 sps:$4 sm:$0xff]   ;;  %v13889_v61 = vld [vmem:[%s19737_s5 + $0x320] ss:$16 sps:$4 sm:$0xff]   ;;  %v13892_v16 = vld [vmem:[%s19737_s5 + $0x328] ss:$16 sps:$4 sm:$0xff]  }
 0x31d   : > { %v13897_v17 = vld [vmem:[%s19737_s5 + $0x344] ss:$16 sps:$4 sm:$0xff]   ;;  %v13900_v18 = vld [vmem:[%s19737_s5 + $0x34c] ss:$16 sps:$4 sm:$0xff]   ;;  %v13895_v19 = vld [vmem:[%s19737_s5 + $0x340] ss:$16 sps:$4 sm:$0xff]  }
 0x31e   : > { %6075 = vmatpush1.bf16.msra.mxu0 %v13847_v42  ;;  %6321 = vmatpush1.bf16.msra.mxu1 %v13850_v43  ;;  %v13898_v20 = vld [vmem:[%s19737_s5 + $0x348] ss:$16 sps:$4 sm:$0xff]   ;;  %v13903_v21 = vld [vmem:[%s19737_s5 + $0x364] ss:$16 sps:$4 sm:$0xff]   ;;  %v13906_v22 = vld [vmem:[%s19737_s5 + $0x36c] ss:$16 sps:$4 sm:$0xff]  }
 0x31f   : > { %6076 = vmatprep.subr.bf16.mxu0 %v13855_v44  ;;  %6322 = vmatprep.subr.bf16.mxu1 %v13858_v45  ;;  %v13901_v59 = vld [vmem:[%s19737_s5 + $0x360] ss:$16 sps:$4 sm:$0xff]   ;;  %v13904_v23 = vld [vmem:[%s19737_s5 + $0x368] ss:$16 sps:$4 sm:$0xff]   ;;  %v13909_v25 = vld [vmem:[%s19737_s5 + $0x384] ss:$16 sps:$4 sm:$0xff]  }
 0x320   : > { %v13912_v26 = vld [vmem:[%s19737_s5 + $0x38c] ss:$16 sps:$4 sm:$0xff]   ;;  %v13907_v27 = vld [vmem:[%s19737_s5 + $0x380] ss:$16 sps:$4 sm:$0xff]   ;;  %v13910_v30 = vld [vmem:[%s19737_s5 + $0x388] ss:$16 sps:$4 sm:$0xff]  }
 0x321   : > { %v13915_v34 = vld [vmem:[%s19737_s5 + $0x3a4] ss:$16 sps:$4 sm:$0xff]   ;;  %v13918_v8 = vld [vmem:[%s19737_s5 + $0x3ac] ss:$16 sps:$4 sm:$0xff]   ;;  %v13913_v36 = vld [vmem:[%s19737_s5 + $0x3a0] ss:$16 sps:$4 sm:$0xff]  }
 0x322   : > { %6077 = vmatpush1.bf16.msra.mxu0 %v13853_v46  ;;  %6323 = vmatpush1.bf16.msra.mxu1 %v13856_v47  ;;  %v13916_v62 = vld [vmem:[%s19737_s5 + $0x3a8] ss:$16 sps:$4 sm:$0xff]   ;;  %v13921_v37 = vld [vmem:[%s19737_s5 + $0x3c4] ss:$16 sps:$4 sm:$0xff]   ;;  %v13924_v38 = vld [vmem:[%s19737_s5 + $0x3cc] ss:$16 sps:$4 sm:$0xff]  }
 0x323   : > { %6078 = vmatprep.subr.bf16.mxu0 %v13861_v49  ;;  %6324 = vmatprep.subr.bf16.mxu1 %v13864_v50  ;;  %v13919_v39 = vld [vmem:[%s19737_s5 + $0x3c0] ss:$16 sps:$4 sm:$0xff]   ;;  %v13922_v42 = vld [vmem:[%s19737_s5 + $0x3c8] ss:$16 sps:$4 sm:$0xff]   ;;  %v13927_v43 = vld [vmem:[%s19737_s5 + $0x3e4] ss:$16 sps:$4 sm:$0xff]  }
 0x324   : > { %v13930_v44 = vld [vmem:[%s19737_s5 + $0x3ec] ss:$16 sps:$4 sm:$0xff]   ;;  %v13925_v45 = vld [vmem:[%s19737_s5 + $0x3e0] ss:$16 sps:$4 sm:$0xff]   ;;  %v13928_v46 = vld [vmem:[%s19737_s5 + $0x3e8] ss:$16 sps:$4 sm:$0xff]  }
 0x325   : > { %v13933_v47 = vld [vmem:[%s19737_s5 + $0x404] ss:$16 sps:$4 sm:$0xff]   ;;  %v13936_v49 = vld [vmem:[%s19737_s5 + $0x40c] ss:$16 sps:$4 sm:$0xff]   ;;  %v13931_v50 = vld [vmem:[%s19737_s5 + $0x400] ss:$16 sps:$4 sm:$0xff]  }
 0x326   : > { %6079 = vmatpush1.bf16.msra.mxu0 %v13859_v51  ;;  %6325 = vmatpush1.bf16.msra.mxu1 %v13862_v52  ;;  %v3693_v51 = vpack.c.bf16 %v16776_v55, %v16776_v55  ;;  %v13934_v52 = vld [vmem:[%s19737_s5 + $0x408] ss:$16 sps:$4 sm:$0xff]   ;;  %v13937_v55 = vld [vmem:[%s19737_s5 + $0x420] ss:$16 sps:$4 sm:$0xff]  }
 0x327   : > { %6080 = vmatprep.subr.bf16.mxu0 %v13867_v53  ;;  %6326 = vmatprep.subr.bf16.mxu1 %v13870_v54  ;;  %v3696_v53 = vpack.c.bf16 %v16814_v35, %v16814_v35  ;;  %v13939_v54 = vld [vmem:[%s19737_s5 + $0x424] ss:$16 sps:$4 sm:$0xff]   ;;  %v13940_v35 = vld [vmem:[%s19737_s5 + $0x428] ss:$16 sps:$4 sm:$0xff]  }
 0x32a   : > { %6081 = vmatpush1.bf16.msra.mxu0 %v13865_v48  ;;  %6327 = vmatpush1.bf16.msra.mxu1 %v13868_v56  ;;  %v13942_v48 = vld [vmem:[%s19737_s5 + $0x42c] ss:$16 sps:$4 sm:$0xff]   ;;  %v13945_v56 = vld [vmem:[%s19737_s5 + $0x444] ss:$16 sps:$4 sm:$0xff]  }
 0x32b   : > { %6082 = vmatprep.subr.bf16.mxu0 %v13873_v57  ;;  %6328 = vmatprep.subr.bf16.mxu1 %v13876_v6  ;;  %v13948_v57 = vld [vmem:[%s19737_s5 + $0x44c] ss:$16 sps:$4 sm:$0xff]   ;;  %v13943_v6 = vld [vmem:[%s19737_s5 + $0x440] ss:$16 sps:$4 sm:$0xff]  }
 0x32e   : > { %6083 = vmatpush1.bf16.msra.mxu0 %v13871_v58  ;;  %6329 = vmatpush1.bf16.msra.mxu1 %v13874_v60  ;;  %v13946_v58 = vld [vmem:[%s19737_s5 + $0x448] ss:$16 sps:$4 sm:$0xff]   ;;  %v13951_v60 = vld [vmem:[%s19737_s5 + $0x464] ss:$16 sps:$4 sm:$0xff]  }
 0x32f   : > { %6084 = vmatprep.subr.bf16.mxu0 %v13879_v0  ;;  %6330 = vmatprep.subr.bf16.mxu1 %v13882_v3  ;;  %v13954_v0 = vld [vmem:[%s19737_s5 + $0x46c] ss:$16 sps:$4 sm:$0xff]   ;;  %v13949_v3 = vld [vmem:[%s19737_s5 + $0x460] ss:$16 sps:$4 sm:$0xff]  }
 0x332   : > { %6085 = vmatpush1.bf16.msra.mxu0 %v13877_v4  ;;  %6331 = vmatpush1.bf16.msra.mxu1 %v13880_v5  ;;  %v13952_v4 = vld [vmem:[%s19737_s5 + $0x468] ss:$16 sps:$4 sm:$0xff]   ;;  %v13957_v5 = vld [vmem:[%s19737_s5 + $0x484] ss:$16 sps:$4 sm:$0xff]  }
 0x333   : > { %6086 = vmatprep.subr.bf16.mxu0 %v13885_v10  ;;  %6332 = vmatprep.subr.bf16.mxu1 %v13888_v12  ;;  %v13960_v10 = vld [vmem:[%s19737_s5 + $0x48c] ss:$16 sps:$4 sm:$0xff]   ;;  %v13955_v12 = vld [vmem:[%s19737_s5 + $0x480] ss:$16 sps:$4 sm:$0xff]  }
 0x336   : > { %6087 = vmatpush1.bf16.msra.mxu0 %v13883_v13  ;;  %6333 = vmatpush1.bf16.msra.mxu1 %v13886_v14  ;;  %v13958_v13 = vld [vmem:[%s19737_s5 + $0x488] ss:$16 sps:$4 sm:$0xff]   ;;  %v13963_v14 = vld [vmem:[%s19737_s5 + $0x4a4] ss:$16 sps:$4 sm:$0xff]  }
 0x337   : > { %6088 = vmatprep.subr.bf16.mxu0 %v13891_v1  ;;  %6334 = vmatprep.subr.bf16.mxu1 %v13894_v15  ;;  %v13966_v1 = vld [vmem:[%s19737_s5 + $0x4ac] ss:$16 sps:$4 sm:$0xff]   ;;  %v13961_v15 = vld [vmem:[%s19737_s5 + $0x4a0] ss:$16 sps:$4 sm:$0xff]  }
 0x33a   : > { %6089 = vmatpush1.bf16.msra.mxu0 %v13889_v61  ;;  %6335 = vmatpush1.bf16.msra.mxu1 %v13892_v16  ;;  %v13964_v61 = vld [vmem:[%s19737_s5 + $0x4a8] ss:$16 sps:$4 sm:$0xff]   ;;  %v13969_v16 = vld [vmem:[%s19737_s5 + $0x4c4] ss:$16 sps:$4 sm:$0xff]  }
 0x33b   : > { %6090 = vmatprep.subr.bf16.mxu0 %v13897_v17  ;;  %6336 = vmatprep.subr.bf16.mxu1 %v13900_v18  ;;  %v13972_v17 = vld [vmem:[%s19737_s5 + $0x4cc] ss:$16 sps:$4 sm:$0xff]   ;;  %v13967_v18 = vld [vmem:[%s19737_s5 + $0x4c0] ss:$16 sps:$4 sm:$0xff]  }
 0x33e   : > { %6091 = vmatpush1.bf16.msra.mxu0 %v13895_v19  ;;  %6337 = vmatpush1.bf16.msra.mxu1 %v13898_v20  ;;  %v13970_v19 = vld [vmem:[%s19737_s5 + $0x4c8] ss:$16 sps:$4 sm:$0xff]   ;;  %v13975_v20 = vld [vmem:[%s19737_s5 + $0x4e4] ss:$16 sps:$4 sm:$0xff]  }
 0x33f   : > { %6092 = vmatprep.subr.bf16.mxu0 %v13903_v21  ;;  %6338 = vmatprep.subr.bf16.mxu1 %v13906_v22  ;;  %v13978_v21 = vld [vmem:[%s19737_s5 + $0x4ec] ss:$16 sps:$4 sm:$0xff]   ;;  %v13973_v22 = vld [vmem:[%s19737_s5 + $0x4e0] ss:$16 sps:$4 sm:$0xff]  }
 0x342   : > { %6093 = vmatpush1.bf16.msra.mxu0 %v13901_v59  ;;  %6339 = vmatpush1.bf16.msra.mxu1 %v13904_v23  ;;  %v13976_v59 = vld [vmem:[%s19737_s5 + $0x4e8] ss:$16 sps:$4 sm:$0xff]   ;;  %v13981_v23 = vld [vmem:[%s19737_s5 + $0x504] ss:$16 sps:$4 sm:$0xff]  }
 0x343   : > { %6094 = vmatprep.subr.bf16.mxu0 %v13909_v25  ;;  %6340 = vmatprep.subr.bf16.mxu1 %v13912_v26  ;;  %v13984_v25 = vld [vmem:[%s19737_s5 + $0x50c] ss:$16 sps:$4 sm:$0xff]   ;;  %v13979_v26 = vld [vmem:[%s19737_s5 + $0x500] ss:$16 sps:$4 sm:$0xff]  }
 0x346   : > { %6095 = vmatpush1.bf16.msra.mxu0 %v13907_v27  ;;  %6341 = vmatpush1.bf16.msra.mxu1 %v13910_v30  ;;  %v13982_v27 = vld [vmem:[%s19737_s5 + $0x508] ss:$16 sps:$4 sm:$0xff]   ;;  %v13987_v30 = vld [vmem:[%s19737_s5 + $0x524] ss:$16 sps:$4 sm:$0xff]  }
 0x347   : > { %6096 = vmatprep.subr.bf16.mxu0 %v13915_v34  ;;  %6342 = vmatprep.subr.bf16.mxu1 %v13918_v8  ;;  %v13990_v34 = vld [vmem:[%s19737_s5 + $0x52c] ss:$16 sps:$4 sm:$0xff]   ;;  %v13985_v8 = vld [vmem:[%s19737_s5 + $0x520] ss:$16 sps:$4 sm:$0xff]  }
 0x34a   : > { %6097 = vmatpush1.bf16.msra.mxu0 %v13913_v36  ;;  %6343 = vmatpush1.bf16.msra.mxu1 %v13916_v62  ;;  %v13988_v36 = vld [vmem:[%s19737_s5 + $0x528] ss:$16 sps:$4 sm:$0xff]   ;;  %v13993_v62 = vld [vmem:[%s19737_s5 + $0x544] ss:$16 sps:$4 sm:$0xff]  }
 0x34b   : > { %6098 = vmatprep.subr.bf16.mxu0 %v13921_v37  ;;  %6344 = vmatprep.subr.bf16.mxu1 %v13924_v38  ;;  %v13996_v37 = vld [vmem:[%s19737_s5 + $0x54c] ss:$16 sps:$4 sm:$0xff]   ;;  %v13991_v38 = vld [vmem:[%s19737_s5 + $0x540] ss:$16 sps:$4 sm:$0xff]  }
 0x34e   : > { %6099 = vmatpush1.bf16.msra.mxu0 %v13919_v39  ;;  %6345 = vmatpush1.bf16.msra.mxu1 %v13922_v42  ;;  %v13994_v39 = vld [vmem:[%s19737_s5 + $0x548] ss:$16 sps:$4 sm:$0xff]   ;;  %v13999_v42 = vld [vmem:[%s19737_s5 + $0x564] ss:$16 sps:$4 sm:$0xff]  }
 0x34f   : > { %6100 = vmatprep.subr.bf16.mxu0 %v13927_v43  ;;  %6346 = vmatprep.subr.bf16.mxu1 %v13930_v44  ;;  %v14002_v43 = vld [vmem:[%s19737_s5 + $0x56c] ss:$16 sps:$4 sm:$0xff]   ;;  %v13997_v44 = vld [vmem:[%s19737_s5 + $0x560] ss:$16 sps:$4 sm:$0xff]  }
 0x352   : > { %6101 = vmatpush1.bf16.msra.mxu0 %v13925_v45  ;;  %6347 = vmatpush1.bf16.msra.mxu1 %v13928_v46  ;;  %v14000_v45 = vld [vmem:[%s19737_s5 + $0x568] ss:$16 sps:$4 sm:$0xff]   ;;  %v14005_v46 = vld [vmem:[%s19737_s5 + $0x584] ss:$16 sps:$4 sm:$0xff]  }
 0x353   : > { %6111 = vmatprep.subr.bf16.mxu0 %v13933_v47  ;;  %6357 = vmatprep.subr.bf16.mxu1 %v13936_v49  ;;  %v14008_v47 = vld [vmem:[%s19737_s5 + $0x58c] ss:$16 sps:$4 sm:$0xff]   ;;  %v14003_v49 = vld [vmem:[%s19737_s5 + $0x580] ss:$16 sps:$4 sm:$0xff]  }
 0x355   : > { %6103 = vmatmul.mubr.bf16.vlgmr.msra.gmra.mrb[12].mxu0 %v3693_v51  ;;  %6349 = vmatmul.mubr.bf16.vlgmr.msra.gmra.mrb[4].mxu1 %v3693_v51  ;;  %v14011_v51 = vld [vmem:[%s19737_s5 + $0x5a4] ss:$16 sps:$4 sm:$0xff]  }
 0x356   : > { %6112 = vmatpush1.bf16.msra.mxu0 %v13931_v50  ;;  %6143 = vmatprep.mubr.bf16.mxu0 %v3696_v53  ;;  %v14006_v50 = vld [vmem:[%s19737_s5 + $0x588] ss:$16 sps:$4 sm:$0xff]  }
 0x357   : > { %6358 = vmatpush1.bf16.msra.mxu1 %v13934_v52  ;;  %6389 = vmatprep.mubr.bf16.mxu1 %v3696_v53  ;;  %v14014_v52 = vld [vmem:[%s19737_s5 + $0x5ac] ss:$16 sps:$4 sm:$0xff]   ;;  %v14009_v53 = vld [vmem:[%s19737_s5 + $0x5a0] ss:$16 sps:$4 sm:$0xff]  }
 0x358   : > { %6113 = vmatprep.subr.bf16.mxu0 %v13939_v54  ;;  %6359 = vmatprep.subr.bf16.mxu1 %v13942_v48  ;;  %v14012_v54 = vld [vmem:[%s19737_s5 + $0x5a8] ss:$16 sps:$4 sm:$0xff]   ;;  %v14017_v48 = vld [vmem:[%s19737_s5 + $0x5c4] ss:$16 sps:$4 sm:$0xff]  }
 0x35a   : > { %6114 = vmatpush1.bf16.msra.mxu0 %v13937_v55  ;;  %v14020_v55 = vld [vmem:[%s19737_s5 + $0x5cc] ss:$16 sps:$4 sm:$0xff]  }
 0x35b   : > { %6360 = vmatpush1.bf16.msra.mxu1 %v13940_v35  ;;  %6115 = vmatprep.subr.bf16.mxu0 %v13945_v56  ;;  %v14015_v35 = vld [vmem:[%s19737_s5 + $0x5c0] ss:$16 sps:$4 sm:$0xff]   ;;  %v14018_v56 = vld [vmem:[%s19737_s5 + $0x5c8] ss:$16 sps:$4 sm:$0xff]  }
 0x35c   : > { %6361 = vmatprep.subr.bf16.mxu1 %v13948_v57  ;;  %v14023_v57 = vld [vmem:[%s19737_s5 + $0x5e4] ss:$16 sps:$4 sm:$0xff]  }
 0x35e   : > { %6116 = vmatpush1.bf16.msra.mxu0 %v13943_v6  ;;  %v14026_v6 = vld [vmem:[%s19737_s5 + $0x5ec] ss:$16 sps:$4 sm:$0xff]  }
 0x35f   : > { %6362 = vmatpush1.bf16.msra.mxu1 %v13946_v58  ;;  %6117 = vmatprep.subr.bf16.mxu0 %v13951_v60  ;;  %v14021_v58 = vld [vmem:[%s19737_s5 + $0x5e0] ss:$16 sps:$4 sm:$0xff]   ;;  %v14024_v60 = vld [vmem:[%s19737_s5 + $0x5e8] ss:$16 sps:$4 sm:$0xff]  }
 0x360   : > { %6363 = vmatprep.subr.bf16.mxu1 %v13954_v0  ;;  %v14029_v0 = vld [vmem:[%s19737_s5 + $0x604] ss:$16 sps:$4 sm:$0xff]  }
 0x362   : > { %6118 = vmatpush1.bf16.msra.mxu0 %v13949_v3  ;;  %v14032_v3 = vld [vmem:[%s19737_s5 + $0x60c] ss:$16 sps:$4 sm:$0xff]  }
 0x363   : > { %6364 = vmatpush1.bf16.msra.mxu1 %v13952_v4  ;;  %6119 = vmatprep.subr.bf16.mxu0 %v13957_v5  ;;  %v14027_v4 = vld [vmem:[%s19737_s5 + $0x600] ss:$16 sps:$4 sm:$0xff]   ;;  %v3695_v5 = vpack.c.bf16 %v16793_v24, %v16793_v24 }
 0x364   : > { %6365 = vmatprep.subr.bf16.mxu1 %v13960_v10  ;;  %v14030_v10 = vld [vmem:[%s19737_s5 + $0x608] ss:$16 sps:$4 sm:$0xff]   ;;  %v14033_v24 = vld [vmem:[%s19737_s5 + $0x620] ss:$16 sps:$4 sm:$0xff]  }
 0x366   : > { %6120 = vmatpush1.bf16.msra.mxu0 %v13955_v12  ;;  %v14035_v12 = vld [vmem:[%s19737_s5 + $0x624] ss:$16 sps:$4 sm:$0xff]  }
 0x367   : > { %6366 = vmatpush1.bf16.msra.mxu1 %v13958_v13  ;;  %6121 = vmatprep.subr.bf16.mxu0 %v13963_v14  ;;  %v3698_v13 = vpack.c.bf16 %v16823_v63, %v16823_v63  ;;  %v14038_v14 = vld [vmem:[%s19737_s5 + $0x62c] ss:$16 sps:$4 sm:$0xff]   ;;  %v14041_v63 = vld [vmem:[%s19737_s5 + $0x644] ss:$16 sps:$4 sm:$0xff]  }
 0x368   : > { %6367 = vmatprep.subr.bf16.mxu1 %v13966_v1  ;;  %v14036_v1 = vld [vmem:[%s19737_s5 + $0x628] ss:$16 sps:$4 sm:$0xff]  }
 0x36a   : > { %6122 = vmatpush1.bf16.msra.mxu0 %v13961_v15  ;;  %v14044_v15 = vld [vmem:[%s19737_s5 + $0x64c] ss:$16 sps:$4 sm:$0xff]  }
 0x36b   : > { %6368 = vmatpush1.bf16.msra.mxu1 %v13964_v61  ;;  %6123 = vmatprep.subr.bf16.mxu0 %v13969_v16  ;;  %v14039_v61 = vld [vmem:[%s19737_s5 + $0x640] ss:$16 sps:$4 sm:$0xff]   ;;  %v14042_v16 = vld [vmem:[%s19737_s5 + $0x648] ss:$16 sps:$4 sm:$0xff]  }
 0x36c   : > { %6369 = vmatprep.subr.bf16.mxu1 %v13972_v17  ;;  %v14047_v17 = vld [vmem:[%s19737_s5 + $0x664] ss:$16 sps:$4 sm:$0xff]  }
 0x36e   : > { %6124 = vmatpush1.bf16.msra.mxu0 %v13967_v18  ;;  %v14050_v18 = vld [vmem:[%s19737_s5 + $0x66c] ss:$16 sps:$4 sm:$0xff]  }
 0x36f   : > { %6370 = vmatpush1.bf16.msra.mxu1 %v13970_v19  ;;  %6125 = vmatprep.subr.bf16.mxu0 %v13975_v20  ;;  %v14045_v19 = vld [vmem:[%s19737_s5 + $0x660] ss:$16 sps:$4 sm:$0xff]   ;;  %v14048_v20 = vld [vmem:[%s19737_s5 + $0x668] ss:$16 sps:$4 sm:$0xff]  }
 0x370   : > { %6371 = vmatprep.subr.bf16.mxu1 %v13978_v21  ;;  %v14053_v21 = vld [vmem:[%s19737_s5 + $0x684] ss:$16 sps:$4 sm:$0xff]  }
 0x372   : > { %6126 = vmatpush1.bf16.msra.mxu0 %v13973_v22  ;;  %v14056_v22 = vld [vmem:[%s19737_s5 + $0x68c] ss:$16 sps:$4 sm:$0xff]  }
 0x373   : > { %6372 = vmatpush1.bf16.msra.mxu1 %v13976_v59  ;;  %6127 = vmatprep.subr.bf16.mxu0 %v13981_v23  ;;  %v14051_v59 = vld [vmem:[%s19737_s5 + $0x680] ss:$16 sps:$4 sm:$0xff]   ;;  %v14054_v23 = vld [vmem:[%s19737_s5 + $0x688] ss:$16 sps:$4 sm:$0xff]  }
 0x374   : > { %6373 = vmatprep.subr.bf16.mxu1 %v13984_v25  ;;  %v14059_v25 = vld [vmem:[%s19737_s5 + $0x6a4] ss:$16 sps:$4 sm:$0xff]  }
 0x376   : > { %6128 = vmatpush1.bf16.msra.mxu0 %v13979_v26  ;;  %v14062_v26 = vld [vmem:[%s19737_s5 + $0x6ac] ss:$16 sps:$4 sm:$0xff]  }
 0x377   : > { %6374 = vmatpush1.bf16.msra.mxu1 %v13982_v27  ;;  %6129 = vmatprep.subr.bf16.mxu0 %v13987_v30  ;;  %v14057_v27 = vld [vmem:[%s19737_s5 + $0x6a0] ss:$16 sps:$4 sm:$0xff]   ;;  %v14060_v30 = vld [vmem:[%s19737_s5 + $0x6a8] ss:$16 sps:$4 sm:$0xff]  }
 0x378   : > { %6375 = vmatprep.subr.bf16.mxu1 %v13990_v34  ;;  %v14065_v34 = vld [vmem:[%s19737_s5 + $0x6c4] ss:$16 sps:$4 sm:$0xff]  }
 0x37a   : > { %6130 = vmatpush1.bf16.msra.mxu0 %v13985_v8  ;;  %v14068_v8 = vld [vmem:[%s19737_s5 + $0x6cc] ss:$16 sps:$4 sm:$0xff]  }
 0x37b   : > { %6376 = vmatpush1.bf16.msra.mxu1 %v13988_v36  ;;  %6131 = vmatprep.subr.bf16.mxu0 %v13993_v62  ;;  %v14063_v36 = vld [vmem:[%s19737_s5 + $0x6c0] ss:$16 sps:$4 sm:$0xff]   ;;  %v14066_v62 = vld [vmem:[%s19737_s5 + $0x6c8] ss:$16 sps:$4 sm:$0xff]  }
 0x37c   : > { %6377 = vmatprep.subr.bf16.mxu1 %v13996_v37  ;;  %v14071_v37 = vld [vmem:[%s19737_s5 + $0x6e4] ss:$16 sps:$4 sm:$0xff]  }
 0x37e   : > { %6132 = vmatpush1.bf16.msra.mxu0 %v13991_v38  ;;  %v14074_v38 = vld [vmem:[%s19737_s5 + $0x6ec] ss:$16 sps:$4 sm:$0xff]  }
 0x37f   : > { %6378 = vmatpush1.bf16.msra.mxu1 %v13994_v39  ;;  %6133 = vmatprep.subr.bf16.mxu0 %v13999_v42  ;;  %v14069_v39 = vld [vmem:[%s19737_s5 + $0x6e0] ss:$16 sps:$4 sm:$0xff]   ;;  %v14072_v42 = vld [vmem:[%s19737_s5 + $0x6e8] ss:$16 sps:$4 sm:$0xff]  }
 0x380   : > { %6379 = vmatprep.subr.bf16.mxu1 %v14002_v43  ;;  %v14077_v43 = vld [vmem:[%s19737_s5 + $0x704] ss:$16 sps:$4 sm:$0xff]  }
 0x382   : > { %6134 = vmatpush1.bf16.msra.mxu0 %v13997_v44  ;;  %v14080_v44 = vld [vmem:[%s19737_s5 + $0x70c] ss:$16 sps:$4 sm:$0xff]  }
 0x383   : > { %6380 = vmatpush1.bf16.msra.mxu1 %v14000_v45  ;;  %6135 = vmatprep.subr.bf16.mxu0 %v14005_v46  ;;  %v14075_v45 = vld [vmem:[%s19737_s5 + $0x700] ss:$16 sps:$4 sm:$0xff]   ;;  %v14078_v46 = vld [vmem:[%s19737_s5 + $0x708] ss:$16 sps:$4 sm:$0xff]  }
 0x384   : > { %6381 = vmatprep.subr.bf16.mxu1 %v14008_v47  ;;  %v14083_v47 = vld [vmem:[%s19737_s5 + $0x724] ss:$16 sps:$4 sm:$0xff]  }
 0x386   : > { %6136 = vmatpush1.bf16.msra.mxu0 %v14003_v49  ;;  %v14086_v49 = vld [vmem:[%s19737_s5 + $0x72c] ss:$16 sps:$4 sm:$0xff]  }
 0x387   : > { %6382 = vmatpush1.bf16.msra.mxu1 %v14006_v50  ;;  %6137 = vmatprep.subr.bf16.mxu0 %v14011_v51  ;;  %v14081_v50 = vld [vmem:[%s19737_s5 + $0x720] ss:$16 sps:$4 sm:$0xff]   ;;  %v14084_v51 = vld [vmem:[%s19737_s5 + $0x728] ss:$16 sps:$4 sm:$0xff]  }
 0x388   : > { %6383 = vmatprep.subr.bf16.mxu1 %v14014_v52  ;;  %v14089_v52 = vld [vmem:[%s19737_s5 + $0x744] ss:$16 sps:$4 sm:$0xff]  }
 0x38a   : > { %6138 = vmatpush1.bf16.msra.mxu0 %v14009_v53  ;;  %v14092_v53 = vld [vmem:[%s19737_s5 + $0x74c] ss:$16 sps:$4 sm:$0xff]  }
 0x38b   : > { %6384 = vmatpush1.bf16.msra.mxu1 %v14012_v54  ;;  %6139 = vmatprep.subr.bf16.mxu0 %v14017_v48  ;;  %v14087_v54 = vld [vmem:[%s19737_s5 + $0x740] ss:$16 sps:$4 sm:$0xff]   ;;  %v14090_v48 = vld [vmem:[%s19737_s5 + $0x748] ss:$16 sps:$4 sm:$0xff]  }
 0x38c   : > { %6385 = vmatprep.subr.bf16.mxu1 %v14020_v55  ;;  %v14095_v55 = vld [vmem:[%s19737_s5 + $0x764] ss:$16 sps:$4 sm:$0xff]  }
 0x38e   : > { %6140 = vmatpush1.bf16.msra.mxu0 %v14015_v35  ;;  %v14098_v35 = vld [vmem:[%s19737_s5 + $0x76c] ss:$16 sps:$4 sm:$0xff]  }
 0x38f   : > { %6386 = vmatpush1.bf16.msra.mxu1 %v14018_v56  ;;  %6141 = vmatprep.subr.bf16.mxu0 %v14023_v57  ;;  %v14093_v56 = vld [vmem:[%s19737_s5 + $0x760] ss:$16 sps:$4 sm:$0xff]   ;;  %v14096_v57 = vld [vmem:[%s19737_s5 + $0x768] ss:$16 sps:$4 sm:$0xff]  }
 0x390   : > { %6387 = vmatprep.subr.bf16.mxu1 %v14026_v6  ;;  %v14101_v6 = vld [vmem:[%s19737_s5 + $0x784] ss:$16 sps:$4 sm:$0xff]  }
 0x392   : > { %6142 = vmatpush1.bf16.msra.mxu0 %v14021_v58  ;;  %v14104_v58 = vld [vmem:[%s19737_s5 + $0x78c] ss:$16 sps:$4 sm:$0xff]  }
 0x393   : > { %6388 = vmatpush1.bf16.msra.mxu1 %v14024_v60  ;;  %6152 = vmatprep.subr.bf16.mxu0 %v14029_v0  ;;  %v14099_v60 = vld [vmem:[%s19737_s5 + $0x780] ss:$16 sps:$4 sm:$0xff]   ;;  %v14102_v0 = vld [vmem:[%s19737_s5 + $0x788] ss:$16 sps:$4 sm:$0xff]  }
 0x394   : > { %6398 = vmatprep.subr.bf16.mxu1 %v14032_v3  ;;  %v14107_v3 = vld [vmem:[%s19737_s5 + $0x7a4] ss:$16 sps:$4 sm:$0xff]  }
 0x395   : > { %6144 = vmatmul.mubr.bf16.vlgmr.msra.gmra.mrb[12].mxu0 %v3695_v5 }
 0x396   : > { %6390 = vmatmul.mubr.bf16.vlgmr.msra.gmra.mrb[4].mxu1 %v3695_v5  ;;  %6153 = vmatpush1.bf16.msra.mxu0 %v14027_v4  ;;  %v14110_v4 = vld [vmem:[%s19737_s5 + $0x7ac] ss:$16 sps:$4 sm:$0xff]   ;;  %v14105_v5 = vld [vmem:[%s19737_s5 + $0x7a0] ss:$16 sps:$4 sm:$0xff]  }
 0x397   : > { %6184 = vmatprep.mubr.bf16.mxu0 %v3698_v13  ;;  %6399 = vmatpush1.bf16.msra.mxu1 %v14030_v10  ;;  %v14108_v10 = vld [vmem:[%s19737_s5 + $0x7a8] ss:$16 sps:$4 sm:$0xff]  }
 0x398   : > { %6430 = vmatprep.mubr.bf16.mxu1 %v3698_v13  ;;  %6154 = vmatprep.subr.bf16.mxu0 %v14035_v12  ;;  %v14113_v12 = vld [vmem:[%s19737_s5 + $0x7c4] ss:$16 sps:$4 sm:$0xff]   ;;  %v14116_v13 = vld [vmem:[%s19737_s5 + $0x7cc] ss:$16 sps:$4 sm:$0xff]  }
 0x399   : > { %6400 = vmatprep.subr.bf16.mxu1 %v14038_v14  ;;  %v14111_v14 = vld [vmem:[%s19737_s5 + $0x7c0] ss:$16 sps:$4 sm:$0xff]  }
 0x39a   : > { %6155 = vmatpush1.bf16.msra.mxu0 %v14033_v24  ;;  %v14114_v24 = vld [vmem:[%s19737_s5 + $0x7c8] ss:$16 sps:$4 sm:$0xff]  }
 0x39b   : > { %6401 = vmatpush1.bf16.msra.mxu1 %v14036_v1  ;;  %6156 = vmatprep.subr.bf16.mxu0 %v14041_v63  ;;  %v14119_v1 = vld [vmem:[%s19737_s5 + $0x7e4] ss:$16 sps:$4 sm:$0xff]   ;;  %v14122_v63 = vld [vmem:[%s19737_s5 + $0x7ec] ss:$16 sps:$4 sm:$0xff]  }
 0x39c   : > { %6402 = vmatprep.subr.bf16.mxu1 %v14044_v15  ;;  %v14117_v15 = vld [vmem:[%s19737_s5 + $0x7e0] ss:$16 sps:$4 sm:$0xff]  }
 0x39e   : > { %6157 = vmatpush1.bf16.msra.mxu0 %v14039_v61  ;;  %v14120_v61 = vld [vmem:[%s19737_s5 + $0x7e8] ss:$16 sps:$4 sm:$0xff]  }
 0x39f   : > { %6403 = vmatpush1.bf16.msra.mxu1 %v14042_v16  ;;  %6158 = vmatprep.subr.bf16.mxu0 %v14047_v17  ;;  %v14125_v16 = vld [vmem:[%s19737_s5 + $0x804] ss:$16 sps:$4 sm:$0xff]   ;;  %v14128_v17 = vld [vmem:[%s19737_s5 + $0x80c] ss:$16 sps:$4 sm:$0xff]  }
 0x3a0   : > { %6404 = vmatprep.subr.bf16.mxu1 %v14050_v18  ;;  %v14123_v18 = vld [vmem:[%s19737_s5 + $0x800] ss:$16 sps:$4 sm:$0xff]  }
 0x3a2   : > { %6159 = vmatpush1.bf16.msra.mxu0 %v14045_v19  ;;  %v3697_v19 = vpack.c.bf16 %v16802_v32, %v16802_v32  ;;  %v14129_v32 = vld [vmem:[%s19737_s5 + $0x820] ss:$16 sps:$4 sm:$0xff]  }
 0x3a3   : > { %6405 = vmatpush1.bf16.msra.mxu1 %v14048_v20  ;;  %6160 = vmatprep.subr.bf16.mxu0 %v14053_v21  ;;  %v14126_v20 = vld [vmem:[%s19737_s5 + $0x808] ss:$16 sps:$4 sm:$0xff]   ;;  %v14131_v21 = vld [vmem:[%s19737_s5 + $0x824] ss:$16 sps:$4 sm:$0xff]  }
 0x3a4   : > { %6406 = vmatprep.subr.bf16.mxu1 %v14056_v22  ;;  %v3700_v22 = vpack.c.bf16 %v16820_v40, %v16820_v40  ;;  %v14137_v40 = vld [vmem:[%s19737_s5 + $0x844] ss:$16 sps:$4 sm:$0xff]  }
 0x3a6   : > { %6161 = vmatpush1.bf16.msra.mxu0 %v14051_v59  ;;  %v14134_v59 = vld [vmem:[%s19737_s5 + $0x82c] ss:$16 sps:$4 sm:$0xff]  }
 0x3a7   : > { %6407 = vmatpush1.bf16.msra.mxu1 %v14054_v23  ;;  %6162 = vmatprep.subr.bf16.mxu0 %v14059_v25  ;;  %v14132_v23 = vld [vmem:[%s19737_s5 + $0x828] ss:$16 sps:$4 sm:$0xff]   ;;  %v14140_v25 = vld [vmem:[%s19737_s5 + $0x84c] ss:$16 sps:$4 sm:$0xff]  }
 0x3a8   : > { %6408 = vmatprep.subr.bf16.mxu1 %v14062_v26  ;;  %v14135_v26 = vld [vmem:[%s19737_s5 + $0x840] ss:$16 sps:$4 sm:$0xff]  }
 0x3aa   : > { %6163 = vmatpush1.bf16.msra.mxu0 %v14057_v27  ;;  %v14138_v27 = vld [vmem:[%s19737_s5 + $0x848] ss:$16 sps:$4 sm:$0xff]  }
 0x3ab   : > { %6409 = vmatpush1.bf16.msra.mxu1 %v14060_v30  ;;  %6164 = vmatprep.subr.bf16.mxu0 %v14065_v34  ;;  %v14143_v30 = vld [vmem:[%s19737_s5 + $0x864] ss:$16 sps:$4 sm:$0xff]   ;;  %v14146_v34 = vld [vmem:[%s19737_s5 + $0x86c] ss:$16 sps:$4 sm:$0xff]  }
 0x3ac   : > { %6410 = vmatprep.subr.bf16.mxu1 %v14068_v8  ;;  %v14141_v8 = vld [vmem:[%s19737_s5 + $0x860] ss:$16 sps:$4 sm:$0xff]  }
 0x3ae   : > { %6165 = vmatpush1.bf16.msra.mxu0 %v14063_v36  ;;  %v14144_v36 = vld [vmem:[%s19737_s5 + $0x868] ss:$16 sps:$4 sm:$0xff]  }
 0x3af   : > { %6411 = vmatpush1.bf16.msra.mxu1 %v14066_v62  ;;  %6166 = vmatprep.subr.bf16.mxu0 %v14071_v37  ;;  %v14149_v62 = vld [vmem:[%s19737_s5 + $0x884] ss:$16 sps:$4 sm:$0xff]   ;;  %v14152_v37 = vld [vmem:[%s19737_s5 + $0x88c] ss:$16 sps:$4 sm:$0xff]  }
 0x3b0   : > { %6412 = vmatprep.subr.bf16.mxu1 %v14074_v38  ;;  %v14147_v38 = vld [vmem:[%s19737_s5 + $0x880] ss:$16 sps:$4 sm:$0xff]  }
 0x3b2   : > { %6167 = vmatpush1.bf16.msra.mxu0 %v14069_v39  ;;  %v14150_v39 = vld [vmem:[%s19737_s5 + $0x888] ss:$16 sps:$4 sm:$0xff]  }
 0x3b3   : > { %6413 = vmatpush1.bf16.msra.mxu1 %v14072_v42  ;;  %6168 = vmatprep.subr.bf16.mxu0 %v14077_v43  ;;  %v14155_v42 = vld [vmem:[%s19737_s5 + $0x8a4] ss:$16 sps:$4 sm:$0xff]   ;;  %v14158_v43 = vld [vmem:[%s19737_s5 + $0x8ac] ss:$16 sps:$4 sm:$0xff]  }
 0x3b4   : > { %6414 = vmatprep.subr.bf16.mxu1 %v14080_v44  ;;  %v14153_v44 = vld [vmem:[%s19737_s5 + $0x8a0] ss:$16 sps:$4 sm:$0xff]  }
 0x3b6   : > { %6169 = vmatpush1.bf16.msra.mxu0 %v14075_v45  ;;  %v14156_v45 = vld [vmem:[%s19737_s5 + $0x8a8] ss:$16 sps:$4 sm:$0xff]  }
 0x3b7   : > { %6415 = vmatpush1.bf16.msra.mxu1 %v14078_v46  ;;  %6170 = vmatprep.subr.bf16.mxu0 %v14083_v47  ;;  %v14161_v46 = vld [vmem:[%s19737_s5 + $0x8c4] ss:$16 sps:$4 sm:$0xff]   ;;  %v14164_v47 = vld [vmem:[%s19737_s5 + $0x8cc] ss:$16 sps:$4 sm:$0xff]  }
 0x3b8   : > { %6416 = vmatprep.subr.bf16.mxu1 %v14086_v49  ;;  %v14159_v49 = vld [vmem:[%s19737_s5 + $0x8c0] ss:$16 sps:$4 sm:$0xff]  }
 0x3ba   : > { %6171 = vmatpush1.bf16.msra.mxu0 %v14081_v50  ;;  %v14162_v50 = vld [vmem:[%s19737_s5 + $0x8c8] ss:$16 sps:$4 sm:$0xff]  }
 0x3bb   : > { %6417 = vmatpush1.bf16.msra.mxu1 %v14084_v51  ;;  %6172 = vmatprep.subr.bf16.mxu0 %v14089_v52  ;;  %v14167_v51 = vld [vmem:[%s19737_s5 + $0x8e4] ss:$16 sps:$4 sm:$0xff]   ;;  %v14170_v52 = vld [vmem:[%s19737_s5 + $0x8ec] ss:$16 sps:$4 sm:$0xff]  }
 0x3bc   : > { %6418 = vmatprep.subr.bf16.mxu1 %v14092_v53  ;;  %v14165_v53 = vld [vmem:[%s19737_s5 + $0x8e0] ss:$16 sps:$4 sm:$0xff]  }
 0x3be   : > { %6173 = vmatpush1.bf16.msra.mxu0 %v14087_v54  ;;  %v14168_v54 = vld [vmem:[%s19737_s5 + $0x8e8] ss:$16 sps:$4 sm:$0xff]  }
 0x3bf   : > { %6419 = vmatpush1.bf16.msra.mxu1 %v14090_v48  ;;  %6174 = vmatprep.subr.bf16.mxu0 %v14095_v55  ;;  %v14173_v48 = vld [vmem:[%s19737_s5 + $0x904] ss:$16 sps:$4 sm:$0xff]   ;;  %v14176_v55 = vld [vmem:[%s19737_s5 + $0x90c] ss:$16 sps:$4 sm:$0xff]  }
 0x3c0   : > { %6420 = vmatprep.subr.bf16.mxu1 %v14098_v35  ;;  %v14171_v35 = vld [vmem:[%s19737_s5 + $0x900] ss:$16 sps:$4 sm:$0xff]  }
 0x3c2   : > { %6175 = vmatpush1.bf16.msra.mxu0 %v14093_v56  ;;  %v14174_v56 = vld [vmem:[%s19737_s5 + $0x908] ss:$16 sps:$4 sm:$0xff]  }
 0x3c3   : > { %6421 = vmatpush1.bf16.msra.mxu1 %v14096_v57  ;;  %6176 = vmatprep.subr.bf16.mxu0 %v14101_v6  ;;  %v14179_v57 = vld [vmem:[%s19737_s5 + $0x924] ss:$16 sps:$4 sm:$0xff]   ;;  %v14182_v6 = vld [vmem:[%s19737_s5 + $0x92c] ss:$16 sps:$4 sm:$0xff]  }
 0x3c4   : > { %6422 = vmatprep.subr.bf16.mxu1 %v14104_v58  ;;  %v14177_v58 = vld [vmem:[%s19737_s5 + $0x920] ss:$16 sps:$4 sm:$0xff]  }
 0x3c6   : > { %6177 = vmatpush1.bf16.msra.mxu0 %v14099_v60  ;;  %v14180_v60 = vld [vmem:[%s19737_s5 + $0x928] ss:$16 sps:$4 sm:$0xff]  }
 0x3c7   : > { %6423 = vmatpush1.bf16.msra.mxu1 %v14102_v0  ;;  %6178 = vmatprep.subr.bf16.mxu0 %v14107_v3  ;;  %v14185_v0 = vld [vmem:[%s19737_s5 + $0x944] ss:$16 sps:$4 sm:$0xff]   ;;  %v14188_v3 = vld [vmem:[%s19737_s5 + $0x94c] ss:$16 sps:$4 sm:$0xff]  }
 0x3c8   : > { %6424 = vmatprep.subr.bf16.mxu1 %v14110_v4  ;;  %v14183_v4 = vld [vmem:[%s19737_s5 + $0x940] ss:$16 sps:$4 sm:$0xff]  }
 0x3ca   : > { %6179 = vmatpush1.bf16.msra.mxu0 %v14105_v5  ;;  %v14186_v5 = vld [vmem:[%s19737_s5 + $0x948] ss:$16 sps:$4 sm:$0xff]  }
 0x3cb   : > { %6425 = vmatpush1.bf16.msra.mxu1 %v14108_v10  ;;  %6180 = vmatprep.subr.bf16.mxu0 %v14113_v12  ;;  %v14191_v10 = vld [vmem:[%s19737_s5 + $0x964] ss:$16 sps:$4 sm:$0xff]   ;;  %v14194_v12 = vld [vmem:[%s19737_s5 + $0x96c] ss:$16 sps:$4 sm:$0xff]  }
 0x3cc   : > { %6426 = vmatprep.subr.bf16.mxu1 %v14116_v13  ;;  %v14189_v13 = vld [vmem:[%s19737_s5 + $0x960] ss:$16 sps:$4 sm:$0xff]  }
 0x3ce   : > { %6181 = vmatpush1.bf16.msra.mxu0 %v14111_v14  ;;  %v14192_v14 = vld [vmem:[%s19737_s5 + $0x968] ss:$16 sps:$4 sm:$0xff]  }
 0x3cf   : > { %6427 = vmatpush1.bf16.msra.mxu1 %v14114_v24  ;;  %6182 = vmatprep.subr.bf16.mxu0 %v14119_v1  ;;  %v14197_v24 = vld [vmem:[%s19737_s5 + $0x984] ss:$16 sps:$4 sm:$0xff]   ;;  %v14200_v1 = vld [vmem:[%s19737_s5 + $0x98c] ss:$16 sps:$4 sm:$0xff]  }
 0x3d0   : > { %6428 = vmatprep.subr.bf16.mxu1 %v14122_v63  ;;  %v14195_v63 = vld [vmem:[%s19737_s5 + $0x980] ss:$16 sps:$4 sm:$0xff]  }
 0x3d2   : > { %6183 = vmatpush1.bf16.msra.mxu0 %v14117_v15  ;;  %v14198_v15 = vld [vmem:[%s19737_s5 + $0x988] ss:$16 sps:$4 sm:$0xff]  }
 0x3d3   : > { %6429 = vmatpush1.bf16.msra.mxu1 %v14120_v61  ;;  %6193 = vmatprep.subr.bf16.mxu0 %v14125_v16  ;;  %v14203_v61 = vld [vmem:[%s19737_s5 + $0x9a4] ss:$16 sps:$4 sm:$0xff]   ;;  %v14206_v16 = vld [vmem:[%s19737_s5 + $0x9ac] ss:$16 sps:$4 sm:$0xff]  }
 0x3d4   : > { %6439 = vmatprep.subr.bf16.mxu1 %v14128_v17  ;;  %v14201_v17 = vld [vmem:[%s19737_s5 + $0x9a0] ss:$16 sps:$4 sm:$0xff]  }
 0x3d5   : > { %6185 = vmatmul.mubr.bf16.vlgmr.msra.gmra.mrb[12].mxu0 %v3697_v19 }
 0x3d6   : > { %6431 = vmatmul.mubr.bf16.vlgmr.msra.gmra.mrb[4].mxu1 %v3697_v19  ;;  %6194 = vmatpush1.bf16.msra.mxu0 %v14123_v18  ;;  %v14204_v18 = vld [vmem:[%s19737_s5 + $0x9a8] ss:$16 sps:$4 sm:$0xff]   ;;  %v14209_v19 = vld [vmem:[%s19737_s5 + $0x9c4] ss:$16 sps:$4 sm:$0xff]  }
 0x3d7   : > { %6225 = vmatprep.mubr.bf16.mxu0 %v3700_v22  ;;  %6440 = vmatpush1.bf16.msra.mxu1 %v14126_v20  ;;  %v14212_v20 = vld [vmem:[%s19737_s5 + $0x9cc] ss:$16 sps:$4 sm:$0xff]  }
 0x3d8   : > { %6471 = vmatprep.mubr.bf16.mxu1 %v3700_v22  ;;  %6195 = vmatprep.subr.bf16.mxu0 %v14131_v21  ;;  %v14207_v21 = vld [vmem:[%s19737_s5 + $0x9c0] ss:$16 sps:$4 sm:$0xff]   ;;  %v14210_v22 = vld [vmem:[%s19737_s5 + $0x9c8] ss:$16 sps:$4 sm:$0xff]  }
 0x3d9   : > { %6441 = vmatprep.subr.bf16.mxu1 %v14134_v59  ;;  %v14215_v59 = vld [vmem:[%s19737_s5 + $0x9e4] ss:$16 sps:$4 sm:$0xff]  }
 0x3da   : > { %6196 = vmatpush1.bf16.msra.mxu0 %v14129_v32  ;;  %v14218_v32 = vld [vmem:[%s19737_s5 + $0x9ec] ss:$16 sps:$4 sm:$0xff]  }
 0x3db   : > { %6442 = vmatpush1.bf16.msra.mxu1 %v14132_v23  ;;  %6197 = vmatprep.subr.bf16.mxu0 %v14137_v40  ;;  %v14213_v23 = vld [vmem:[%s19737_s5 + $0x9e0] ss:$16 sps:$4 sm:$0xff]   ;;  %v14216_v40 = vld [vmem:[%s19737_s5 + $0x9e8] ss:$16 sps:$4 sm:$0xff]  }
 0x3dc   : > { %6443 = vmatprep.subr.bf16.mxu1 %v14140_v25  ;;  %v14221_v25 = vld [vmem:[%s19737_s5 + $0xa04] ss:$16 sps:$4 sm:$0xff]  }
 0x3de   : > { %6198 = vmatpush1.bf16.msra.mxu0 %v14135_v26  ;;  %v14224_v26 = vld [vmem:[%s19737_s5 + $0xa0c] ss:$16 sps:$4 sm:$0xff]  }
 0x3df   : > { %6444 = vmatpush1.bf16.msra.mxu1 %v14138_v27  ;;  %6199 = vmatprep.subr.bf16.mxu0 %v14143_v30  ;;  %v14219_v27 = vld [vmem:[%s19737_s5 + $0xa00] ss:$16 sps:$4 sm:$0xff]   ;;  %v3699_v30 = vpack.c.bf16 %v16796_v7, %v16796_v7 }
 0x3e0   : > { %6445 = vmatprep.subr.bf16.mxu1 %v14146_v34  ;;  %v14222_v34 = vld [vmem:[%s19737_s5 + $0xa08] ss:$16 sps:$4 sm:$0xff]   ;;  %v14225_v7 = vld [vmem:[%s19737_s5 + $0xa20] ss:$16 sps:$4 sm:$0xff]  }
 0x3e2   : > { %6200 = vmatpush1.bf16.msra.mxu0 %v14141_v8  ;;  %v14227_v8 = vld [vmem:[%s19737_s5 + $0xa24] ss:$16 sps:$4 sm:$0xff]  }
 0x3e3   : > { %6446 = vmatpush1.bf16.msra.mxu1 %v14144_v36  ;;  %6201 = vmatprep.subr.bf16.mxu0 %v14149_v62  ;;  %v3702_v36 = vpack.c.bf16 %v16826_v41, %v16826_v41  ;;  %v14230_v62 = vld [vmem:[%s19737_s5 + $0xa2c] ss:$16 sps:$4 sm:$0xff]   ;;  %v14233_v41 = vld [vmem:[%s19737_s5 + $0xa44] ss:$16 sps:$4 sm:$0xff]  }
 0x3e4   : > { %6447 = vmatprep.subr.bf16.mxu1 %v14152_v37  ;;  %v14228_v37 = vld [vmem:[%s19737_s5 + $0xa28] ss:$16 sps:$4 sm:$0xff]  }
 0x3e6   : > { %6202 = vmatpush1.bf16.msra.mxu0 %v14147_v38  ;;  %v14236_v38 = vld [vmem:[%s19737_s5 + $0xa4c] ss:$16 sps:$4 sm:$0xff]  }
 0x3e7   : > { %6448 = vmatpush1.bf16.msra.mxu1 %v14150_v39  ;;  %6203 = vmatprep.subr.bf16.mxu0 %v14155_v42  ;;  %v14231_v39 = vld [vmem:[%s19737_s5 + $0xa40] ss:$16 sps:$4 sm:$0xff]   ;;  %v14234_v42 = vld [vmem:[%s19737_s5 + $0xa48] ss:$16 sps:$4 sm:$0xff]  }
 0x3e8   : > { %6449 = vmatprep.subr.bf16.mxu1 %v14158_v43  ;;  %v14239_v43 = vld [vmem:[%s19737_s5 + $0xa64] ss:$16 sps:$4 sm:$0xff]  }
 0x3ea   : > { %6204 = vmatpush1.bf16.msra.mxu0 %v14153_v44  ;;  %v14242_v44 = vld [vmem:[%s19737_s5 + $0xa6c] ss:$16 sps:$4 sm:$0xff]  }
 0x3eb   : > { %6450 = vmatpush1.bf16.msra.mxu1 %v14156_v45  ;;  %6205 = vmatprep.subr.bf16.mxu0 %v14161_v46  ;;  %v14237_v45 = vld [vmem:[%s19737_s5 + $0xa60] ss:$16 sps:$4 sm:$0xff]   ;;  %v14240_v46 = vld [vmem:[%s19737_s5 + $0xa68] ss:$16 sps:$4 sm:$0xff]  }
 0x3ec   : > { %6451 = vmatprep.subr.bf16.mxu1 %v14164_v47  ;;  %v14245_v47 = vld [vmem:[%s19737_s5 + $0xa84] ss:$16 sps:$4 sm:$0xff]  }
 0x3ee   : > { %6206 = vmatpush1.bf16.msra.mxu0 %v14159_v49  ;;  %v14248_v49 = vld [vmem:[%s19737_s5 + $0xa8c] ss:$16 sps:$4 sm:$0xff]  }
 0x3ef   : > { %6452 = vmatpush1.bf16.msra.mxu1 %v14162_v50  ;;  %6207 = vmatprep.subr.bf16.mxu0 %v14167_v51  ;;  %v14243_v50 = vld [vmem:[%s19737_s5 + $0xa80] ss:$16 sps:$4 sm:$0xff]   ;;  %v14246_v51 = vld [vmem:[%s19737_s5 + $0xa88] ss:$16 sps:$4 sm:$0xff]  }
 0x3f0   : > { %6453 = vmatprep.subr.bf16.mxu1 %v14170_v52  ;;  %v14251_v52 = vld [vmem:[%s19737_s5 + $0xaa4] ss:$16 sps:$4 sm:$0xff]  }
 0x3f2   : > { %6208 = vmatpush1.bf16.msra.mxu0 %v14165_v53  ;;  %v14254_v53 = vld [vmem:[%s19737_s5 + $0xaac] ss:$16 sps:$4 sm:$0xff]  }
 0x3f3   : > { %6454 = vmatpush1.bf16.msra.mxu1 %v14168_v54  ;;  %6209 = vmatprep.subr.bf16.mxu0 %v14173_v48  ;;  %v14249_v54 = vld [vmem:[%s19737_s5 + $0xaa0] ss:$16 sps:$4 sm:$0xff]   ;;  %v14252_v48 = vld [vmem:[%s19737_s5 + $0xaa8] ss:$16 sps:$4 sm:$0xff]  }
 0x3f4   : > { %6455 = vmatprep.subr.bf16.mxu1 %v14176_v55  ;;  %v14257_v55 = vld [vmem:[%s19737_s5 + $0xac4] ss:$16 sps:$4 sm:$0xff]  }
 0x3f6   : > { %6210 = vmatpush1.bf16.msra.mxu0 %v14171_v35  ;;  %v14260_v35 = vld [vmem:[%s19737_s5 + $0xacc] ss:$16 sps:$4 sm:$0xff]  }
 0x3f7   : > { %6456 = vmatpush1.bf16.msra.mxu1 %v14174_v56  ;;  %6211 = vmatprep.subr.bf16.mxu0 %v14179_v57  ;;  %v14255_v56 = vld [vmem:[%s19737_s5 + $0xac0] ss:$16 sps:$4 sm:$0xff]   ;;  %v14258_v57 = vld [vmem:[%s19737_s5 + $0xac8] ss:$16 sps:$4 sm:$0xff]  }
 0x3f8   : > { %6457 = vmatprep.subr.bf16.mxu1 %v14182_v6  ;;  %v14263_v6 = vld [vmem:[%s19737_s5 + $0xae4] ss:$16 sps:$4 sm:$0xff]  }
 0x3fa   : > { %6212 = vmatpush1.bf16.msra.mxu0 %v14177_v58  ;;  %v14266_v58 = vld [vmem:[%s19737_s5 + $0xaec] ss:$16 sps:$4 sm:$0xff]  }
 0x3fb   : > { %6458 = vmatpush1.bf16.msra.mxu1 %v14180_v60  ;;  %6213 = vmatprep.subr.bf16.mxu0 %v14185_v0  ;;  %v14261_v60 = vld [vmem:[%s19737_s5 + $0xae0] ss:$16 sps:$4 sm:$0xff]   ;;  %v14264_v0 = vld [vmem:[%s19737_s5 + $0xae8] ss:$16 sps:$4 sm:$0xff]  }
 0x3fc   : > { %6459 = vmatprep.subr.bf16.mxu1 %v14188_v3  ;;  %v14269_v3 = vld [vmem:[%s19737_s5 + $0xb04] ss:$16 sps:$4 sm:$0xff]  }
 0x3fe   : > { %6214 = vmatpush1.bf16.msra.mxu0 %v14183_v4  ;;  %v14272_v4 = vld [vmem:[%s19737_s5 + $0xb0c] ss:$16 sps:$4 sm:$0xff]  }
 0x3ff   : > { %6460 = vmatpush1.bf16.msra.mxu1 %v14186_v5  ;;  %6215 = vmatprep.subr.bf16.mxu0 %v14191_v10  ;;  %v14267_v5 = vld [vmem:[%s19737_s5 + $0xb00] ss:$16 sps:$4 sm:$0xff]   ;;  %v14270_v10 = vld [vmem:[%s19737_s5 + $0xb08] ss:$16 sps:$4 sm:$0xff]  }
 0x400   : > { %6461 = vmatprep.subr.bf16.mxu1 %v14194_v12  ;;  %v14275_v12 = vld [vmem:[%s19737_s5 + $0xb24] ss:$16 sps:$4 sm:$0xff]  }
 0x402   : > { %6216 = vmatpush1.bf16.msra.mxu0 %v14189_v13  ;;  %v14278_v13 = vld [vmem:[%s19737_s5 + $0xb2c] ss:$16 sps:$4 sm:$0xff]  }
 0x403   : > { %6462 = vmatpush1.bf16.msra.mxu1 %v14192_v14  ;;  %6217 = vmatprep.subr.bf16.mxu0 %v14197_v24  ;;  %v14273_v14 = vld [vmem:[%s19737_s5 + $0xb20] ss:$16 sps:$4 sm:$0xff]   ;;  %v14276_v24 = vld [vmem:[%s19737_s5 + $0xb28] ss:$16 sps:$4 sm:$0xff]  }
 0x404   : > { %6463 = vmatprep.subr.bf16.mxu1 %v14200_v1  ;;  %v14281_v1 = vld [vmem:[%s19737_s5 + $0xb44] ss:$16 sps:$4 sm:$0xff]  }
 0x406   : > { %6218 = vmatpush1.bf16.msra.mxu0 %v14195_v63  ;;  %v14284_v63 = vld [vmem:[%s19737_s5 + $0xb4c] ss:$16 sps:$4 sm:$0xff]  }
 0x407   : > { %6464 = vmatpush1.bf16.msra.mxu1 %v14198_v15  ;;  %6219 = vmatprep.subr.bf16.mxu0 %v14203_v61  ;;  %v14279_v15 = vld [vmem:[%s19737_s5 + $0xb40] ss:$16 sps:$4 sm:$0xff]   ;;  %v14282_v61 = vld [vmem:[%s19737_s5 + $0xb48] ss:$16 sps:$4 sm:$0xff]  }
 0x408   : > { %6465 = vmatprep.subr.bf16.mxu1 %v14206_v16  ;;  %v14287_v16 = vld [vmem:[%s19737_s5 + $0xb64] ss:$16 sps:$4 sm:$0xff]  }
 0x40a   : > { %6220 = vmatpush1.bf16.msra.mxu0 %v14201_v17  ;;  %v14290_v17 = vld [vmem:[%s19737_s5 + $0xb6c] ss:$16 sps:$4 sm:$0xff]  }
 0x40b   : > { %6466 = vmatpush1.bf16.msra.mxu1 %v14204_v18  ;;  %6221 = vmatprep.subr.bf16.mxu0 %v14209_v19  ;;  %v14285_v18 = vld [vmem:[%s19737_s5 + $0xb60] ss:$16 sps:$4 sm:$0xff]   ;;  %v14288_v19 = vld [vmem:[%s19737_s5 + $0xb68] ss:$16 sps:$4 sm:$0xff]  }
 0x40c   : > { %6467 = vmatprep.subr.bf16.mxu1 %v14212_v20  ;;  %v14293_v20 = vld [vmem:[%s19737_s5 + $0xb84] ss:$16 sps:$4 sm:$0xff]  }
 0x40e   : > { %6222 = vmatpush1.bf16.msra.mxu0 %v14207_v21  ;;  %v14296_v21 = vld [vmem:[%s19737_s5 + $0xb8c] ss:$16 sps:$4 sm:$0xff]  }
 0x40f   : > { %6468 = vmatpush1.bf16.msra.mxu1 %v14210_v22  ;;  %6223 = vmatprep.subr.bf16.mxu0 %v14215_v59  ;;  %v14291_v22 = vld [vmem:[%s19737_s5 + $0xb80] ss:$16 sps:$4 sm:$0xff]   ;;  %v14294_v59 = vld [vmem:[%s19737_s5 + $0xb88] ss:$16 sps:$4 sm:$0xff]  }
 0x410   : > { %6469 = vmatprep.subr.bf16.mxu1 %v14218_v32  ;;  %v14299_v32 = vld [vmem:[%s19737_s5 + $0xba4] ss:$16 sps:$4 sm:$0xff]  }
 0x412   : > { %6224 = vmatpush1.bf16.msra.mxu0 %v14213_v23  ;;  %v14302_v23 = vld [vmem:[%s19737_s5 + $0xbac] ss:$16 sps:$4 sm:$0xff]  }
 0x413   : > { %6470 = vmatpush1.bf16.msra.mxu1 %v14216_v40  ;;  %6234 = vmatprep.subr.bf16.mxu0 %v14221_v25  ;;  %v14297_v40 = vld [vmem:[%s19737_s5 + $0xba0] ss:$16 sps:$4 sm:$0xff]   ;;  %v14300_v25 = vld [vmem:[%s19737_s5 + $0xba8] ss:$16 sps:$4 sm:$0xff]  }
 0x414   : > { %6480 = vmatprep.subr.bf16.mxu1 %v14224_v26  ;;  %v14305_v26 = vld [vmem:[%s19737_s5 + $0xbc4] ss:$16 sps:$4 sm:$0xff]  }
 0x415   : > { %6226 = vmatmul.mubr.bf16.vlgmr.msra.gmra.mrb[12].mxu0 %v3699_v30 }
 0x416   : > { %6472 = vmatmul.mubr.bf16.vlgmr.msra.gmra.mrb[4].mxu1 %v3699_v30  ;;  %6235 = vmatpush1.bf16.msra.mxu0 %v14219_v27  ;;  %v14308_v27 = vld [vmem:[%s19737_s5 + $0xbcc] ss:$16 sps:$4 sm:$0xff]   ;;  %v14303_v30 = vld [vmem:[%s19737_s5 + $0xbc0] ss:$16 sps:$4 sm:$0xff]  }
 0x417   : > { %6266 = vmatprep.mubr.bf16.mxu0 %v3702_v36  ;;  %6481 = vmatpush1.bf16.msra.mxu1 %v14222_v34  ;;  %v14306_v34 = vld [vmem:[%s19737_s5 + $0xbc8] ss:$16 sps:$4 sm:$0xff]  }
 0x418   : > { %6512 = vmatprep.mubr.bf16.mxu1 %v3702_v36  ;;  %6236 = vmatprep.subr.bf16.mxu0 %v14227_v8  ;;  %v14311_v8 = vld [vmem:[%s19737_s5 + $0xbe4] ss:$16 sps:$4 sm:$0xff]   ;;  %v14314_v36 = vld [vmem:[%s19737_s5 + $0xbec] ss:$16 sps:$4 sm:$0xff]  }
 0x419   : > { %6482 = vmatprep.subr.bf16.mxu1 %v14230_v62  ;;  %v14309_v62 = vld [vmem:[%s19737_s5 + $0xbe0] ss:$16 sps:$4 sm:$0xff]  }
 0x41a   : > { %6237 = vmatpush1.bf16.msra.mxu0 %v14225_v7  ;;  %v14312_v7 = vld [vmem:[%s19737_s5 + $0xbe8] ss:$16 sps:$4 sm:$0xff]  }
 0x41b   : > { %6483 = vmatpush1.bf16.msra.mxu1 %v14228_v37  ;;  %6238 = vmatprep.subr.bf16.mxu0 %v14233_v41  ;;  %v14317_v37 = vld [vmem:[%s19739_s7 + $0x4] ss:$16 sps:$4 sm:$0xff]   ;;  %v14320_v41 = vld [vmem:[%s19739_s7 + $0xc] ss:$16 sps:$4 sm:$0xff]  }
 0x41c   : > { %6484 = vmatprep.subr.bf16.mxu1 %v14236_v38  ;;  %v14315_v38 = vld [vmem:[%s19739_s7] ss:$16 sps:$4 sm:$0xff]  }
 0x41e   : > { %6239 = vmatpush1.bf16.msra.mxu0 %v14231_v39  ;;  %v3701_v39 = vpack.c.bf16 %v16805_v33, %v16805_v33  ;;  %v14321_v33 = vld [vmem:[%s19739_s7 + $0x20] ss:$16 sps:$4 sm:$0xff]  }
 0x41f   : > { %6485 = vmatpush1.bf16.msra.mxu1 %v14234_v42  ;;  %6240 = vmatprep.subr.bf16.mxu0 %v14239_v43  ;;  %v14318_v42 = vld [vmem:[%s19739_s7 + $0x8] ss:$16 sps:$4 sm:$0xff]   ;;  %v14323_v43 = vld [vmem:[%s19739_s7 + $0x24] ss:$16 sps:$4 sm:$0xff]  }
 0x420   : > { %6486 = vmatprep.subr.bf16.mxu1 %v14242_v44  ;;  %v14326_v44 = vld [vmem:[%s19739_s7 + $0x2c] ss:$16 sps:$4 sm:$0xff]  }
 0x422   : > { %6241 = vmatpush1.bf16.msra.mxu0 %v14237_v45  ;;  %v14324_v45 = vld [vmem:[%s19739_s7 + $0x28] ss:$16 sps:$4 sm:$0xff]  }
 0x423   : > { %6487 = vmatpush1.bf16.msra.mxu1 %v14240_v46  ;;  %6242 = vmatprep.subr.bf16.mxu0 %v14245_v47  ;;  %v14329_v46 = vld [vmem:[%s19739_s7 + $0x44] ss:$16 sps:$4 sm:$0xff]   ;;  %v14332_v47 = vld [vmem:[%s19739_s7 + $0x4c] ss:$16 sps:$4 sm:$0xff]  }
 0x424   : > { %6488 = vmatprep.subr.bf16.mxu1 %v14248_v49  ;;  %v14327_v49 = vld [vmem:[%s19739_s7 + $0x40] ss:$16 sps:$4 sm:$0xff]  }
 0x426   : > { %6243 = vmatpush1.bf16.msra.mxu0 %v14243_v50  ;;  %v14330_v50 = vld [vmem:[%s19739_s7 + $0x48] ss:$16 sps:$4 sm:$0xff]  }
 0x427   : > { %6489 = vmatpush1.bf16.msra.mxu1 %v14246_v51  ;;  %6244 = vmatprep.subr.bf16.mxu0 %v14251_v52  ;;  %v14335_v51 = vld [vmem:[%s19739_s7 + $0x64] ss:$16 sps:$4 sm:$0xff]   ;;  %v14338_v52 = vld [vmem:[%s19739_s7 + $0x6c] ss:$16 sps:$4 sm:$0xff]  }
 0x428   : > { %6490 = vmatprep.subr.bf16.mxu1 %v14254_v53  ;;  %v14333_v53 = vld [vmem:[%s19739_s7 + $0x60] ss:$16 sps:$4 sm:$0xff]  }
 0x42a   : > { %6245 = vmatpush1.bf16.msra.mxu0 %v14249_v54  ;;  %v14336_v54 = vld [vmem:[%s19739_s7 + $0x68] ss:$16 sps:$4 sm:$0xff]  }
 0x42b   : > { %6491 = vmatpush1.bf16.msra.mxu1 %v14252_v48  ;;  %6246 = vmatprep.subr.bf16.mxu0 %v14257_v55  ;;  %v14341_v48 = vld [vmem:[%s19739_s7 + $0x84] ss:$16 sps:$4 sm:$0xff]   ;;  %v14344_v55 = vld [vmem:[%s19739_s7 + $0x8c] ss:$16 sps:$4 sm:$0xff]  }
 0x42c   : > { %6492 = vmatprep.subr.bf16.mxu1 %v14260_v35  ;;  %v14339_v35 = vld [vmem:[%s19739_s7 + $0x80] ss:$16 sps:$4 sm:$0xff]  }
 0x42e   : > { %6247 = vmatpush1.bf16.msra.mxu0 %v14255_v56  ;;  %v14342_v56 = vld [vmem:[%s19739_s7 + $0x88] ss:$16 sps:$4 sm:$0xff]  }
 0x42f   : > { %6493 = vmatpush1.bf16.msra.mxu1 %v14258_v57  ;;  %6248 = vmatprep.subr.bf16.mxu0 %v14263_v6  ;;  %v14347_v57 = vld [vmem:[%s19739_s7 + $0xa4] ss:$16 sps:$4 sm:$0xff]   ;;  %v14350_v6 = vld [vmem:[%s19739_s7 + $0xac] ss:$16 sps:$4 sm:$0xff]  }
 0x430   : > { %6494 = vmatprep.subr.bf16.mxu1 %v14266_v58  ;;  %v14345_v58 = vld [vmem:[%s19739_s7 + $0xa0] ss:$16 sps:$4 sm:$0xff]  }
 0x432   : > { %6249 = vmatpush1.bf16.msra.mxu0 %v14261_v60  ;;  %v14348_v60 = vld [vmem:[%s19739_s7 + $0xa8] ss:$16 sps:$4 sm:$0xff]  }
 0x433   : > { %6495 = vmatpush1.bf16.msra.mxu1 %v14264_v0  ;;  %6250 = vmatprep.subr.bf16.mxu0 %v14269_v3  ;;  %v14353_v0 = vld [vmem:[%s19739_s7 + $0xc4] ss:$16 sps:$4 sm:$0xff]   ;;  %v14356_v3 = vld [vmem:[%s19739_s7 + $0xcc] ss:$16 sps:$4 sm:$0xff]  }
 0x434   : > { %6496 = vmatprep.subr.bf16.mxu1 %v14272_v4  ;;  %v14351_v4 = vld [vmem:[%s19739_s7 + $0xc0] ss:$16 sps:$4 sm:$0xff]  }
 0x436   : > { %6251 = vmatpush1.bf16.msra.mxu0 %v14267_v5  ;;  %v14354_v5 = vld [vmem:[%s19739_s7 + $0xc8] ss:$16 sps:$4 sm:$0xff]  }
 0x437   : > { %6497 = vmatpush1.bf16.msra.mxu1 %v14270_v10  ;;  %6252 = vmatprep.subr.bf16.mxu0 %v14275_v12  ;;  %v14359_v10 = vld [vmem:[%s19739_s7 + $0xe4] ss:$16 sps:$4 sm:$0xff]   ;;  %v14362_v12 = vld [vmem:[%s19739_s7 + $0xec] ss:$16 sps:$4 sm:$0xff]  }
 0x438   : > { %6498 = vmatprep.subr.bf16.mxu1 %v14278_v13  ;;  %v14357_v13 = vld [vmem:[%s19739_s7 + $0xe0] ss:$16 sps:$4 sm:$0xff]  }
 0x43a   : > { %6253 = vmatpush1.bf16.msra.mxu0 %v14273_v14  ;;  %v14360_v14 = vld [vmem:[%s19739_s7 + $0xe8] ss:$16 sps:$4 sm:$0xff]  }
 0x43b   : > { %6499 = vmatpush1.bf16.msra.mxu1 %v14276_v24  ;;  %6254 = vmatprep.subr.bf16.mxu0 %v14281_v1  ;;  %v14365_v24 = vld [vmem:[%s19739_s7 + $0x104] ss:$16 sps:$4 sm:$0xff]   ;;  %v14368_v1 = vld [vmem:[%s19739_s7 + $0x10c] ss:$16 sps:$4 sm:$0xff]  }
 0x43c   : > { %6500 = vmatprep.subr.bf16.mxu1 %v14284_v63  ;;  %v14363_v63 = vld [vmem:[%s19739_s7 + $0x100] ss:$16 sps:$4 sm:$0xff]  }
 0x43e   : > { %6255 = vmatpush1.bf16.msra.mxu0 %v14279_v15  ;;  %v14366_v15 = vld [vmem:[%s19739_s7 + $0x108] ss:$16 sps:$4 sm:$0xff]  }
 0x43f   : > { %6501 = vmatpush1.bf16.msra.mxu1 %v14282_v61  ;;  %6256 = vmatprep.subr.bf16.mxu0 %v14287_v16  ;;  %v14371_v61 = vld [vmem:[%s19739_s7 + $0x124] ss:$16 sps:$4 sm:$0xff]   ;;  %v14374_v16 = vld [vmem:[%s19739_s7 + $0x12c] ss:$16 sps:$4 sm:$0xff]  }
 0x440   : > { %6502 = vmatprep.subr.bf16.mxu1 %v14290_v17  ;;  %v14369_v17 = vld [vmem:[%s19739_s7 + $0x120] ss:$16 sps:$4 sm:$0xff]  }
 0x442   : > { %6257 = vmatpush1.bf16.msra.mxu0 %v14285_v18  ;;  %v14372_v18 = vld [vmem:[%s19739_s7 + $0x128] ss:$16 sps:$4 sm:$0xff]  }
 0x443   : > { %6503 = vmatpush1.bf16.msra.mxu1 %v14288_v19  ;;  %6258 = vmatprep.subr.bf16.mxu0 %v14293_v20  ;;  %v14377_v19 = vld [vmem:[%s19739_s7 + $0x144] ss:$16 sps:$4 sm:$0xff]   ;;  %v14380_v20 = vld [vmem:[%s19739_s7 + $0x14c] ss:$16 sps:$4 sm:$0xff]  }
 0x444   : > { %6504 = vmatprep.subr.bf16.mxu1 %v14296_v21  ;;  %v14375_v21 = vld [vmem:[%s19739_s7 + $0x140] ss:$16 sps:$4 sm:$0xff]  }
 0x446   : > { %6259 = vmatpush1.bf16.msra.mxu0 %v14291_v22  ;;  %v14378_v22 = vld [vmem:[%s19739_s7 + $0x148] ss:$16 sps:$4 sm:$0xff]  }
 0x447   : > { %6505 = vmatpush1.bf16.msra.mxu1 %v14294_v59  ;;  %6260 = vmatprep.subr.bf16.mxu0 %v14299_v32  ;;  %v14383_v59 = vld [vmem:[%s19739_s7 + $0x164] ss:$16 sps:$4 sm:$0xff]   ;;  %v14386_v32 = vld [vmem:[%s19739_s7 + $0x16c] ss:$16 sps:$4 sm:$0xff]  }
 0x448   : > { %6506 = vmatprep.subr.bf16.mxu1 %v14302_v23  ;;  %v14381_v23 = vld [vmem:[%s19739_s7 + $0x160] ss:$16 sps:$4 sm:$0xff]  }
 0x44a   : > { %6261 = vmatpush1.bf16.msra.mxu0 %v14297_v40  ;;  %v14384_v40 = vld [vmem:[%s19739_s7 + $0x168] ss:$16 sps:$4 sm:$0xff]  }
 0x44b   : > { %6507 = vmatpush1.bf16.msra.mxu1 %v14300_v25  ;;  %6262 = vmatprep.subr.bf16.mxu0 %v14305_v26  ;;  %v14389_v25 = vld [vmem:[%s19739_s7 + $0x184] ss:$16 sps:$4 sm:$0xff]   ;;  %v14392_v26 = vld [vmem:[%s19739_s7 + $0x18c] ss:$16 sps:$4 sm:$0xff]  }
 0x44c   : > { %6508 = vmatprep.subr.bf16.mxu1 %v14308_v27  ;;  %v14387_v27 = vld [vmem:[%s19739_s7 + $0x180] ss:$16 sps:$4 sm:$0xff]  }
 0x44e   : > { %6263 = vmatpush1.bf16.msra.mxu0 %v14303_v30  ;;  %v14390_v30 = vld [vmem:[%s19739_s7 + $0x188] ss:$16 sps:$4 sm:$0xff]  }
 0x44f   : > { %6509 = vmatpush1.bf16.msra.mxu1 %v14306_v34  ;;  %6264 = vmatprep.subr.bf16.mxu0 %v14311_v8  ;;  %v14395_v34 = vld [vmem:[%s19739_s7 + $0x1a4] ss:$16 sps:$4 sm:$0xff]   ;;  %v14398_v8 = vld [vmem:[%s19739_s7 + $0x1ac] ss:$16 sps:$4 sm:$0xff]  }
 0x450   : > { %6510 = vmatprep.subr.bf16.mxu1 %v14314_v36  ;;  %v14393_v36 = vld [vmem:[%s19739_s7 + $0x1a0] ss:$16 sps:$4 sm:$0xff]  }
 0x452   : > { %6265 = vmatpush1.bf16.msra.mxu0 %v14309_v62  ;;  %v14396_v62 = vld [vmem:[%s19739_s7 + $0x1a8] ss:$16 sps:$4 sm:$0xff]  }
 0x453   : > { %6511 = vmatpush1.bf16.msra.mxu1 %v14312_v7  ;;  %7319 = vmatprep.subr.bf16.mxu0 %v14317_v37  ;;  %v14401_v7 = vld [vmem:[%s19739_s7 + $0x1c4] ss:$16 sps:$4 sm:$0xff]   ;;  %v14404_v37 = vld [vmem:[%s19739_s7 + $0x1cc] ss:$16 sps:$4 sm:$0xff]  }
 0x454   : > { %7401 = vmatprep.subr.bf16.mxu1 %v14320_v41  ;;  %v14399_v41 = vld [vmem:[%s19739_s7 + $0x1c0] ss:$16 sps:$4 sm:$0xff]  }
 0x455   : > { %6267 = vmatmul.mubr.bf16.vlgmr.msra.gmra.mrb[12].mxu0 %v3701_v39 }
 0x456   : > { %6513 = vmatmul.mubr.bf16.vlgmr.msra.gmra.mrb[4].mxu1 %v3701_v39  ;;  %7320 = vmatpush1.bf16.msra.mxu0 %v14315_v38  ;;  %v14402_v38 = vld [vmem:[%s19739_s7 + $0x1c8] ss:$16 sps:$4 sm:$0xff]   ;;  %v14407_v39 = vld [vmem:[%s19739_s7 + $0x1e4] ss:$16 sps:$4 sm:$0xff]  }
 0x457   : > { %7402 = vmatpush1.bf16.msra.mxu1 %v14318_v42  ;;  %7321 = vmatprep.subr.bf16.mxu0 %v14323_v43  ;;  %v14410_v42 = vld [vmem:[%s19739_s7 + $0x1ec] ss:$16 sps:$4 sm:$0xff]   ;;  %v14405_v43 = vld [vmem:[%s19739_s7 + $0x1e0] ss:$16 sps:$4 sm:$0xff]  }
 0x458   : > { %7403 = vmatprep.subr.bf16.mxu1 %v14326_v44  ;;  %v14408_v44 = vld [vmem:[%s19739_s7 + $0x1e8] ss:$16 sps:$4 sm:$0xff]  }
 0x45a   : > { %7322 = vmatpush1.bf16.msra.mxu0 %v14321_v33  ;;  %v14413_v33 = vld [vmem:[%s19739_s7 + $0x204] ss:$16 sps:$4 sm:$0xff]  }
 0x45b   : > { %7404 = vmatpush1.bf16.msra.mxu1 %v14324_v45  ;;  %7323 = vmatprep.subr.bf16.mxu0 %v14329_v46  ;;  %v14416_v45 = vld [vmem:[%s19739_s7 + $0x20c] ss:$16 sps:$4 sm:$0xff]   ;;  %v17977_v46 = vld [vmem:[%s19738_s6] sm:$0xf] }
 0x45c   : > { %7405 = vmatprep.subr.bf16.mxu1 %v14332_v47  ;;  %v4092_v47 = vrot.slane %v17977_v46, %v15549_v29 }
 0x45e   : > { %7324 = vmatpush1.bf16.msra.mxu0 %v14327_v49  ;;  %v4096_v49 = vrot.slane %v17977_v46, %v15557_v31 }
 0x45f   : > { %7406 = vmatpush1.bf16.msra.mxu1 %v14330_v50  ;;  %7325 = vmatprep.subr.bf16.mxu0 %v14335_v51  ;;  %v4104_v50 = vrot.slane %v17977_v46, %v15606_v11 }
 0x460   : > { %7407 = vmatprep.subr.bf16.mxu1 %v14338_v52 }
 0x462   : > { %7326 = vmatpush1.bf16.msra.mxu0 %v14333_v53 }
 0x463   : > { %7408 = vmatpush1.bf16.msra.mxu1 %v14336_v54  ;;  %7327 = vmatprep.subr.bf16.mxu0 %v14341_v48 }
 0x464   : > { %7409 = vmatprep.subr.bf16.mxu1 %v14344_v55 }
 0x466   : > { %7328 = vmatpush1.bf16.msra.mxu0 %v14339_v35 }
 0x467   : > { %7410 = vmatpush1.bf16.msra.mxu1 %v14342_v56  ;;  %7329 = vmatprep.subr.bf16.mxu0 %v14347_v57 }
 0x468   : > { %7411 = vmatprep.subr.bf16.mxu1 %v14350_v6 }
 0x46a   : > { %7330 = vmatpush1.bf16.msra.mxu0 %v14345_v58 }
 0x46b   : > { %7412 = vmatpush1.bf16.msra.mxu1 %v14348_v60  ;;  %7331 = vmatprep.subr.bf16.mxu0 %v14353_v0 }
 0x46c   : > { %7413 = vmatprep.subr.bf16.mxu1 %v14356_v3 }
 0x46e   : > { %7332 = vmatpush1.bf16.msra.mxu0 %v14351_v4 }
 0x46f   : > { %7414 = vmatpush1.bf16.msra.mxu1 %v14354_v5  ;;  %7333 = vmatprep.subr.bf16.mxu0 %v14359_v10  ;;  %v14411_v5 = vld [vmem:[%s19739_s7 + $0x200] ss:$16 sps:$4 sm:$0xff]   ;;  %v14414_v10 = vld [vmem:[%s19739_s7 + $0x208] ss:$16 sps:$4 sm:$0xff]  }
 0x470   : > { %7415 = vmatprep.subr.bf16.mxu1 %v14362_v12 }
 0x472   : > { %7334 = vmatpush1.bf16.msra.mxu0 %v14357_v13  ;;  %v14419_v13 = vld [vmem:[%s19739_s7 + $0x224] ss:$16 sps:$4 sm:$0xff]  }
 0x473   : > { %7416 = vmatpush1.bf16.msra.mxu1 %v14360_v14  ;;  %7335 = vmatprep.subr.bf16.mxu0 %v14365_v24  ;;  %v14422_v14 = vld [vmem:[%s19739_s7 + $0x22c] ss:$16 sps:$4 sm:$0xff]  }
 0x474   : > { %7417 = vmatprep.subr.bf16.mxu1 %v14368_v1  ;;  %v14417_v1 = vld [vmem:[%s19739_s7 + $0x220] ss:$16 sps:$4 sm:$0xff]  }
 0x476   : > { %7336 = vmatpush1.bf16.msra.mxu0 %v14363_v63  ;;  %v14420_v63 = vld [vmem:[%s19739_s7 + $0x228] ss:$16 sps:$4 sm:$0xff]  }
 0x477   : > { %7418 = vmatpush1.bf16.msra.mxu1 %v14366_v15  ;;  %7337 = vmatprep.subr.bf16.mxu0 %v14371_v61  ;;  %v14425_v15 = vld [vmem:[%s19739_s7 + $0x244] ss:$16 sps:$4 sm:$0xff]   ;;  %v14428_v61 = vld [vmem:[%s19739_s7 + $0x24c] ss:$16 sps:$4 sm:$0xff]  }
 0x478   : > { %7419 = vmatprep.subr.bf16.mxu1 %v14374_v16  ;;  %v14423_v16 = vld [vmem:[%s19739_s7 + $0x240] ss:$16 sps:$4 sm:$0xff]  }
 0x47a   : > { %7338 = vmatpush1.bf16.msra.mxu0 %v14369_v17  ;;  %v14426_v17 = vld [vmem:[%s19739_s7 + $0x248] ss:$16 sps:$4 sm:$0xff]  }
 0x47b   : > { %7420 = vmatpush1.bf16.msra.mxu1 %v14372_v18  ;;  %7339 = vmatprep.subr.bf16.mxu0 %v14377_v19  ;;  %v14431_v18 = vld [vmem:[%s19739_s7 + $0x264] ss:$16 sps:$4 sm:$0xff]   ;;  %v14434_v19 = vld [vmem:[%s19739_s7 + $0x26c] ss:$16 sps:$4 sm:$0xff]  }
 0x47c   : > { %7421 = vmatprep.subr.bf16.mxu1 %v14380_v20  ;;  %v14429_v20 = vld [vmem:[%s19739_s7 + $0x260] ss:$16 sps:$4 sm:$0xff]  }
 0x47e   : > { %7340 = vmatpush1.bf16.msra.mxu0 %v14375_v21  ;;  %v14432_v21 = vld [vmem:[%s19739_s7 + $0x268] ss:$16 sps:$4 sm:$0xff]  }
 0x47f   : > { %7422 = vmatpush1.bf16.msra.mxu1 %v14378_v22  ;;  %7341 = vmatprep.subr.bf16.mxu0 %v14383_v59  ;;  %v14437_v22 = vld [vmem:[%s19739_s7 + $0x284] ss:$16 sps:$4 sm:$0xff]   ;;  %v14440_v59 = vld [vmem:[%s19739_s7 + $0x28c] ss:$16 sps:$4 sm:$0xff]  }
 0x480   : > { %7423 = vmatprep.subr.bf16.mxu1 %v14386_v32  ;;  %v14435_v32 = vld [vmem:[%s19739_s7 + $0x280] ss:$16 sps:$4 sm:$0xff]  }
 0x482   : > { %7342 = vmatpush1.bf16.msra.mxu0 %v14381_v23  ;;  %v14438_v23 = vld [vmem:[%s19739_s7 + $0x288] ss:$16 sps:$4 sm:$0xff]  }
 0x483   : > { %7424 = vmatpush1.bf16.msra.mxu1 %v14384_v40  ;;  %7343 = vmatprep.subr.bf16.mxu0 %v14389_v25  ;;  %v14443_v40 = vld [vmem:[%s19739_s7 + $0x2a4] ss:$16 sps:$4 sm:$0xff]   ;;  %v14446_v25 = vld [vmem:[%s19739_s7 + $0x2ac] ss:$16 sps:$4 sm:$0xff]  }
 0x484   : > { %7425 = vmatprep.subr.bf16.mxu1 %v14392_v26  ;;  %v14441_v26 = vld [vmem:[%s19739_s7 + $0x2a0] ss:$16 sps:$4 sm:$0xff]  }
 0x486   : > { %7344 = vmatpush1.bf16.msra.mxu0 %v14387_v27  ;;  %v14444_v27 = vld [vmem:[%s19739_s7 + $0x2a8] ss:$16 sps:$4 sm:$0xff]  }
 0x487   : > { %7426 = vmatpush1.bf16.msra.mxu1 %v14390_v30  ;;  %7345 = vmatprep.subr.bf16.mxu0 %v14395_v34  ;;  %v14449_v30 = vld [vmem:[%s19739_s7 + $0x2c4] ss:$16 sps:$4 sm:$0xff]   ;;  %v14452_v34 = vld [vmem:[%s19739_s7 + $0x2cc] ss:$16 sps:$4 sm:$0xff]  }
 0x488   : > { %7427 = vmatprep.subr.bf16.mxu1 %v14398_v8  ;;  %v14447_v8 = vld [vmem:[%s19739_s7 + $0x2c0] ss:$16 sps:$4 sm:$0xff]  }
 0x48a   : > { %7346 = vmatpush1.bf16.msra.mxu0 %v14393_v36  ;;  %v14450_v36 = vld [vmem:[%s19739_s7 + $0x2c8] ss:$16 sps:$4 sm:$0xff]  }
 0x48b   : > { %7428 = vmatpush1.bf16.msra.mxu1 %v14396_v62  ;;  %7347 = vmatprep.subr.bf16.mxu0 %v14401_v7  ;;  %v14455_v62 = vld [vmem:[%s19739_s7 + $0x2e4] ss:$16 sps:$4 sm:$0xff]   ;;  %v14458_v7 = vld [vmem:[%s19739_s7 + $0x2ec] ss:$16 sps:$4 sm:$0xff]  }
 0x48c   : > { %7429 = vmatprep.subr.bf16.mxu1 %v14404_v37  ;;  %v14453_v37 = vld [vmem:[%s19739_s7 + $0x2e0] ss:$16 sps:$4 sm:$0xff]  }
 0x48e   : > { %7348 = vmatpush1.bf16.msra.mxu0 %v14399_v41  ;;  %v14456_v41 = vld [vmem:[%s19739_s7 + $0x2e8] ss:$16 sps:$4 sm:$0xff]  }
 0x48f   : > { %7430 = vmatpush1.bf16.msra.mxu1 %v14402_v38  ;;  %7349 = vmatprep.subr.bf16.mxu0 %v14407_v39  ;;  %v14461_v38 = vld [vmem:[%s19739_s7 + $0x304] ss:$16 sps:$4 sm:$0xff]   ;;  %v14464_v39 = vld [vmem:[%s19739_s7 + $0x30c] ss:$16 sps:$4 sm:$0xff]  }
 0x490   : > { %7431 = vmatprep.subr.bf16.mxu1 %v14410_v42  ;;  %v14459_v42 = vld [vmem:[%s19739_s7 + $0x300] ss:$16 sps:$4 sm:$0xff]  }
 0x492   : > { %7350 = vmatpush1.bf16.msra.mxu0 %v14405_v43  ;;  %v14462_v43 = vld [vmem:[%s19739_s7 + $0x308] ss:$16 sps:$4 sm:$0xff]  }
 0x493   : > { %7432 = vmatpush1.bf16.msra.mxu1 %v14408_v44  ;;  %7360 = vmatprep.subr.bf16.mxu0 %v14413_v33  ;;  %v14467_v44 = vld [vmem:[%s19739_s7 + $0x324] ss:$16 sps:$4 sm:$0xff]   ;;  %v14470_v33 = vld [vmem:[%s19739_s7 + $0x32c] ss:$16 sps:$4 sm:$0xff]  }
 0x494   : > { %7442 = vmatprep.subr.bf16.mxu1 %v14416_v45  ;;  %v14465_v45 = vld [vmem:[%s19739_s7 + $0x320] ss:$16 sps:$4 sm:$0xff]  }
 0x528   : > { %v6268_v51 = vpop.f32.mrb[12].mxu0 }
 0x529   : > { %v12992_v52 = vadd.f32 %v6268_v51, %v4092_v47  ;;  %v17985_v53 = vpop.f32.mrb[4].mxu1  ;;  %v6270_v54 = vpop.f32.mrb[13].mxu0  ;;  %v14468_v47 = vld [vmem:[%s19739_s7 + $0x328] ss:$16 sps:$4 sm:$0xff]   ;;  %v14471_v51 = vld [vmem:[%s19739_s7 + $0x340] ss:$16 sps:$4 sm:$0xff]  }
 0x52a   : > { %v12993_v48 = vadd.f32 %v6270_v54, %v4096_v49  ;;  %v6516_v55 = vpop.f32.mrb[5].mxu1  ;;  %v6272_v35 = vpop.f32.mrb[14].mxu0  ;;  %v14473_v49 = vld [vmem:[%s19739_s7 + $0x344] ss:$16 sps:$4 sm:$0xff]  }
 0x52b   : > { %v6521_v56 = vmax.f32 %v12992_v52, 0.0  ;;  %v12995_v57 = vadd.f32 %v6516_v55, %v4104_v50  ;;  %v6518_v6 = vpop.f32.mrb[6].mxu1  ;;  %v6273_v58 = vpop.f32.mrb[15].mxu0  ;;  %v14476_v50 = vld [vmem:[%s19739_s7 + $0x34c] ss:$16 sps:$4 sm:$0xff]  }
 0x52c   : > { %v6522_v60 = vmax.f32 %v12993_v48, 0.0  ;;  %v6519_v0 = vpop.f32.mrb[7].mxu1  ;;  %v14474_v52 = vld [vmem:[%s19739_s7 + $0x348] ss:$16 sps:$4 sm:$0xff]   ;;  %v14479_v54 = vld [vmem:[%s19739_s7 + $0x364] ss:$16 sps:$4 sm:$0xff]  }
 0x52d   : > { %v6524_v3 = vmax.f32 %v12995_v57, 0.0  ;;  %v6525_v12 = vpack.c.bf16 %v6521_v56, %v6521_v56  ;;  %v14482_v48 = vld [vmem:[%s19739_s7 + $0x36c] ss:$16 sps:$4 sm:$0xff]   ;;  %v14477_v55 = vld [vmem:[%s19739_s7 + $0x360] ss:$16 sps:$4 sm:$0xff]  }
 0x52e   : > { %v6526_v4 = vpack.c.bf16 %v6522_v60, %v6522_v60  ;;  %v14480_v35 = vld [vmem:[%s19739_s7 + $0x368] ss:$16 sps:$4 sm:$0xff]   ;;  %v14485_v56 = vld [vmem:[%s19739_s7 + $0x384] ss:$16 sps:$4 sm:$0xff]   ;;  %v14488_v57 = vld [vmem:[%s19739_s7 + $0x38c] ss:$16 sps:$4 sm:$0xff]  }
 0x52f   : > { %v6528_v24 = vpack.c.bf16 %v6524_v3, %v6524_v3  ;;  %v14483_v6 = vld [vmem:[%s19739_s7 + $0x380] ss:$16 sps:$4 sm:$0xff]   ;;  %v14486_v58 = vld [vmem:[%s19739_s7 + $0x388] ss:$16 sps:$4 sm:$0xff]   ;;  %v14491_v60 = vld [vmem:[%s19739_s7 + $0x3a4] ss:$16 sps:$4 sm:$0xff]  }
 0x530   : > { %7351 = vmatprep.mubr.bf16.mxu0 %v6526_v4  ;;  %7433 = vmatprep.mubr.bf16.mxu1 %v6526_v4  ;;  %v14494_v0 = vld [vmem:[%s19739_s7 + $0x3ac] ss:$16 sps:$4 sm:$0xff]   ;;  %v14489_v3 = vld [vmem:[%s19739_s7 + $0x3a0] ss:$16 sps:$4 sm:$0xff]   ;;  %v14492_v4 = vld [vmem:[%s19739_s7 + $0x3a8] ss:$16 sps:$4 sm:$0xff]  }
 0x531   : > { %7352 = vmatmul.mubr.bf16.vlgmr.msra.gmra.mrb[16].mxu0 %v6525_v12  ;;  %7434 = vmatmul.mubr.bf16.vlgmr.msra.gmra.mrb[8].mxu1 %v6525_v12  ;;  %v14500_v12 = vld [vmem:[%s19739_s7 + $0x3cc] ss:$16 sps:$4 sm:$0xff]  }
 0x532   : > { %7361 = vmatpush1.bf16.msra.mxu0 %v14411_v5  ;;  %7443 = vmatpush1.bf16.msra.mxu1 %v14414_v10  ;;  %v4100_v5 = vrot.slane %v17977_v46, %v15600_v9  ;;  %v14497_v10 = vld [vmem:[%s19739_s7 + $0x3c4] ss:$16 sps:$4 sm:$0xff]   ;;  %v14498_v46 = vld [vmem:[%s19739_s7 + $0x3c8] ss:$16 sps:$4 sm:$0xff]  }
 0x533   : > { %7392 = vmatprep.mubr.bf16.mxu0 %v6528_v24  ;;  %7474 = vmatprep.mubr.bf16.mxu1 %v6528_v24  ;;  %v14503_v24 = vld [vmem:[%s19739_s7 + $0x3e4] ss:$16 sps:$4 sm:$0xff]  }
 0x534   : > { %7362 = vmatprep.subr.bf16.mxu0 %v14419_v13  ;;  %7444 = vmatprep.subr.bf16.mxu1 %v14422_v14  ;;  %v14495_v13 = vld [vmem:[%s19739_s7 + $0x3c0] ss:$16 sps:$4 sm:$0xff]   ;;  %v12994_v14 = vadd.f32 %v17985_v53, %v4100_v5  ;;  %v14504_v53 = vld [vmem:[%s19739_s7 + $0x3e8] ss:$16 sps:$4 sm:$0xff]  }
 0x535   : > { %v14573_v5 = vld [vmem:[%s19741_s9 + $0x420] ss:$48 sps:$4 sm:$0xff]  }
 0x536   : > { %7363 = vmatpush1.bf16.msra.mxu0 %v14417_v1  ;;  %7445 = vmatpush1.bf16.msra.mxu1 %v14420_v63  ;;  %v14506_v1 = vld [vmem:[%s19739_s7 + $0x3ec] ss:$16 sps:$4 sm:$0xff]   ;;  %v14501_v63 = vld [vmem:[%s19739_s7 + $0x3e0] ss:$16 sps:$4 sm:$0xff]  }
 0x537   : > { %7364 = vmatprep.subr.bf16.mxu0 %v14425_v15  ;;  %7446 = vmatprep.subr.bf16.mxu1 %v14428_v61  ;;  %v6523_v15 = vmax.f32 %v12994_v14, 0.0  ;;  %v14509_v61 = vld [vmem:[%s19741_s9 + $0x4] ss:$48 sps:$4 sm:$0xff]   ;;  %v14582_v14 = vld [vmem:[%s19741_s9 + $0x488] ss:$48 sps:$4 sm:$0xff]  }
 0x53a   : > { %7365 = vmatpush1.bf16.msra.mxu0 %v14423_v16  ;;  %7447 = vmatpush1.bf16.msra.mxu1 %v14426_v17  ;;  %v14512_v16 = vld [vmem:[%s19741_s9 + $0xc] ss:$48 sps:$4 sm:$0xff]   ;;  %v14507_v17 = vld [vmem:[%s19741_s9] ss:$48 sps:$4 sm:$0xff]  }
 0x53b   : > { %7366 = vmatprep.subr.bf16.mxu0 %v14431_v18  ;;  %7448 = vmatprep.subr.bf16.mxu1 %v14434_v19  ;;  %v14510_v18 = vld [vmem:[%s19741_s9 + $0x8] ss:$48 sps:$4 sm:$0xff]   ;;  %v6527_v19 = vpack.c.bf16 %v6523_v15, %v6523_v15  ;;  %v14593_v15 = vld [vmem:[%s19741_s9 + $0x544] ss:$48 sps:$4 sm:$0xff]  }
 0x53e   : > { %7367 = vmatpush1.bf16.msra.mxu0 %v14429_v20  ;;  %7449 = vmatpush1.bf16.msra.mxu1 %v14432_v21  ;;  %v14515_v20 = vld [vmem:[%s19741_s9 + $0x64] ss:$48 sps:$4 sm:$0xff]   ;;  %v14518_v21 = vld [vmem:[%s19741_s9 + $0x6c] ss:$48 sps:$4 sm:$0xff]  }
 0x53f   : > { %7368 = vmatprep.subr.bf16.mxu0 %v14437_v22  ;;  %7450 = vmatprep.subr.bf16.mxu1 %v14440_v59  ;;  %v14513_v22 = vld [vmem:[%s19741_s9 + $0x60] ss:$48 sps:$4 sm:$0xff]   ;;  %v14516_v59 = vld [vmem:[%s19741_s9 + $0x68] ss:$48 sps:$4 sm:$0xff]  }
 0x542   : > { %7369 = vmatpush1.bf16.msra.mxu0 %v14435_v32  ;;  %7451 = vmatpush1.bf16.msra.mxu1 %v14438_v23  ;;  %v14521_v32 = vld [vmem:[%s19741_s9 + $0xc4] ss:$48 sps:$4 sm:$0xff]   ;;  %v14524_v23 = vld [vmem:[%s19741_s9 + $0xcc] ss:$48 sps:$4 sm:$0xff]  }
 0x543   : > { %7370 = vmatprep.subr.bf16.mxu0 %v14443_v40  ;;  %7452 = vmatprep.subr.bf16.mxu1 %v14446_v25  ;;  %v14519_v40 = vld [vmem:[%s19741_s9 + $0xc0] ss:$48 sps:$4 sm:$0xff]   ;;  %v14522_v25 = vld [vmem:[%s19741_s9 + $0xc8] ss:$48 sps:$4 sm:$0xff]  }
 0x546   : > { %7371 = vmatpush1.bf16.msra.mxu0 %v14441_v26  ;;  %7453 = vmatpush1.bf16.msra.mxu1 %v14444_v27  ;;  %v14527_v26 = vld [vmem:[%s19741_s9 + $0x124] ss:$48 sps:$4 sm:$0xff]   ;;  %v14530_v27 = vld [vmem:[%s19741_s9 + $0x12c] ss:$48 sps:$4 sm:$0xff]  }
 0x547   : > { %7372 = vmatprep.subr.bf16.mxu0 %v14449_v30  ;;  %7454 = vmatprep.subr.bf16.mxu1 %v14452_v34  ;;  %v14525_v30 = vld [vmem:[%s19741_s9 + $0x120] ss:$48 sps:$4 sm:$0xff]   ;;  %v14528_v34 = vld [vmem:[%s19741_s9 + $0x128] ss:$48 sps:$4 sm:$0xff]  }
 0x54a   : > { %7373 = vmatpush1.bf16.msra.mxu0 %v14447_v8  ;;  %7455 = vmatpush1.bf16.msra.mxu1 %v14450_v36  ;;  %v14533_v8 = vld [vmem:[%s19741_s9 + $0x184] ss:$48 sps:$4 sm:$0xff]   ;;  %v14536_v36 = vld [vmem:[%s19741_s9 + $0x18c] ss:$48 sps:$4 sm:$0xff]  }
 0x54b   : > { %7374 = vmatprep.subr.bf16.mxu0 %v14455_v62  ;;  %7456 = vmatprep.subr.bf16.mxu1 %v14458_v7  ;;  %v14531_v62 = vld [vmem:[%s19741_s9 + $0x180] ss:$48 sps:$4 sm:$0xff]   ;;  %v14534_v7 = vld [vmem:[%s19741_s9 + $0x188] ss:$48 sps:$4 sm:$0xff]  }
 0x54e   : > { %7375 = vmatpush1.bf16.msra.mxu0 %v14453_v37  ;;  %7457 = vmatpush1.bf16.msra.mxu1 %v14456_v41  ;;  %v14539_v37 = vld [vmem:[%s19741_s9 + $0x1e4] ss:$48 sps:$4 sm:$0xff]   ;;  %v14542_v41 = vld [vmem:[%s19741_s9 + $0x1ec] ss:$48 sps:$4 sm:$0xff]  }
 0x54f   : > { %7376 = vmatprep.subr.bf16.mxu0 %v14461_v38  ;;  %7458 = vmatprep.subr.bf16.mxu1 %v14464_v39  ;;  %v14537_v38 = vld [vmem:[%s19741_s9 + $0x1e0] ss:$48 sps:$4 sm:$0xff]   ;;  %v14540_v39 = vld [vmem:[%s19741_s9 + $0x1e8] ss:$48 sps:$4 sm:$0xff]  }
 0x552   : > { %7377 = vmatpush1.bf16.msra.mxu0 %v14459_v42  ;;  %7459 = vmatpush1.bf16.msra.mxu1 %v14462_v43  ;;  %v14545_v42 = vld [vmem:[%s19741_s9 + $0x244] ss:$48 sps:$4 sm:$0xff]   ;;  %v14548_v43 = vld [vmem:[%s19741_s9 + $0x24c] ss:$48 sps:$4 sm:$0xff]  }
 0x553   : > { %7378 = vmatprep.subr.bf16.mxu0 %v14467_v44  ;;  %7460 = vmatprep.subr.bf16.mxu1 %v14470_v33  ;;  %v14543_v44 = vld [vmem:[%s19741_s9 + $0x240] ss:$48 sps:$4 sm:$0xff]   ;;  %v14546_v33 = vld [vmem:[%s19741_s9 + $0x248] ss:$48 sps:$4 sm:$0xff]  }
 0x556   : > { %7379 = vmatpush1.bf16.msra.mxu0 %v14465_v45  ;;  %7461 = vmatpush1.bf16.msra.mxu1 %v14468_v47  ;;  %v14551_v45 = vld [vmem:[%s19741_s9 + $0x2a4] ss:$48 sps:$4 sm:$0xff]   ;;  %v14554_v47 = vld [vmem:[%s19741_s9 + $0x2ac] ss:$48 sps:$4 sm:$0xff]  }
 0x557   : > { %7380 = vmatprep.subr.bf16.mxu0 %v14473_v49  ;;  %7462 = vmatprep.subr.bf16.mxu1 %v14476_v50  ;;  %v14549_v49 = vld [vmem:[%s19741_s9 + $0x2a0] ss:$48 sps:$4 sm:$0xff]   ;;  %v14552_v50 = vld [vmem:[%s19741_s9 + $0x2a8] ss:$48 sps:$4 sm:$0xff]  }
 0x55a   : > { %7381 = vmatpush1.bf16.msra.mxu0 %v14471_v51  ;;  %7463 = vmatpush1.bf16.msra.mxu1 %v14474_v52  ;;  %v14557_v51 = vld [vmem:[%s19741_s9 + $0x304] ss:$48 sps:$4 sm:$0xff]   ;;  %v14560_v52 = vld [vmem:[%s19741_s9 + $0x30c] ss:$48 sps:$4 sm:$0xff]  }
 0x55b   : > { %7382 = vmatprep.subr.bf16.mxu0 %v14479_v54  ;;  %7464 = vmatprep.subr.bf16.mxu1 %v14482_v48  ;;  %v14555_v54 = vld [vmem:[%s19741_s9 + $0x300] ss:$48 sps:$4 sm:$0xff]   ;;  %v14558_v48 = vld [vmem:[%s19741_s9 + $0x308] ss:$48 sps:$4 sm:$0xff]  }
 0x55e   : > { %7383 = vmatpush1.bf16.msra.mxu0 %v14477_v55  ;;  %7465 = vmatpush1.bf16.msra.mxu1 %v14480_v35  ;;  %v14563_v55 = vld [vmem:[%s19741_s9 + $0x364] ss:$48 sps:$4 sm:$0xff]   ;;  %v14566_v35 = vld [vmem:[%s19741_s9 + $0x36c] ss:$48 sps:$4 sm:$0xff]  }
 0x55f   : > { %7384 = vmatprep.subr.bf16.mxu0 %v14485_v56  ;;  %7466 = vmatprep.subr.bf16.mxu1 %v14488_v57  ;;  %v14561_v56 = vld [vmem:[%s19741_s9 + $0x360] ss:$48 sps:$4 sm:$0xff]   ;;  %v14564_v57 = vld [vmem:[%s19741_s9 + $0x368] ss:$48 sps:$4 sm:$0xff]  }
 0x562   : > { %7385 = vmatpush1.bf16.msra.mxu0 %v14483_v6  ;;  %7467 = vmatpush1.bf16.msra.mxu1 %v14486_v58  ;;  %v14569_v6 = vld [vmem:[%s19741_s9 + $0x3c4] ss:$48 sps:$4 sm:$0xff]   ;;  %v14572_v58 = vld [vmem:[%s19741_s9 + $0x3cc] ss:$48 sps:$4 sm:$0xff]  }
 0x563   : > { %7386 = vmatprep.subr.bf16.mxu0 %v14491_v60  ;;  %7468 = vmatprep.subr.bf16.mxu1 %v14494_v0  ;;  %v14567_v60 = vld [vmem:[%s19741_s9 + $0x3c0] ss:$48 sps:$4 sm:$0xff]   ;;  %v14570_v0 = vld [vmem:[%s19741_s9 + $0x3c8] ss:$48 sps:$4 sm:$0xff]  }
 0x566   : > { %7387 = vmatpush1.bf16.msra.mxu0 %v14489_v3  ;;  %7469 = vmatpush1.bf16.msra.mxu1 %v14492_v4  ;;  %v14575_v3 = vld [vmem:[%s19741_s9 + $0x424] ss:$48 sps:$4 sm:$0xff]   ;;  %v14578_v4 = vld [vmem:[%s19741_s9 + $0x42c] ss:$48 sps:$4 sm:$0xff]  }
 0x567   : > { %7388 = vmatprep.subr.bf16.mxu0 %v14497_v10  ;;  %7470 = vmatprep.subr.bf16.mxu1 %v14500_v12  ;;  %v14576_v10 = vld [vmem:[%s19741_s9 + $0x428] ss:$48 sps:$4 sm:$0xff]   ;;  %v14581_v12 = vld [vmem:[%s19741_s9 + $0x484] ss:$48 sps:$4 sm:$0xff]  }
 0x56a   : > { %7389 = vmatpush1.bf16.msra.mxu0 %v14495_v13  ;;  %7471 = vmatpush1.bf16.msra.mxu1 %v14498_v46  ;;  %v14584_v13 = vld [vmem:[%s19741_s9 + $0x48c] ss:$48 sps:$4 sm:$0xff]   ;;  %v14579_v46 = vld [vmem:[%s19741_s9 + $0x480] ss:$48 sps:$4 sm:$0xff]  }
 0x56b   : > { %7390 = vmatprep.subr.bf16.mxu0 %v14503_v24  ;;  %7472 = vmatprep.subr.bf16.mxu1 %v14506_v1  ;;  %v14587_v24 = vld [vmem:[%s19741_s9 + $0x4e4] ss:$48 sps:$4 sm:$0xff]   ;;  %v14590_v1 = vld [vmem:[%s19741_s9 + $0x4ec] ss:$48 sps:$4 sm:$0xff]  }
 0x56e   : > { %7391 = vmatpush1.bf16.msra.mxu0 %v14501_v63  ;;  %7473 = vmatpush1.bf16.msra.mxu1 %v14504_v53  ;;  %v14585_v63 = vld [vmem:[%s19741_s9 + $0x4e0] ss:$48 sps:$4 sm:$0xff]   ;;  %v14588_v53 = vld [vmem:[%s19741_s9 + $0x4e8] ss:$48 sps:$4 sm:$0xff]  }
 0x56f   : > { %9859 = vmatprep.subr.bf16.mxu0 %v14509_v61  ;;  %9941 = vmatprep.subr.bf16.mxu1 %v14512_v16  ;;  %v14596_v61 = vld [vmem:[%s19741_s9 + $0x54c] ss:$48 sps:$4 sm:$0xff]   ;;  %v14591_v16 = vld [vmem:[%s19741_s9 + $0x540] ss:$48 sps:$4 sm:$0xff]  }
 0x571   : > { %7393 = vmatmul.mubr.bf16.vlgmr.msra.gmra.mrb[16].mxu0 %v6527_v19  ;;  %7475 = vmatmul.mubr.bf16.vlgmr.msra.gmra.mrb[8].mxu1 %v6527_v19  ;;  %v14602_v19 = vld [vmem:[%s19741_s9 + $0x5ac] ss:$48 sps:$4 sm:$0xff]  }
 0x572   : > { %9860 = vmatpush1.bf16.msra.mxu0 %v14507_v17  ;;  %9942 = vmatpush1.bf16.msra.mxu1 %v14510_v18  ;;  %v14594_v17 = vld [vmem:[%s19741_s9 + $0x548] ss:$48 sps:$4 sm:$0xff]   ;;  %v14599_v18 = vld [vmem:[%s19741_s9 + $0x5a4] ss:$48 sps:$4 sm:$0xff]  }
 0x573   : > { %9861 = vmatprep.subr.bf16.mxu0 %v14515_v20  ;;  %9943 = vmatprep.subr.bf16.mxu1 %v14518_v21  ;;  %v14597_v20 = vld [vmem:[%s19741_s9 + $0x5a0] ss:$48 sps:$4 sm:$0xff]   ;;  %v14600_v21 = vld [vmem:[%s19741_s9 + $0x5a8] ss:$48 sps:$4 sm:$0xff]  }
 0x576   : > { %9862 = vmatpush1.bf16.msra.mxu0 %v14513_v22  ;;  %9944 = vmatpush1.bf16.msra.mxu1 %v14516_v59  ;;  %v14605_v22 = vld [vmem:[%s19741_s9 + $0x604] ss:$48 sps:$4 sm:$0xff]   ;;  %v14608_v59 = vld [vmem:[%s19741_s9 + $0x60c] ss:$48 sps:$4 sm:$0xff]  }
 0x577   : > { %9863 = vmatprep.subr.bf16.mxu0 %v14521_v32  ;;  %9945 = vmatprep.subr.bf16.mxu1 %v14524_v23  ;;  %v18377_v32 = vld [vmem:[%s19740_s8] sm:$0xf] }
 0x578   : > { %v6662_v23 = vrot.slane %v18377_v32, %v15549_v29 }
 0x57a   : > { %9864 = vmatpush1.bf16.msra.mxu0 %v14519_v40  ;;  %9946 = vmatpush1.bf16.msra.mxu1 %v14522_v25  ;;  %v6666_v40 = vrot.slane %v18377_v32, %v15557_v31  ;;  %v6674_v25 = vrot.slane %v18377_v32, %v15606_v11 }
 0x57b   : > { %9865 = vmatprep.subr.bf16.mxu0 %v14527_v26  ;;  %9947 = vmatprep.subr.bf16.mxu1 %v14530_v27 }
 0x57e   : > { %9866 = vmatpush1.bf16.msra.mxu0 %v14525_v30  ;;  %9948 = vmatpush1.bf16.msra.mxu1 %v14528_v34 }
 0x57f   : > { %9867 = vmatprep.subr.bf16.mxu0 %v14533_v8  ;;  %9949 = vmatprep.subr.bf16.mxu1 %v14536_v36 }
 0x582   : > { %9868 = vmatpush1.bf16.msra.mxu0 %v14531_v62  ;;  %9950 = vmatpush1.bf16.msra.mxu1 %v14534_v7 }
 0x583   : > { %9869 = vmatprep.subr.bf16.mxu0 %v14539_v37  ;;  %9951 = vmatprep.subr.bf16.mxu1 %v14542_v41 }
 0x586   : > { %9870 = vmatpush1.bf16.msra.mxu0 %v14537_v38  ;;  %9952 = vmatpush1.bf16.msra.mxu1 %v14540_v39 }
 0x587   : > { %9871 = vmatprep.subr.bf16.mxu0 %v14545_v42  ;;  %9953 = vmatprep.subr.bf16.mxu1 %v14548_v43 }
 0x58a   : > { %9872 = vmatpush1.bf16.msra.mxu0 %v14543_v44  ;;  %9954 = vmatpush1.bf16.msra.mxu1 %v14546_v33  ;;  %v14603_v33 = vld [vmem:[%s19741_s9 + $0x600] ss:$48 sps:$4 sm:$0xff]  }
 0x58b   : > { %9873 = vmatprep.subr.bf16.mxu0 %v14551_v45  ;;  %9955 = vmatprep.subr.bf16.mxu1 %v14554_v47  ;;  %v14606_v45 = vld [vmem:[%s19741_s9 + $0x608] ss:$48 sps:$4 sm:$0xff]  }
 0x58e   : > { %9874 = vmatpush1.bf16.msra.mxu0 %v14549_v49  ;;  %9956 = vmatpush1.bf16.msra.mxu1 %v14552_v50  ;;  %v14611_v49 = vld [vmem:[%s19741_s9 + $0x664] ss:$48 sps:$4 sm:$0xff]   ;;  %v14614_v50 = vld [vmem:[%s19741_s9 + $0x66c] ss:$48 sps:$4 sm:$0xff]  }
 0x58f   : > { %9875 = vmatprep.subr.bf16.mxu0 %v14557_v51  ;;  %9957 = vmatprep.subr.bf16.mxu1 %v14560_v52  ;;  %v14609_v52 = vld [vmem:[%s19741_s9 + $0x660] ss:$48 sps:$4 sm:$0xff]  }
 0x592   : > { %9876 = vmatpush1.bf16.msra.mxu0 %v14555_v54  ;;  %9958 = vmatpush1.bf16.msra.mxu1 %v14558_v48  ;;  %v14612_v54 = vld [vmem:[%s19741_s9 + $0x668] ss:$48 sps:$4 sm:$0xff]   ;;  %v14617_v48 = vld [vmem:[%s19741_s9 + $0x6c4] ss:$48 sps:$4 sm:$0xff]  }
 0x593   : > { %9877 = vmatprep.subr.bf16.mxu0 %v14563_v55  ;;  %9959 = vmatprep.subr.bf16.mxu1 %v14566_v35  ;;  %v14620_v55 = vld [vmem:[%s19741_s9 + $0x6cc] ss:$48 sps:$4 sm:$0xff]   ;;  %v14615_v35 = vld [vmem:[%s19741_s9 + $0x6c0] ss:$48 sps:$4 sm:$0xff]  }
 0x596   : > { %9878 = vmatpush1.bf16.msra.mxu0 %v14561_v56  ;;  %9960 = vmatpush1.bf16.msra.mxu1 %v14564_v57  ;;  %v14618_v56 = vld [vmem:[%s19741_s9 + $0x6c8] ss:$48 sps:$4 sm:$0xff]   ;;  %v14623_v57 = vld [vmem:[%s19741_s9 + $0x724] ss:$48 sps:$4 sm:$0xff]  }
 0x597   : > { %9879 = vmatprep.subr.bf16.mxu0 %v14569_v6  ;;  %9961 = vmatprep.subr.bf16.mxu1 %v14572_v58  ;;  %v14626_v6 = vld [vmem:[%s19741_s9 + $0x72c] ss:$48 sps:$4 sm:$0xff]   ;;  %v14621_v58 = vld [vmem:[%s19741_s9 + $0x720] ss:$48 sps:$4 sm:$0xff]  }
 0x59a   : > { %9880 = vmatpush1.bf16.msra.mxu0 %v14567_v60  ;;  %9962 = vmatpush1.bf16.msra.mxu1 %v14570_v0  ;;  %v14624_v60 = vld [vmem:[%s19741_s9 + $0x728] ss:$48 sps:$4 sm:$0xff]   ;;  %v14629_v0 = vld [vmem:[%s19741_s9 + $0x784] ss:$48 sps:$4 sm:$0xff]  }
 0x59b   : > { %9881 = vmatprep.subr.bf16.mxu0 %v14575_v3  ;;  %9963 = vmatprep.subr.bf16.mxu1 %v14578_v4  ;;  %v14632_v3 = vld [vmem:[%s19741_s9 + $0x78c] ss:$48 sps:$4 sm:$0xff]   ;;  %v14627_v4 = vld [vmem:[%s19741_s9 + $0x780] ss:$48 sps:$4 sm:$0xff]  }
 0x59e   : > { %9882 = vmatpush1.bf16.msra.mxu0 %v14573_v5  ;;  %9964 = vmatpush1.bf16.msra.mxu1 %v14576_v10  ;;  %v14630_v5 = vld [vmem:[%s19741_s9 + $0x788] ss:$48 sps:$4 sm:$0xff]   ;;  %v14635_v10 = vld [vmem:[%s19741_s9 + $0x7e4] ss:$48 sps:$4 sm:$0xff]  }
 0x59f   : > { %9883 = vmatprep.subr.bf16.mxu0 %v14581_v12  ;;  %9965 = vmatprep.subr.bf16.mxu1 %v14584_v13  ;;  %v14638_v12 = vld [vmem:[%s19741_s9 + $0x7ec] ss:$48 sps:$4 sm:$0xff]   ;;  %v14633_v13 = vld [vmem:[%s19741_s9 + $0x7e0] ss:$48 sps:$4 sm:$0xff]  }
 0x5a2   : > { %9884 = vmatpush1.bf16.msra.mxu0 %v14579_v46  ;;  %9966 = vmatpush1.bf16.msra.mxu1 %v14582_v14  ;;  %v14636_v46 = vld [vmem:[%s19741_s9 + $0x7e8] ss:$48 sps:$4 sm:$0xff]   ;;  %v14641_v14 = vld [vmem:[%s19741_s9 + $0x844] ss:$48 sps:$4 sm:$0xff]  }
 0x5a3   : > { %9885 = vmatprep.subr.bf16.mxu0 %v14587_v24  ;;  %9967 = vmatprep.subr.bf16.mxu1 %v14590_v1  ;;  %v14644_v24 = vld [vmem:[%s19741_s9 + $0x84c] ss:$48 sps:$4 sm:$0xff]   ;;  %v14639_v1 = vld [vmem:[%s19741_s9 + $0x840] ss:$48 sps:$4 sm:$0xff]  }
 0x5a6   : > { %9886 = vmatpush1.bf16.msra.mxu0 %v14585_v63  ;;  %9968 = vmatpush1.bf16.msra.mxu1 %v14588_v53  ;;  %v14642_v63 = vld [vmem:[%s19741_s9 + $0x848] ss:$48 sps:$4 sm:$0xff]   ;;  %v14647_v53 = vld [vmem:[%s19741_s9 + $0x8a4] ss:$48 sps:$4 sm:$0xff]  }
 0x5a7   : > { %9887 = vmatprep.subr.bf16.mxu0 %v14593_v15  ;;  %9969 = vmatprep.subr.bf16.mxu1 %v14596_v61  ;;  %v14650_v15 = vld [vmem:[%s19741_s9 + $0x8ac] ss:$48 sps:$4 sm:$0xff]   ;;  %v14645_v61 = vld [vmem:[%s19741_s9 + $0x8a0] ss:$48 sps:$4 sm:$0xff]  }
 0x5aa   : > { %9888 = vmatpush1.bf16.msra.mxu0 %v14591_v16  ;;  %9970 = vmatpush1.bf16.msra.mxu1 %v14594_v17  ;;  %v14648_v16 = vld [vmem:[%s19741_s9 + $0x8a8] ss:$48 sps:$4 sm:$0xff]   ;;  %v14653_v17 = vld [vmem:[%s19741_s9 + $0x904] ss:$48 sps:$4 sm:$0xff]  }
 0x5ab   : > { %9889 = vmatprep.subr.bf16.mxu0 %v14599_v18  ;;  %9971 = vmatprep.subr.bf16.mxu1 %v14602_v19  ;;  %v14656_v18 = vld [vmem:[%s19741_s9 + $0x90c] ss:$48 sps:$4 sm:$0xff]   ;;  %v14651_v19 = vld [vmem:[%s19741_s9 + $0x900] ss:$48 sps:$4 sm:$0xff]  }
 0x5ae   : > { %9890 = vmatpush1.bf16.msra.mxu0 %v14597_v20  ;;  %9972 = vmatpush1.bf16.msra.mxu1 %v14600_v21  ;;  %v14654_v20 = vld [vmem:[%s19741_s9 + $0x908] ss:$48 sps:$4 sm:$0xff]   ;;  %v14659_v21 = vld [vmem:[%s19741_s9 + $0x964] ss:$48 sps:$4 sm:$0xff]  }
 0x5af   : > { %9900 = vmatprep.subr.bf16.mxu0 %v14605_v22  ;;  %9982 = vmatprep.subr.bf16.mxu1 %v14608_v59  ;;  %v14662_v22 = vld [vmem:[%s19741_s9 + $0x96c] ss:$48 sps:$4 sm:$0xff]   ;;  %v14657_v59 = vld [vmem:[%s19741_s9 + $0x960] ss:$48 sps:$4 sm:$0xff]  }
 0x644   : > { %v7394_v26 = vpop.f32.mrb[16].mxu0  ;;  %v18385_v27 = vpop.f32.mrb[8].mxu1 }
 0x645   : > { %v12996_v30 = vadd.f32 %v7394_v26, %v6662_v23  ;;  %v7396_v34 = vpop.f32.mrb[17].mxu0  ;;  %v7478_v8 = vpop.f32.mrb[9].mxu1  ;;  %v14660_v23 = vld [vmem:[%s19741_s9 + $0x968] ss:$48 sps:$4 sm:$0xff]   ;;  %v14663_v26 = vld [vmem:[%s19741_s9 + $0x9c0] ss:$48 sps:$4 sm:$0xff]  }
 0x646   : > { %v12997_v36 = vadd.f32 %v7396_v34, %v6666_v40  ;;  %v12999_v62 = vadd.f32 %v7478_v8, %v6674_v25  ;;  %v7398_v7 = vpop.f32.mrb[18].mxu0  ;;  %v7480_v37 = vpop.f32.mrb[10].mxu1  ;;  %v14665_v40 = vld [vmem:[%s19741_s9 + $0x9c4] ss:$48 sps:$4 sm:$0xff]   ;;  %v14668_v25 = vld [vmem:[%s19741_s9 + $0x9cc] ss:$48 sps:$4 sm:$0xff]  }
 0x647   : > { %v7483_v41 = vmax.f32 %v12996_v30, 0.0  ;;  %v7399_v38 = vpop.f32.mrb[19].mxu0  ;;  %v7481_v39 = vpop.f32.mrb[11].mxu1  ;;  %v14666_v30 = vld [vmem:[%s19741_s9 + $0x9c8] ss:$48 sps:$4 sm:$0xff]  }
 0x648   : > { %v7484_v42 = vmax.f32 %v12997_v36, 0.0  ;;  %v7486_v43 = vmax.f32 %v12999_v62, 0.0  ;;  %v14671_v34 = vld [vmem:[%s19741_s9 + $0xa24] ss:$48 sps:$4 sm:$0xff]   ;;  %v14674_v8 = vld [vmem:[%s19741_s9 + $0xa2c] ss:$48 sps:$4 sm:$0xff]  }
 0x649   : > { %v18395_v47 = vpack.c.bf16 %v7483_v41, %v7483_v41  ;;  %v14669_v36 = vld [vmem:[%s19741_s9 + $0xa20] ss:$48 sps:$4 sm:$0xff]   ;;  %v14672_v62 = vld [vmem:[%s19741_s9 + $0xa28] ss:$48 sps:$4 sm:$0xff]   ;;  %v14677_v7 = vld [vmem:[%s19741_s9 + $0xa84] ss:$48 sps:$4 sm:$0xff]  }
 0x64a   : > { %v18387_v44 = vpack.c.bf16 %v7484_v42, %v7484_v42  ;;  %v18405_v51 = vpack.c.bf16 %v7486_v43, %v7486_v43  ;;  %v14680_v37 = vld [vmem:[%s19741_s9 + $0xa8c] ss:$48 sps:$4 sm:$0xff]   ;;  %v14675_v41 = vld [vmem:[%s19741_s9 + $0xa80] ss:$48 sps:$4 sm:$0xff]   ;;  %v14678_v38 = vld [vmem:[%s19741_s9 + $0xa88] ss:$48 sps:$4 sm:$0xff]  }
 0x64b   : > { %v14683_v39 = vld [vmem:[%s19741_s9 + $0xae4] ss:$48 sps:$4 sm:$0xff]   ;;  %v14686_v42 = vld [vmem:[%s19741_s9 + $0xaec] ss:$48 sps:$4 sm:$0xff]   ;;  %v14681_v43 = vld [vmem:[%s19741_s9 + $0xae0] ss:$48 sps:$4 sm:$0xff]  }
 0x64c   : > { %9891 = vmatprep.mubr.bf16.mxu0 %v18387_v44  ;;  %9973 = vmatprep.mubr.bf16.mxu1 %v18387_v44 }
 0x64d   : > { %9892 = vmatmul.mubr.bf16.vlgmr.msra.gmra.mrb[20].mxu0 %v18395_v47  ;;  %9974 = vmatmul.mubr.bf16.vlgmr.msra.gmra.mrb[12].mxu1 %v18395_v47 }
 0x64e   : > { %9901 = vmatpush1.bf16.msra.mxu0 %v14603_v33  ;;  %9983 = vmatpush1.bf16.msra.mxu1 %v14606_v45  ;;  %v14684_v33 = vld [vmem:[%s19741_s9 + $0xae8] ss:$48 sps:$4 sm:$0xff]   ;;  %v6670_v45 = vrot.slane %v18377_v32, %v15600_v9 }
 0x64f   : > { %9932 = vmatprep.mubr.bf16.mxu0 %v18405_v51  ;;  %10014 = vmatprep.mubr.bf16.mxu1 %v18405_v51  ;;  %v14690_v32 = vld [vmem:[%s19741_s9 + $0xb48] ss:$48 sps:$4 sm:$0xff]  }
 0x650   : > { %9902 = vmatprep.subr.bf16.mxu0 %v14611_v49  ;;  %9984 = vmatprep.subr.bf16.mxu1 %v14614_v50  ;;  %v14689_v49 = vld [vmem:[%s19741_s9 + $0xb44] ss:$48 sps:$4 sm:$0xff]   ;;  %v14692_v50 = vld [vmem:[%s19741_s9 + $0xb4c] ss:$48 sps:$4 sm:$0xff]  }
 0x652   : > { %9903 = vmatpush1.bf16.msra.mxu0 %v14609_v52  ;;  %9985 = vmatpush1.bf16.msra.mxu1 %v14612_v54  ;;  %v14687_v52 = vld [vmem:[%s19741_s9 + $0xb40] ss:$48 sps:$4 sm:$0xff]   ;;  %v12998_v54 = vadd.f32 %v18385_v27, %v6670_v45  ;;  %v14696_v27 = vld [vmem:[%s19741_s9 + $0xba8] ss:$48 sps:$4 sm:$0xff]  }
 0x653   : > { %9904 = vmatprep.subr.bf16.mxu0 %v14617_v48  ;;  %9986 = vmatprep.subr.bf16.mxu1 %v14620_v55  ;;  %v14695_v48 = vld [vmem:[%s19741_s9 + $0xba4] ss:$48 sps:$4 sm:$0xff]   ;;  %v14698_v55 = vld [vmem:[%s19741_s9 + $0xbac] ss:$48 sps:$4 sm:$0xff]   ;;  %v14762_v45 = vld [vmem:[%s19741_s9 + $0x3d8] ss:$48 sps:$4 sm:$0xff]  }
 0x656   : > { %9905 = vmatpush1.bf16.msra.mxu0 %v14615_v35  ;;  %9987 = vmatpush1.bf16.msra.mxu1 %v14618_v56  ;;  %v14693_v35 = vld [vmem:[%s19741_s9 + $0xba0] ss:$48 sps:$4 sm:$0xff]   ;;  %v7485_v56 = vmax.f32 %v12998_v54, 0.0  ;;  %v14773_v54 = vld [vmem:[%s19741_s9 + $0x494] ss:$48 sps:$4 sm:$0xff]  }
 0x657   : > { %9906 = vmatprep.subr.bf16.mxu0 %v14623_v57  ;;  %9988 = vmatprep.subr.bf16.mxu1 %v14626_v6  ;;  %v14701_v57 = vld [vmem:[%s19741_s9 + $0x14] ss:$48 sps:$4 sm:$0xff]   ;;  %v14704_v6 = vld [vmem:[%s19741_s9 + $0x1c] ss:$48 sps:$4 sm:$0xff]  }
 0x65a   : > { %9907 = vmatpush1.bf16.msra.mxu0 %v14621_v58  ;;  %9989 = vmatpush1.bf16.msra.mxu1 %v14624_v60  ;;  %v14699_v58 = vld [vmem:[%s19741_s9 + $0x10] ss:$48 sps:$4 sm:$0xff]   ;;  %v18597_v60 = vpack.c.bf16 %v7485_v56, %v7485_v56  ;;  %v14782_v56 = vld [vmem:[%s19741_s9 + $0x4fc] ss:$48 sps:$4 sm:$0xff]  }
 0x65b   : > { %9908 = vmatprep.subr.bf16.mxu0 %v14629_v0  ;;  %9990 = vmatprep.subr.bf16.mxu1 %v14632_v3  ;;  %v14702_v0 = vld [vmem:[%s19741_s9 + $0x18] ss:$48 sps:$4 sm:$0xff]   ;;  %v14707_v3 = vld [vmem:[%s19741_s9 + $0x74] ss:$48 sps:$4 sm:$0xff]  }
 0x65e   : > { %9909 = vmatpush1.bf16.msra.mxu0 %v14627_v4  ;;  %9991 = vmatpush1.bf16.msra.mxu1 %v14630_v5  ;;  %v14710_v4 = vld [vmem:[%s19741_s9 + $0x7c] ss:$48 sps:$4 sm:$0xff]   ;;  %v14705_v5 = vld [vmem:[%s19741_s9 + $0x70] ss:$48 sps:$4 sm:$0xff]  }
 0x65f   : > { %9910 = vmatprep.subr.bf16.mxu0 %v14635_v10  ;;  %9992 = vmatprep.subr.bf16.mxu1 %v14638_v12  ;;  %v14708_v10 = vld [vmem:[%s19741_s9 + $0x78] ss:$48 sps:$4 sm:$0xff]   ;;  %v14713_v12 = vld [vmem:[%s19741_s9 + $0xd4] ss:$48 sps:$4 sm:$0xff]  }
 0x662   : > { %9911 = vmatpush1.bf16.msra.mxu0 %v14633_v13  ;;  %9993 = vmatpush1.bf16.msra.mxu1 %v14636_v46  ;;  %v14716_v13 = vld [vmem:[%s19741_s9 + $0xdc] ss:$48 sps:$4 sm:$0xff]   ;;  %v14711_v46 = vld [vmem:[%s19741_s9 + $0xd0] ss:$48 sps:$4 sm:$0xff]  }
 0x663   : > { %9912 = vmatprep.subr.bf16.mxu0 %v14641_v14  ;;  %9994 = vmatprep.subr.bf16.mxu1 %v14644_v24  ;;  %v14714_v14 = vld [vmem:[%s19741_s9 + $0xd8] ss:$48 sps:$4 sm:$0xff]   ;;  %v14719_v24 = vld [vmem:[%s19741_s9 + $0x134] ss:$48 sps:$4 sm:$0xff]  }
 0x666   : > { %9913 = vmatpush1.bf16.msra.mxu0 %v14639_v1  ;;  %9995 = vmatpush1.bf16.msra.mxu1 %v14642_v63  ;;  %v14722_v1 = vld [vmem:[%s19741_s9 + $0x13c] ss:$48 sps:$4 sm:$0xff]   ;;  %v14717_v63 = vld [vmem:[%s19741_s9 + $0x130] ss:$48 sps:$4 sm:$0xff]  }
 0x667   : > { %9914 = vmatprep.subr.bf16.mxu0 %v14647_v53  ;;  %9996 = vmatprep.subr.bf16.mxu1 %v14650_v15  ;;  %v14720_v53 = vld [vmem:[%s19741_s9 + $0x138] ss:$48 sps:$4 sm:$0xff]   ;;  %v14725_v15 = vld [vmem:[%s19741_s9 + $0x194] ss:$48 sps:$4 sm:$0xff]  }
 0x66a   : > { %9915 = vmatpush1.bf16.msra.mxu0 %v14645_v61  ;;  %9997 = vmatpush1.bf16.msra.mxu1 %v14648_v16  ;;  %v14728_v61 = vld [vmem:[%s19741_s9 + $0x19c] ss:$48 sps:$4 sm:$0xff]   ;;  %v14723_v16 = vld [vmem:[%s19741_s9 + $0x190] ss:$48 sps:$4 sm:$0xff]  }
 0x66b   : > { %9916 = vmatprep.subr.bf16.mxu0 %v14653_v17  ;;  %9998 = vmatprep.subr.bf16.mxu1 %v14656_v18  ;;  %v14726_v17 = vld [vmem:[%s19741_s9 + $0x198] ss:$48 sps:$4 sm:$0xff]   ;;  %v14731_v18 = vld [vmem:[%s19741_s9 + $0x1f4] ss:$48 sps:$4 sm:$0xff]  }
 0x66e   : > { %9917 = vmatpush1.bf16.msra.mxu0 %v14651_v19  ;;  %9999 = vmatpush1.bf16.msra.mxu1 %v14654_v20  ;;  %v14734_v19 = vld [vmem:[%s19741_s9 + $0x1fc] ss:$48 sps:$4 sm:$0xff]   ;;  %v14729_v20 = vld [vmem:[%s19741_s9 + $0x1f0] ss:$48 sps:$4 sm:$0xff]  }
 0x66f   : > { %9918 = vmatprep.subr.bf16.mxu0 %v14659_v21  ;;  %10000 = vmatprep.subr.bf16.mxu1 %v14662_v22  ;;  %v14732_v21 = vld [vmem:[%s19741_s9 + $0x1f8] ss:$48 sps:$4 sm:$0xff]   ;;  %v14737_v22 = vld [vmem:[%s19741_s9 + $0x254] ss:$48 sps:$4 sm:$0xff]  }
 0x672   : > { %9919 = vmatpush1.bf16.msra.mxu0 %v14657_v59  ;;  %10001 = vmatpush1.bf16.msra.mxu1 %v14660_v23  ;;  %v14740_v59 = vld [vmem:[%s19741_s9 + $0x25c] ss:$48 sps:$4 sm:$0xff]   ;;  %v14735_v23 = vld [vmem:[%s19741_s9 + $0x250] ss:$48 sps:$4 sm:$0xff]  }
 0x673   : > { %9920 = vmatprep.subr.bf16.mxu0 %v14665_v40  ;;  %10002 = vmatprep.subr.bf16.mxu1 %v14668_v25  ;;  %v14738_v40 = vld [vmem:[%s19741_s9 + $0x258] ss:$48 sps:$4 sm:$0xff]   ;;  %v14743_v25 = vld [vmem:[%s19741_s9 + $0x2b4] ss:$48 sps:$4 sm:$0xff]  }
 0x676   : > { %9921 = vmatpush1.bf16.msra.mxu0 %v14663_v26  ;;  %10003 = vmatpush1.bf16.msra.mxu1 %v14666_v30  ;;  %v14746_v26 = vld [vmem:[%s19741_s9 + $0x2bc] ss:$48 sps:$4 sm:$0xff]   ;;  %v14741_v30 = vld [vmem:[%s19741_s9 + $0x2b0] ss:$48 sps:$4 sm:$0xff]  }
 0x677   : > { %9922 = vmatprep.subr.bf16.mxu0 %v14671_v34  ;;  %10004 = vmatprep.subr.bf16.mxu1 %v14674_v8  ;;  %v14744_v34 = vld [vmem:[%s19741_s9 + $0x2b8] ss:$48 sps:$4 sm:$0xff]   ;;  %v14749_v8 = vld [vmem:[%s19741_s9 + $0x314] ss:$48 sps:$4 sm:$0xff]  }
 0x67a   : > { %9923 = vmatpush1.bf16.msra.mxu0 %v14669_v36  ;;  %10005 = vmatpush1.bf16.msra.mxu1 %v14672_v62  ;;  %v14752_v36 = vld [vmem:[%s19741_s9 + $0x31c] ss:$48 sps:$4 sm:$0xff]   ;;  %v14747_v62 = vld [vmem:[%s19741_s9 + $0x310] ss:$48 sps:$4 sm:$0xff]  }
 0x67b   : > { %9924 = vmatprep.subr.bf16.mxu0 %v14677_v7  ;;  %10006 = vmatprep.subr.bf16.mxu1 %v14680_v37  ;;  %v14750_v7 = vld [vmem:[%s19741_s9 + $0x318] ss:$48 sps:$4 sm:$0xff]   ;;  %v14755_v37 = vld [vmem:[%s19741_s9 + $0x374] ss:$48 sps:$4 sm:$0xff]  }
 0x67e   : > { %9925 = vmatpush1.bf16.msra.mxu0 %v14675_v41  ;;  %10007 = vmatpush1.bf16.msra.mxu1 %v14678_v38  ;;  %v14758_v41 = vld [vmem:[%s19741_s9 + $0x37c] ss:$48 sps:$4 sm:$0xff]   ;;  %v14753_v38 = vld [vmem:[%s19741_s9 + $0x370] ss:$48 sps:$4 sm:$0xff]  }
 0x67f   : > { %9926 = vmatprep.subr.bf16.mxu0 %v14683_v39  ;;  %10008 = vmatprep.subr.bf16.mxu1 %v14686_v42  ;;  %v14756_v39 = vld [vmem:[%s19741_s9 + $0x378] ss:$48 sps:$4 sm:$0xff]   ;;  %v14761_v42 = vld [vmem:[%s19741_s9 + $0x3d4] ss:$48 sps:$4 sm:$0xff]  }
 0x682   : > { %9927 = vmatpush1.bf16.msra.mxu0 %v14681_v43  ;;  %10009 = vmatpush1.bf16.msra.mxu1 %v14684_v33  ;;  %v14764_v43 = vld [vmem:[%s19741_s9 + $0x3dc] ss:$48 sps:$4 sm:$0xff]   ;;  %v14759_v33 = vld [vmem:[%s19741_s9 + $0x3d0] ss:$48 sps:$4 sm:$0xff]  }
 0x683   : > { %9928 = vmatprep.subr.bf16.mxu0 %v14689_v49  ;;  %10010 = vmatprep.subr.bf16.mxu1 %v14692_v50  ;;  %v14767_v49 = vld [vmem:[%s19741_s9 + $0x434] ss:$48 sps:$4 sm:$0xff]   ;;  %v14770_v50 = vld [vmem:[%s19741_s9 + $0x43c] ss:$48 sps:$4 sm:$0xff]  }
 0x686   : > { %9929 = vmatpush1.bf16.msra.mxu0 %v14687_v52  ;;  %10011 = vmatpush1.bf16.msra.mxu1 %v14690_v32  ;;  %v14765_v52 = vld [vmem:[%s19741_s9 + $0x430] ss:$48 sps:$4 sm:$0xff]   ;;  %v14768_v32 = vld [vmem:[%s19741_s9 + $0x438] ss:$48 sps:$4 sm:$0xff]  }
 0x687   : > { %9930 = vmatprep.subr.bf16.mxu0 %v14695_v48  ;;  %10012 = vmatprep.subr.bf16.mxu1 %v14698_v55  ;;  %v14776_v48 = vld [vmem:[%s19741_s9 + $0x49c] ss:$48 sps:$4 sm:$0xff]   ;;  %v14771_v55 = vld [vmem:[%s19741_s9 + $0x490] ss:$48 sps:$4 sm:$0xff]  }
 0x68a   : > { %9931 = vmatpush1.bf16.msra.mxu0 %v14693_v35  ;;  %10013 = vmatpush1.bf16.msra.mxu1 %v14696_v27  ;;  %v14774_v35 = vld [vmem:[%s19741_s9 + $0x498] ss:$48 sps:$4 sm:$0xff]   ;;  %v14779_v27 = vld [vmem:[%s19741_s9 + $0x4f4] ss:$48 sps:$4 sm:$0xff]  }
 0x68b   : > { %10023 = vmatprep.subr.bf16.mxu0 %v14701_v57  ;;  %10105 = vmatprep.subr.bf16.mxu1 %v14704_v6  ;;  %v14777_v57 = vld [vmem:[%s19741_s9 + $0x4f0] ss:$48 sps:$4 sm:$0xff]   ;;  %v14780_v6 = vld [vmem:[%s19741_s9 + $0x4f8] ss:$48 sps:$4 sm:$0xff]  }
 0x68d   : > { %9933 = vmatmul.mubr.bf16.vlgmr.msra.gmra.mrb[20].mxu0 %v18597_v60  ;;  %10015 = vmatmul.mubr.bf16.vlgmr.msra.gmra.mrb[12].mxu1 %v18597_v60 }
 0x68e   : > { %10024 = vmatpush1.bf16.msra.mxu0 %v14699_v58  ;;  %10055 = vmatprep.mubr.bf16.mxu0 %v18387_v44  ;;  %v14785_v58 = vld [vmem:[%s19741_s9 + $0x554] ss:$48 sps:$4 sm:$0xff]  }
 0x68f   : > { %10106 = vmatpush1.bf16.msra.mxu1 %v14702_v0  ;;  %10137 = vmatprep.mubr.bf16.mxu1 %v18387_v44  ;;  %v14788_v0 = vld [vmem:[%s19741_s9 + $0x55c] ss:$48 sps:$4 sm:$0xff]  }
 0x690   : > { %10025 = vmatprep.subr.bf16.mxu0 %v14707_v3  ;;  %10107 = vmatprep.subr.bf16.mxu1 %v14710_v4  ;;  %v14783_v3 = vld [vmem:[%s19741_s9 + $0x550] ss:$48 sps:$4 sm:$0xff]   ;;  %v14786_v4 = vld [vmem:[%s19741_s9 + $0x558] ss:$48 sps:$4 sm:$0xff]  }
 0x692   : > { %10026 = vmatpush1.bf16.msra.mxu0 %v14705_v5  ;;  %v14791_v5 = vld [vmem:[%s19741_s9 + $0x5b4] ss:$48 sps:$4 sm:$0xff]  }
 0x693   : > { %10108 = vmatpush1.bf16.msra.mxu1 %v14708_v10  ;;  %10027 = vmatprep.subr.bf16.mxu0 %v14713_v12  ;;  %v14794_v10 = vld [vmem:[%s19741_s9 + $0x5bc] ss:$48 sps:$4 sm:$0xff]   ;;  %v14789_v12 = vld [vmem:[%s19741_s9 + $0x5b0] ss:$48 sps:$4 sm:$0xff]  }
 0x694   : > { %10109 = vmatprep.subr.bf16.mxu1 %v14716_v13  ;;  %v14792_v13 = vld [vmem:[%s19741_s9 + $0x5b8] ss:$48 sps:$4 sm:$0xff]  }
 0x696   : > { %10028 = vmatpush1.bf16.msra.mxu0 %v14711_v46  ;;  %v14797_v46 = vld [vmem:[%s19741_s9 + $0x614] ss:$48 sps:$4 sm:$0xff]  }
 0x697   : > { %10110 = vmatpush1.bf16.msra.mxu1 %v14714_v14  ;;  %10029 = vmatprep.subr.bf16.mxu0 %v14719_v24  ;;  %v14800_v14 = vld [vmem:[%s19741_s9 + $0x61c] ss:$48 sps:$4 sm:$0xff]   ;;  %v14795_v24 = vld [vmem:[%s19741_s9 + $0x610] ss:$48 sps:$4 sm:$0xff]  }
 0x698   : > { %10111 = vmatprep.subr.bf16.mxu1 %v14722_v1  ;;  %v14798_v1 = vld [vmem:[%s19741_s9 + $0x618] ss:$48 sps:$4 sm:$0xff]  }
 0x69a   : > { %10030 = vmatpush1.bf16.msra.mxu0 %v14717_v63  ;;  %v14803_v63 = vld [vmem:[%s19741_s9 + $0x674] ss:$48 sps:$4 sm:$0xff]  }
 0x69b   : > { %10112 = vmatpush1.bf16.msra.mxu1 %v14720_v53  ;;  %10031 = vmatprep.subr.bf16.mxu0 %v14725_v15  ;;  %v14806_v53 = vld [vmem:[%s19741_s9 + $0x67c] ss:$48 sps:$4 sm:$0xff]   ;;  %v14801_v15 = vld [vmem:[%s19741_s9 + $0x670] ss:$48 sps:$4 sm:$0xff]  }
 0x69c   : > { %10113 = vmatprep.subr.bf16.mxu1 %v14728_v61  ;;  %v14804_v61 = vld [vmem:[%s19741_s9 + $0x678] ss:$48 sps:$4 sm:$0xff]  }
 0x69e   : > { %10032 = vmatpush1.bf16.msra.mxu0 %v14723_v16  ;;  %v14809_v16 = vld [vmem:[%s19741_s9 + $0x6d4] ss:$48 sps:$4 sm:$0xff]  }
 0x69f   : > { %10114 = vmatpush1.bf16.msra.mxu1 %v14726_v17  ;;  %10033 = vmatprep.subr.bf16.mxu0 %v14731_v18  ;;  %v14812_v17 = vld [vmem:[%s19741_s9 + $0x6dc] ss:$48 sps:$4 sm:$0xff]   ;;  %v14807_v18 = vld [vmem:[%s19741_s9 + $0x6d0] ss:$48 sps:$4 sm:$0xff]  }
 0x6a0   : > { %10115 = vmatprep.subr.bf16.mxu1 %v14734_v19  ;;  %v14810_v19 = vld [vmem:[%s19741_s9 + $0x6d8] ss:$48 sps:$4 sm:$0xff]  }
 0x6a2   : > { %10034 = vmatpush1.bf16.msra.mxu0 %v14729_v20  ;;  %v14815_v20 = vld [vmem:[%s19741_s9 + $0x734] ss:$48 sps:$4 sm:$0xff]  }
 0x6a3   : > { %10116 = vmatpush1.bf16.msra.mxu1 %v14732_v21  ;;  %10035 = vmatprep.subr.bf16.mxu0 %v14737_v22  ;;  %v14818_v21 = vld [vmem:[%s19741_s9 + $0x73c] ss:$48 sps:$4 sm:$0xff]   ;;  %v14813_v22 = vld [vmem:[%s19741_s9 + $0x730] ss:$48 sps:$4 sm:$0xff]  }
 0x6a4   : > { %10117 = vmatprep.subr.bf16.mxu1 %v14740_v59  ;;  %v14816_v59 = vld [vmem:[%s19741_s9 + $0x738] ss:$48 sps:$4 sm:$0xff]  }
 0x6a6   : > { %10036 = vmatpush1.bf16.msra.mxu0 %v14735_v23  ;;  %v14821_v23 = vld [vmem:[%s19741_s9 + $0x794] ss:$48 sps:$4 sm:$0xff]  }
 0x6a7   : > { %10118 = vmatpush1.bf16.msra.mxu1 %v14738_v40  ;;  %10037 = vmatprep.subr.bf16.mxu0 %v14743_v25  ;;  %v14824_v40 = vld [vmem:[%s19741_s9 + $0x79c] ss:$48 sps:$4 sm:$0xff]   ;;  %v14819_v25 = vld [vmem:[%s19741_s9 + $0x790] ss:$48 sps:$4 sm:$0xff]  }
 0x6a8   : > { %10119 = vmatprep.subr.bf16.mxu1 %v14746_v26  ;;  %v14822_v26 = vld [vmem:[%s19741_s9 + $0x798] ss:$48 sps:$4 sm:$0xff]  }
 0x6aa   : > { %10038 = vmatpush1.bf16.msra.mxu0 %v14741_v30  ;;  %v14827_v30 = vld [vmem:[%s19741_s9 + $0x7f4] ss:$48 sps:$4 sm:$0xff]  }
 0x6ab   : > { %10120 = vmatpush1.bf16.msra.mxu1 %v14744_v34  ;;  %10039 = vmatprep.subr.bf16.mxu0 %v14749_v8  ;;  %v14830_v34 = vld [vmem:[%s19741_s9 + $0x7fc] ss:$48 sps:$4 sm:$0xff]   ;;  %v14825_v8 = vld [vmem:[%s19741_s9 + $0x7f0] ss:$48 sps:$4 sm:$0xff]  }
 0x6ac   : > { %10121 = vmatprep.subr.bf16.mxu1 %v14752_v36  ;;  %v14828_v36 = vld [vmem:[%s19741_s9 + $0x7f8] ss:$48 sps:$4 sm:$0xff]  }
 0x6ae   : > { %10040 = vmatpush1.bf16.msra.mxu0 %v14747_v62  ;;  %v14833_v62 = vld [vmem:[%s19741_s9 + $0x854] ss:$48 sps:$4 sm:$0xff]  }
 0x6af   : > { %10122 = vmatpush1.bf16.msra.mxu1 %v14750_v7  ;;  %10041 = vmatprep.subr.bf16.mxu0 %v14755_v37  ;;  %v14836_v7 = vld [vmem:[%s19741_s9 + $0x85c] ss:$48 sps:$4 sm:$0xff]   ;;  %v14831_v37 = vld [vmem:[%s19741_s9 + $0x850] ss:$48 sps:$4 sm:$0xff]  }
 0x6b0   : > { %10123 = vmatprep.subr.bf16.mxu1 %v14758_v41  ;;  %v14834_v41 = vld [vmem:[%s19741_s9 + $0x858] ss:$48 sps:$4 sm:$0xff]  }
 0x6b2   : > { %10042 = vmatpush1.bf16.msra.mxu0 %v14753_v38  ;;  %v14839_v38 = vld [vmem:[%s19741_s9 + $0x8b4] ss:$48 sps:$4 sm:$0xff]  }
 0x6b3   : > { %10124 = vmatpush1.bf16.msra.mxu1 %v14756_v39  ;;  %10043 = vmatprep.subr.bf16.mxu0 %v14761_v42  ;;  %v14842_v39 = vld [vmem:[%s19741_s9 + $0x8bc] ss:$48 sps:$4 sm:$0xff]   ;;  %v14837_v42 = vld [vmem:[%s19741_s9 + $0x8b0] ss:$48 sps:$4 sm:$0xff]  }
 0x6b4   : > { %10125 = vmatprep.subr.bf16.mxu1 %v14764_v43  ;;  %v14840_v43 = vld [vmem:[%s19741_s9 + $0x8b8] ss:$48 sps:$4 sm:$0xff]  }
 0x6b6   : > { %10044 = vmatpush1.bf16.msra.mxu0 %v14759_v33  ;;  %v14845_v33 = vld [vmem:[%s19741_s9 + $0x914] ss:$48 sps:$4 sm:$0xff]  }
 0x6b7   : > { %10126 = vmatpush1.bf16.msra.mxu1 %v14762_v45  ;;  %10045 = vmatprep.subr.bf16.mxu0 %v14767_v49  ;;  %v14848_v45 = vld [vmem:[%s19741_s9 + $0x91c] ss:$48 sps:$4 sm:$0xff]   ;;  %v14843_v49 = vld [vmem:[%s19741_s9 + $0x910] ss:$48 sps:$4 sm:$0xff]  }
 0x6b8   : > { %10127 = vmatprep.subr.bf16.mxu1 %v14770_v50  ;;  %v14846_v50 = vld [vmem:[%s19741_s9 + $0x918] ss:$48 sps:$4 sm:$0xff]  }
 0x6ba   : > { %10046 = vmatpush1.bf16.msra.mxu0 %v14765_v52  ;;  %v14851_v52 = vld [vmem:[%s19741_s9 + $0x974] ss:$48 sps:$4 sm:$0xff]  }
 0x6bb   : > { %10128 = vmatpush1.bf16.msra.mxu1 %v14768_v32  ;;  %10047 = vmatprep.subr.bf16.mxu0 %v14773_v54  ;;  %v14854_v32 = vld [vmem:[%s19741_s9 + $0x97c] ss:$48 sps:$4 sm:$0xff]   ;;  %v14849_v54 = vld [vmem:[%s19741_s9 + $0x970] ss:$48 sps:$4 sm:$0xff]  }
 0x6bc   : > { %10129 = vmatprep.subr.bf16.mxu1 %v14776_v48  ;;  %v14852_v48 = vld [vmem:[%s19741_s9 + $0x978] ss:$48 sps:$4 sm:$0xff]  }
 0x6be   : > { %10048 = vmatpush1.bf16.msra.mxu0 %v14771_v55  ;;  %v14857_v55 = vld [vmem:[%s19741_s9 + $0x9d4] ss:$48 sps:$4 sm:$0xff]  }
 0x6bf   : > { %10130 = vmatpush1.bf16.msra.mxu1 %v14774_v35  ;;  %10049 = vmatprep.subr.bf16.mxu0 %v14779_v27  ;;  %v14860_v35 = vld [vmem:[%s19741_s9 + $0x9dc] ss:$48 sps:$4 sm:$0xff]   ;;  %v14855_v27 = vld [vmem:[%s19741_s9 + $0x9d0] ss:$48 sps:$4 sm:$0xff]  }
 0x6c0   : > { %10131 = vmatprep.subr.bf16.mxu1 %v14782_v56  ;;  %v14858_v56 = vld [vmem:[%s19741_s9 + $0x9d8] ss:$48 sps:$4 sm:$0xff]  }
 0x6c2   : > { %10050 = vmatpush1.bf16.msra.mxu0 %v14777_v57  ;;  %v14863_v57 = vld [vmem:[%s19741_s9 + $0xa34] ss:$48 sps:$4 sm:$0xff]  }
 0x6c3   : > { %10132 = vmatpush1.bf16.msra.mxu1 %v14780_v6  ;;  %10051 = vmatprep.subr.bf16.mxu0 %v14785_v58  ;;  %v14866_v6 = vld [vmem:[%s19741_s9 + $0xa3c] ss:$48 sps:$4 sm:$0xff]   ;;  %v14861_v58 = vld [vmem:[%s19741_s9 + $0xa30] ss:$48 sps:$4 sm:$0xff]  }
 0x6c4   : > { %10133 = vmatprep.subr.bf16.mxu1 %v14788_v0  ;;  %v14864_v0 = vld [vmem:[%s19741_s9 + $0xa38] ss:$48 sps:$4 sm:$0xff]  }
 0x6c6   : > { %10052 = vmatpush1.bf16.msra.mxu0 %v14783_v3  ;;  %v14869_v3 = vld [vmem:[%s19741_s9 + $0xa94] ss:$48 sps:$4 sm:$0xff]  }
 0x6c7   : > { %10134 = vmatpush1.bf16.msra.mxu1 %v14786_v4  ;;  %10053 = vmatprep.subr.bf16.mxu0 %v14791_v5  ;;  %v14872_v4 = vld [vmem:[%s19741_s9 + $0xa9c] ss:$48 sps:$4 sm:$0xff]   ;;  %v14867_v5 = vld [vmem:[%s19741_s9 + $0xa90] ss:$48 sps:$4 sm:$0xff]  }
 0x6c8   : > { %10135 = vmatprep.subr.bf16.mxu1 %v14794_v10  ;;  %v14870_v10 = vld [vmem:[%s19741_s9 + $0xa98] ss:$48 sps:$4 sm:$0xff]  }
 0x6ca   : > { %10054 = vmatpush1.bf16.msra.mxu0 %v14789_v12  ;;  %v14875_v12 = vld [vmem:[%s19741_s9 + $0xaf4] ss:$48 sps:$4 sm:$0xff]  }
 0x6cb   : > { %10136 = vmatpush1.bf16.msra.mxu1 %v14792_v13  ;;  %10064 = vmatprep.subr.bf16.mxu0 %v14797_v46  ;;  %v14878_v13 = vld [vmem:[%s19741_s9 + $0xafc] ss:$48 sps:$4 sm:$0xff]   ;;  %v14873_v46 = vld [vmem:[%s19741_s9 + $0xaf0] ss:$48 sps:$4 sm:$0xff]  }
 0x6cc   : > { %10146 = vmatprep.subr.bf16.mxu1 %v14800_v14  ;;  %v14876_v14 = vld [vmem:[%s19741_s9 + $0xaf8] ss:$48 sps:$4 sm:$0xff]  }
 0x6cd   : > { %10056 = vmatmul.mubr.bf16.vlgmr.msra.gmra.mrb[24].mxu0 %v18395_v47 }
 0x6ce   : > { %10138 = vmatmul.mubr.bf16.vlgmr.msra.gmra.mrb[16].mxu1 %v18395_v47  ;;  %10065 = vmatpush1.bf16.msra.mxu0 %v14795_v24  ;;  %v14881_v24 = vld [vmem:[%s19741_s9 + $0xb54] ss:$48 sps:$4 sm:$0xff]  }
 0x6cf   : > { %10096 = vmatprep.mubr.bf16.mxu0 %v18405_v51  ;;  %10147 = vmatpush1.bf16.msra.mxu1 %v14798_v1  ;;  %v14884_v1 = vld [vmem:[%s19741_s9 + $0xb5c] ss:$48 sps:$4 sm:$0xff]  }
 0x6d0   : > { %10178 = vmatprep.mubr.bf16.mxu1 %v18405_v51  ;;  %10066 = vmatprep.subr.bf16.mxu0 %v14803_v63  ;;  %v14879_v63 = vld [vmem:[%s19741_s9 + $0xb50] ss:$48 sps:$4 sm:$0xff]  }
 0x6d1   : > { %10148 = vmatprep.subr.bf16.mxu1 %v14806_v53  ;;  %v14882_v53 = vld [vmem:[%s19741_s9 + $0xb58] ss:$48 sps:$4 sm:$0xff]  }
 0x6d2   : > { %10067 = vmatpush1.bf16.msra.mxu0 %v14801_v15  ;;  %v14887_v15 = vld [vmem:[%s19741_s9 + $0xbb4] ss:$48 sps:$4 sm:$0xff]  }
 0x6d3   : > { %10149 = vmatpush1.bf16.msra.mxu1 %v14804_v61  ;;  %10068 = vmatprep.subr.bf16.mxu0 %v14809_v16  ;;  %v14890_v61 = vld [vmem:[%s19741_s9 + $0xbbc] ss:$48 sps:$4 sm:$0xff]   ;;  %v14885_v16 = vld [vmem:[%s19741_s9 + $0xbb0] ss:$48 sps:$4 sm:$0xff]  }
 0x6d4   : > { %10150 = vmatprep.subr.bf16.mxu1 %v14812_v17  ;;  %v14888_v17 = vld [vmem:[%s19741_s9 + $0xbb8] ss:$48 sps:$4 sm:$0xff]  }
 0x6d6   : > { %10069 = vmatpush1.bf16.msra.mxu0 %v14807_v18  ;;  %v14893_v18 = vld [vmem:[%s19741_s9 + $0x24] ss:$48 sps:$4 sm:$0xff]  }
 0x6d7   : > { %10151 = vmatpush1.bf16.msra.mxu1 %v14810_v19  ;;  %10070 = vmatprep.subr.bf16.mxu0 %v14815_v20  ;;  %v14896_v19 = vld [vmem:[%s19741_s9 + $0x2c] ss:$48 sps:$4 sm:$0xff]   ;;  %v14891_v20 = vld [vmem:[%s19741_s9 + $0x20] ss:$48 sps:$4 sm:$0xff]  }
 0x6d8   : > { %10152 = vmatprep.subr.bf16.mxu1 %v14818_v21  ;;  %v14894_v21 = vld [vmem:[%s19741_s9 + $0x28] ss:$48 sps:$4 sm:$0xff]  }
 0x6da   : > { %10071 = vmatpush1.bf16.msra.mxu0 %v14813_v22  ;;  %v14899_v22 = vld [vmem:[%s19741_s9 + $0x84] ss:$48 sps:$4 sm:$0xff]  }
 0x6db   : > { %10153 = vmatpush1.bf16.msra.mxu1 %v14816_v59  ;;  %10072 = vmatprep.subr.bf16.mxu0 %v14821_v23  ;;  %v14902_v59 = vld [vmem:[%s19741_s9 + $0x8c] ss:$48 sps:$4 sm:$0xff]   ;;  %v14897_v23 = vld [vmem:[%s19741_s9 + $0x80] ss:$48 sps:$4 sm:$0xff]  }
 0x6dc   : > { %10154 = vmatprep.subr.bf16.mxu1 %v14824_v40  ;;  %v14900_v40 = vld [vmem:[%s19741_s9 + $0x88] ss:$48 sps:$4 sm:$0xff]  }
 0x6de   : > { %10073 = vmatpush1.bf16.msra.mxu0 %v14819_v25  ;;  %v14905_v25 = vld [vmem:[%s19741_s9 + $0xe4] ss:$48 sps:$4 sm:$0xff]  }
 0x6df   : > { %10155 = vmatpush1.bf16.msra.mxu1 %v14822_v26  ;;  %10074 = vmatprep.subr.bf16.mxu0 %v14827_v30  ;;  %v14908_v26 = vld [vmem:[%s19741_s9 + $0xec] ss:$48 sps:$4 sm:$0xff]   ;;  %v14903_v30 = vld [vmem:[%s19741_s9 + $0xe0] ss:$48 sps:$4 sm:$0xff]  }
 0x6e0   : > { %10156 = vmatprep.subr.bf16.mxu1 %v14830_v34  ;;  %v14906_v34 = vld [vmem:[%s19741_s9 + $0xe8] ss:$48 sps:$4 sm:$0xff]  }
 0x6e2   : > { %10075 = vmatpush1.bf16.msra.mxu0 %v14825_v8  ;;  %v14914_v8 = vld [vmem:[%s19741_s9 + $0x14c] ss:$48 sps:$4 sm:$0xff]  }
 0x6e3   : > { %10157 = vmatpush1.bf16.msra.mxu1 %v14828_v36  ;;  %10076 = vmatprep.subr.bf16.mxu0 %v14833_v62  ;;  %v14909_v36 = vld [vmem:[%s19741_s9 + $0x140] ss:$48 sps:$4 sm:$0xff]   ;;  %v14912_v62 = vld [vmem:[%s19741_s9 + $0x148] ss:$48 sps:$4 sm:$0xff]  }
 0x6e4   : > { %10158 = vmatprep.subr.bf16.mxu1 %v14836_v7  ;;  %v14917_v7 = vld [vmem:[%s19741_s9 + $0x1a4] ss:$48 sps:$4 sm:$0xff]  }
 0x6e6   : > { %10077 = vmatpush1.bf16.msra.mxu0 %v14831_v37  ;;  %v14920_v37 = vld [vmem:[%s19741_s9 + $0x1ac] ss:$48 sps:$4 sm:$0xff]  }
 0x6e7   : > { %10159 = vmatpush1.bf16.msra.mxu1 %v14834_v41  ;;  %10078 = vmatprep.subr.bf16.mxu0 %v14839_v38  ;;  %v14915_v41 = vld [vmem:[%s19741_s9 + $0x1a0] ss:$48 sps:$4 sm:$0xff]   ;;  %v14918_v38 = vld [vmem:[%s19741_s9 + $0x1a8] ss:$48 sps:$4 sm:$0xff]  }
 0x6e8   : > { %10160 = vmatprep.subr.bf16.mxu1 %v14842_v39  ;;  %v14923_v39 = vld [vmem:[%s19741_s9 + $0x204] ss:$48 sps:$4 sm:$0xff]  }
 0x6ea   : > { %10079 = vmatpush1.bf16.msra.mxu0 %v14837_v42  ;;  %v14926_v42 = vld [vmem:[%s19741_s9 + $0x20c] ss:$48 sps:$4 sm:$0xff]  }
 0x6eb   : > { %10161 = vmatpush1.bf16.msra.mxu1 %v14840_v43  ;;  %10080 = vmatprep.subr.bf16.mxu0 %v14845_v33  ;;  %v14921_v43 = vld [vmem:[%s19741_s9 + $0x200] ss:$48 sps:$4 sm:$0xff]   ;;  %v14924_v33 = vld [vmem:[%s19741_s9 + $0x208] ss:$48 sps:$4 sm:$0xff]  }
 0x6ec   : > { %10162 = vmatprep.subr.bf16.mxu1 %v14848_v45  ;;  %v14929_v45 = vld [vmem:[%s19741_s9 + $0x264] ss:$48 sps:$4 sm:$0xff]  }
 0x6ee   : > { %10081 = vmatpush1.bf16.msra.mxu0 %v14843_v49  ;;  %v14932_v49 = vld [vmem:[%s19741_s9 + $0x26c] ss:$48 sps:$4 sm:$0xff]  }
 0x6ef   : > { %10163 = vmatpush1.bf16.msra.mxu1 %v14846_v50  ;;  %10082 = vmatprep.subr.bf16.mxu0 %v14851_v52  ;;  %v14927_v50 = vld [vmem:[%s19741_s9 + $0x260] ss:$48 sps:$4 sm:$0xff]   ;;  %v14930_v52 = vld [vmem:[%s19741_s9 + $0x268] ss:$48 sps:$4 sm:$0xff]  }
 0x6f0   : > { %10164 = vmatprep.subr.bf16.mxu1 %v14854_v32  ;;  %v14935_v32 = vld [vmem:[%s19741_s9 + $0x2c4] ss:$48 sps:$4 sm:$0xff]  }
 0x6f2   : > { %10083 = vmatpush1.bf16.msra.mxu0 %v14849_v54  ;;  %v14938_v54 = vld [vmem:[%s19741_s9 + $0x2cc] ss:$48 sps:$4 sm:$0xff]  }
 0x6f3   : > { %10165 = vmatpush1.bf16.msra.mxu1 %v14852_v48  ;;  %10084 = vmatprep.subr.bf16.mxu0 %v14857_v55  ;;  %v14933_v48 = vld [vmem:[%s19741_s9 + $0x2c0] ss:$48 sps:$4 sm:$0xff]   ;;  %v14936_v55 = vld [vmem:[%s19741_s9 + $0x2c8] ss:$48 sps:$4 sm:$0xff]  }
 0x6f4   : > { %10166 = vmatprep.subr.bf16.mxu1 %v14860_v35  ;;  %v14941_v35 = vld [vmem:[%s19741_s9 + $0x324] ss:$48 sps:$4 sm:$0xff]  }
 0x6f6   : > { %10085 = vmatpush1.bf16.msra.mxu0 %v14855_v27  ;;  %v14944_v27 = vld [vmem:[%s19741_s9 + $0x32c] ss:$48 sps:$4 sm:$0xff]  }
 0x6f7   : > { %10167 = vmatpush1.bf16.msra.mxu1 %v14858_v56  ;;  %10086 = vmatprep.subr.bf16.mxu0 %v14863_v57  ;;  %v14939_v56 = vld [vmem:[%s19741_s9 + $0x320] ss:$48 sps:$4 sm:$0xff]   ;;  %v14942_v57 = vld [vmem:[%s19741_s9 + $0x328] ss:$48 sps:$4 sm:$0xff]  }
 0x6f8   : > { %10168 = vmatprep.subr.bf16.mxu1 %v14866_v6  ;;  %v14947_v6 = vld [vmem:[%s19741_s9 + $0x384] ss:$48 sps:$4 sm:$0xff]  }
 0x6fa   : > { %10087 = vmatpush1.bf16.msra.mxu0 %v14861_v58  ;;  %v14950_v58 = vld [vmem:[%s19741_s9 + $0x38c] ss:$48 sps:$4 sm:$0xff]  }
 0x6fb   : > { %10169 = vmatpush1.bf16.msra.mxu1 %v14864_v0  ;;  %10088 = vmatprep.subr.bf16.mxu0 %v14869_v3  ;;  %v14945_v0 = vld [vmem:[%s19741_s9 + $0x380] ss:$48 sps:$4 sm:$0xff]   ;;  %v14948_v3 = vld [vmem:[%s19741_s9 + $0x388] ss:$48 sps:$4 sm:$0xff]  }
 0x6fc   : > { %10170 = vmatprep.subr.bf16.mxu1 %v14872_v4  ;;  %v14953_v4 = vld [vmem:[%s19741_s9 + $0x3e4] ss:$48 sps:$4 sm:$0xff]  }
 0x6fe   : > { %10089 = vmatpush1.bf16.msra.mxu0 %v14867_v5  ;;  %v14956_v5 = vld [vmem:[%s19741_s9 + $0x3ec] ss:$48 sps:$4 sm:$0xff]  }
 0x6ff   : > { %10171 = vmatpush1.bf16.msra.mxu1 %v14870_v10  ;;  %10090 = vmatprep.subr.bf16.mxu0 %v14875_v12  ;;  %v14951_v10 = vld [vmem:[%s19741_s9 + $0x3e0] ss:$48 sps:$4 sm:$0xff]   ;;  %v14954_v12 = vld [vmem:[%s19741_s9 + $0x3e8] ss:$48 sps:$4 sm:$0xff]  }
 0x700   : > { %10172 = vmatprep.subr.bf16.mxu1 %v14878_v13  ;;  %v14959_v13 = vld [vmem:[%s19741_s9 + $0x444] ss:$48 sps:$4 sm:$0xff]  }
 0x702   : > { %10091 = vmatpush1.bf16.msra.mxu0 %v14873_v46  ;;  %v14962_v46 = vld [vmem:[%s19741_s9 + $0x44c] ss:$48 sps:$4 sm:$0xff]  }
 0x703   : > { %10173 = vmatpush1.bf16.msra.mxu1 %v14876_v14  ;;  %10092 = vmatprep.subr.bf16.mxu0 %v14881_v24  ;;  %v14957_v14 = vld [vmem:[%s19741_s9 + $0x440] ss:$48 sps:$4 sm:$0xff]   ;;  %v14960_v24 = vld [vmem:[%s19741_s9 + $0x448] ss:$48 sps:$4 sm:$0xff]  }
 0x704   : > { %10174 = vmatprep.subr.bf16.mxu1 %v14884_v1  ;;  %v14965_v1 = vld [vmem:[%s19741_s9 + $0x4a4] ss:$48 sps:$4 sm:$0xff]  }
 0x706   : > { %10093 = vmatpush1.bf16.msra.mxu0 %v14879_v63  ;;  %v14968_v63 = vld [vmem:[%s19741_s9 + $0x4ac] ss:$48 sps:$4 sm:$0xff]  }
 0x707   : > { %10175 = vmatpush1.bf16.msra.mxu1 %v14882_v53  ;;  %10094 = vmatprep.subr.bf16.mxu0 %v14887_v15  ;;  %v14963_v53 = vld [vmem:[%s19741_s9 + $0x4a0] ss:$48 sps:$4 sm:$0xff]   ;;  %v14966_v15 = vld [vmem:[%s19741_s9 + $0x4a8] ss:$48 sps:$4 sm:$0xff]  }
 0x708   : > { %10176 = vmatprep.subr.bf16.mxu1 %v14890_v61  ;;  %v14971_v61 = vld [vmem:[%s19741_s9 + $0x504] ss:$48 sps:$4 sm:$0xff]  }
 0x70a   : > { %10095 = vmatpush1.bf16.msra.mxu0 %v14885_v16  ;;  %v14974_v16 = vld [vmem:[%s19741_s9 + $0x50c] ss:$48 sps:$4 sm:$0xff]  }
 0x70b   : > { %10177 = vmatpush1.bf16.msra.mxu1 %v14888_v17  ;;  %10187 = vmatprep.subr.bf16.mxu0 %v14893_v18  ;;  %v14969_v17 = vld [vmem:[%s19741_s9 + $0x500] ss:$48 sps:$4 sm:$0xff]   ;;  %v14972_v18 = vld [vmem:[%s19741_s9 + $0x508] ss:$48 sps:$4 sm:$0xff]  }
 0x70c   : > { %10269 = vmatprep.subr.bf16.mxu1 %v14896_v19  ;;  %v14977_v19 = vld [vmem:[%s19741_s9 + $0x564] ss:$48 sps:$4 sm:$0xff]  }
 0x70d   : > { %10097 = vmatmul.mubr.bf16.vlgmr.msra.gmra.mrb[24].mxu0 %v18597_v60 }
 0x70e   : > { %10179 = vmatmul.mubr.bf16.vlgmr.msra.gmra.mrb[16].mxu1 %v18597_v60  ;;  %10188 = vmatpush1.bf16.msra.mxu0 %v14891_v20  ;;  %v14980_v20 = vld [vmem:[%s19741_s9 + $0x56c] ss:$48 sps:$4 sm:$0xff]  }
 0x70f   : > { %10219 = vmatprep.mubr.bf16.mxu0 %v18387_v44  ;;  %10270 = vmatpush1.bf16.msra.mxu1 %v14894_v21  ;;  %v14975_v21 = vld [vmem:[%s19741_s9 + $0x560] ss:$48 sps:$4 sm:$0xff]  }
 0x710   : > { %10301 = vmatprep.mubr.bf16.mxu1 %v18387_v44  ;;  %10189 = vmatprep.subr.bf16.mxu0 %v14899_v22  ;;  %v14911_v44 = vld [vmem:[%s19741_s9 + $0x144] ss:$48 sps:$4 sm:$0xff]   ;;  %v14978_v22 = vld [vmem:[%s19741_s9 + $0x568] ss:$48 sps:$4 sm:$0xff]  }
 0x711   : > { %10271 = vmatprep.subr.bf16.mxu1 %v14902_v59  ;;  %v14983_v59 = vld [vmem:[%s19741_s9 + $0x5c4] ss:$48 sps:$4 sm:$0xff]  }
 0x712   : > { %10190 = vmatpush1.bf16.msra.mxu0 %v14897_v23  ;;  %v14986_v23 = vld [vmem:[%s19741_s9 + $0x5cc] ss:$48 sps:$4 sm:$0xff]  }
 0x713   : > { %10272 = vmatpush1.bf16.msra.mxu1 %v14900_v40  ;;  %10191 = vmatprep.subr.bf16.mxu0 %v14905_v25  ;;  %v14981_v40 = vld [vmem:[%s19741_s9 + $0x5c0] ss:$48 sps:$4 sm:$0xff]   ;;  %v14984_v25 = vld [vmem:[%s19741_s9 + $0x5c8] ss:$48 sps:$4 sm:$0xff]  }
 0x714   : > { %10273 = vmatprep.subr.bf16.mxu1 %v14908_v26  ;;  %v14989_v26 = vld [vmem:[%s19741_s9 + $0x624] ss:$48 sps:$4 sm:$0xff]  }
 0x716   : > { %10192 = vmatpush1.bf16.msra.mxu0 %v14903_v30  ;;  %v14992_v30 = vld [vmem:[%s19741_s9 + $0x62c] ss:$48 sps:$4 sm:$0xff]  }
 0x717   : > { %10274 = vmatpush1.bf16.msra.mxu1 %v14906_v34  ;;  %10193 = vmatprep.subr.bf16.mxu0 %v14911_v44  ;;  %v14987_v34 = vld [vmem:[%s19741_s9 + $0x620] ss:$48 sps:$4 sm:$0xff]   ;;  %v14990_v44 = vld [vmem:[%s19741_s9 + $0x628] ss:$48 sps:$4 sm:$0xff]  }
 0x718   : > { %10275 = vmatprep.subr.bf16.mxu1 %v14914_v8  ;;  %v14995_v8 = vld [vmem:[%s19741_s9 + $0x684] ss:$48 sps:$4 sm:$0xff]  }
 0x71a   : > { %10194 = vmatpush1.bf16.msra.mxu0 %v14909_v36  ;;  %v14998_v36 = vld [vmem:[%s19741_s9 + $0x68c] ss:$48 sps:$4 sm:$0xff]  }
 0x71b   : > { %10276 = vmatpush1.bf16.msra.mxu1 %v14912_v62  ;;  %10195 = vmatprep.subr.bf16.mxu0 %v14917_v7  ;;  %v14993_v62 = vld [vmem:[%s19741_s9 + $0x680] ss:$48 sps:$4 sm:$0xff]   ;;  %v14996_v7 = vld [vmem:[%s19741_s9 + $0x688] ss:$48 sps:$4 sm:$0xff]  }
 0x71c   : > { %10277 = vmatprep.subr.bf16.mxu1 %v14920_v37  ;;  %v15001_v37 = vld [vmem:[%s19741_s9 + $0x6e4] ss:$48 sps:$4 sm:$0xff]  }
 0x71e   : > { %10196 = vmatpush1.bf16.msra.mxu0 %v14915_v41  ;;  %v14999_v41 = vld [vmem:[%s19741_s9 + $0x6e0] ss:$48 sps:$4 sm:$0xff]  }
 0x71f   : > { %10278 = vmatpush1.bf16.msra.mxu1 %v14918_v38  ;;  %10197 = vmatprep.subr.bf16.mxu0 %v14923_v39  ;;  %v15002_v38 = vld [vmem:[%s19741_s9 + $0x6e8] ss:$48 sps:$4 sm:$0xff]   ;;  %v15010_v39 = vld [vmem:[%s19741_s9 + $0x74c] ss:$48 sps:$4 sm:$0xff]  }
 0x720   : > { %10279 = vmatprep.subr.bf16.mxu1 %v14926_v42  ;;  %v15005_v42 = vld [vmem:[%s19741_s9 + $0x740] ss:$48 sps:$4 sm:$0xff]  }
 0x722   : > { %10198 = vmatpush1.bf16.msra.mxu0 %v14921_v43  ;;  %v15008_v43 = vld [vmem:[%s19741_s9 + $0x748] ss:$48 sps:$4 sm:$0xff]  }
 0x723   : > { %10280 = vmatpush1.bf16.msra.mxu1 %v14924_v33  ;;  %10199 = vmatprep.subr.bf16.mxu0 %v14929_v45  ;;  %v15013_v33 = vld [vmem:[%s19741_s9 + $0x7a4] ss:$48 sps:$4 sm:$0xff]   ;;  %v15016_v45 = vld [vmem:[%s19741_s9 + $0x7ac] ss:$48 sps:$4 sm:$0xff]  }
 0x724   : > { %10281 = vmatprep.subr.bf16.mxu1 %v14932_v49  ;;  %v15011_v49 = vld [vmem:[%s19741_s9 + $0x7a0] ss:$48 sps:$4 sm:$0xff]  }
 0x726   : > { %10200 = vmatpush1.bf16.msra.mxu0 %v14927_v50  ;;  %v15014_v50 = vld [vmem:[%s19741_s9 + $0x7a8] ss:$48 sps:$4 sm:$0xff]  }
 0x727   : > { %10282 = vmatpush1.bf16.msra.mxu1 %v14930_v52  ;;  %10201 = vmatprep.subr.bf16.mxu0 %v14935_v32  ;;  %v15019_v52 = vld [vmem:[%s19741_s9 + $0x804] ss:$48 sps:$4 sm:$0xff]   ;;  %v15022_v32 = vld [vmem:[%s19741_s9 + $0x80c] ss:$48 sps:$4 sm:$0xff]  }
 0x728   : > { %10283 = vmatprep.subr.bf16.mxu1 %v14938_v54  ;;  %v15017_v54 = vld [vmem:[%s19741_s9 + $0x800] ss:$48 sps:$4 sm:$0xff]  }
 0x72a   : > { %10202 = vmatpush1.bf16.msra.mxu0 %v14933_v48  ;;  %v15020_v48 = vld [vmem:[%s19741_s9 + $0x808] ss:$48 sps:$4 sm:$0xff]  }
 0x72b   : > { %10284 = vmatpush1.bf16.msra.mxu1 %v14936_v55  ;;  %10203 = vmatprep.subr.bf16.mxu0 %v14941_v35  ;;  %v15025_v55 = vld [vmem:[%s19741_s9 + $0x864] ss:$48 sps:$4 sm:$0xff]  }
 0x72c   : > { %10285 = vmatprep.subr.bf16.mxu1 %v14944_v27 }
 0x72e   : > { %10204 = vmatpush1.bf16.msra.mxu0 %v14939_v56  ;;  %v15028_v56 = vld [vmem:[%s19741_s9 + $0x86c] ss:$48 sps:$4 sm:$0xff]  }
 0x72f   : > { %10286 = vmatpush1.bf16.msra.mxu1 %v14942_v57  ;;  %10205 = vmatprep.subr.bf16.mxu0 %v14947_v6 }
 0x730   : > { %10287 = vmatprep.subr.bf16.mxu1 %v14950_v58 }
 0x732   : > { %10206 = vmatpush1.bf16.msra.mxu0 %v14945_v0 }
 0x733   : > { %10288 = vmatpush1.bf16.msra.mxu1 %v14948_v3  ;;  %10207 = vmatprep.subr.bf16.mxu0 %v14953_v4  ;;  %v15023_v3 = vld [vmem:[%s19741_s9 + $0x860] ss:$48 sps:$4 sm:$0xff]  }
 0x734   : > { %10289 = vmatprep.subr.bf16.mxu1 %v14956_v5 }
 0x736   : > { %10208 = vmatpush1.bf16.msra.mxu0 %v14951_v10  ;;  %v15026_v10 = vld [vmem:[%s19741_s9 + $0x868] ss:$48 sps:$4 sm:$0xff]  }
 0x737   : > { %10290 = vmatpush1.bf16.msra.mxu1 %v14954_v12  ;;  %10209 = vmatprep.subr.bf16.mxu0 %v14959_v13  ;;  %v15031_v12 = vld [vmem:[%s19741_s9 + $0x8c4] ss:$48 sps:$4 sm:$0xff]   ;;  %v15034_v13 = vld [vmem:[%s19741_s9 + $0x8cc] ss:$48 sps:$4 sm:$0xff]  }
 0x738   : > { %10291 = vmatprep.subr.bf16.mxu1 %v14962_v46  ;;  %v15029_v46 = vld [vmem:[%s19741_s9 + $0x8c0] ss:$48 sps:$4 sm:$0xff]  }
 0x73a   : > { %10210 = vmatpush1.bf16.msra.mxu0 %v14957_v14  ;;  %v15032_v14 = vld [vmem:[%s19741_s9 + $0x8c8] ss:$48 sps:$4 sm:$0xff]  }
 0x73b   : > { %10292 = vmatpush1.bf16.msra.mxu1 %v14960_v24  ;;  %10211 = vmatprep.subr.bf16.mxu0 %v14965_v1  ;;  %v15037_v24 = vld [vmem:[%s19741_s9 + $0x924] ss:$48 sps:$4 sm:$0xff]   ;;  %v15040_v1 = vld [vmem:[%s19741_s9 + $0x92c] ss:$48 sps:$4 sm:$0xff]  }
 0x73c   : > { %10293 = vmatprep.subr.bf16.mxu1 %v14968_v63  ;;  %v15035_v63 = vld [vmem:[%s19741_s9 + $0x920] ss:$48 sps:$4 sm:$0xff]  }
 0x73e   : > { %10212 = vmatpush1.bf16.msra.mxu0 %v14963_v53  ;;  %v15038_v53 = vld [vmem:[%s19741_s9 + $0x928] ss:$48 sps:$4 sm:$0xff]  }
 0x73f   : > { %10294 = vmatpush1.bf16.msra.mxu1 %v14966_v15  ;;  %10213 = vmatprep.subr.bf16.mxu0 %v14971_v61  ;;  %v15043_v15 = vld [vmem:[%s19741_s9 + $0x984] ss:$48 sps:$4 sm:$0xff]   ;;  %v15046_v61 = vld [vmem:[%s19741_s9 + $0x98c] ss:$48 sps:$4 sm:$0xff]  }
 0x740   : > { %10295 = vmatprep.subr.bf16.mxu1 %v14974_v16  ;;  %v15041_v16 = vld [vmem:[%s19741_s9 + $0x980] ss:$48 sps:$4 sm:$0xff]  }
 0x742   : > { %10214 = vmatpush1.bf16.msra.mxu0 %v14969_v17  ;;  %v15044_v17 = vld [vmem:[%s19741_s9 + $0x988] ss:$48 sps:$4 sm:$0xff]  }
 0x743   : > { %10296 = vmatpush1.bf16.msra.mxu1 %v14972_v18  ;;  %10215 = vmatprep.subr.bf16.mxu0 %v14977_v19  ;;  %v15049_v18 = vld [vmem:[%s19741_s9 + $0x9e4] ss:$48 sps:$4 sm:$0xff]   ;;  %v15052_v19 = vld [vmem:[%s19741_s9 + $0x9ec] ss:$48 sps:$4 sm:$0xff]  }
 0x744   : > { %10297 = vmatprep.subr.bf16.mxu1 %v14980_v20  ;;  %v15047_v20 = vld [vmem:[%s19741_s9 + $0x9e0] ss:$48 sps:$4 sm:$0xff]  }
 0x746   : > { %10216 = vmatpush1.bf16.msra.mxu0 %v14975_v21  ;;  %v15050_v21 = vld [vmem:[%s19741_s9 + $0x9e8] ss:$48 sps:$4 sm:$0xff]  }
 0x747   : > { %10298 = vmatpush1.bf16.msra.mxu1 %v14978_v22  ;;  %10217 = vmatprep.subr.bf16.mxu0 %v14983_v59  ;;  %v15055_v22 = vld [vmem:[%s19741_s9 + $0xa44] ss:$48 sps:$4 sm:$0xff]   ;;  %v15058_v59 = vld [vmem:[%s19741_s9 + $0xa4c] ss:$48 sps:$4 sm:$0xff]  }
 0x748   : > { %10299 = vmatprep.subr.bf16.mxu1 %v14986_v23  ;;  %v15053_v23 = vld [vmem:[%s19741_s9 + $0xa40] ss:$48 sps:$4 sm:$0xff]  }
 0x74a   : > { %10218 = vmatpush1.bf16.msra.mxu0 %v14981_v40  ;;  %v15056_v40 = vld [vmem:[%s19741_s9 + $0xa48] ss:$48 sps:$4 sm:$0xff]  }
 0x74b   : > { %10300 = vmatpush1.bf16.msra.mxu1 %v14984_v25  ;;  %10228 = vmatprep.subr.bf16.mxu0 %v14989_v26  ;;  %v15061_v25 = vld [vmem:[%s19741_s9 + $0xaa4] ss:$48 sps:$4 sm:$0xff]   ;;  %v15064_v26 = vld [vmem:[%s19741_s9 + $0xaac] ss:$48 sps:$4 sm:$0xff]  }
 0x74c   : > { %10310 = vmatprep.subr.bf16.mxu1 %v14992_v30  ;;  %v15059_v30 = vld [vmem:[%s19741_s9 + $0xaa0] ss:$48 sps:$4 sm:$0xff]  }
 0x74d   : > { %10220 = vmatmul.mubr.bf16.vlgmr.msra.gmra.mrb[28].mxu0 %v18395_v47 }
 0x74e   : > { %10302 = vmatmul.mubr.bf16.vlgmr.msra.gmra.mrb[20].mxu1 %v18395_v47  ;;  %10229 = vmatpush1.bf16.msra.mxu0 %v14987_v34  ;;  %v15004_v47 = vld [vmem:[%s19741_s9 + $0x6ec] ss:$48 sps:$4 sm:$0xff]   ;;  %v15062_v34 = vld [vmem:[%s19741_s9 + $0xaa8] ss:$48 sps:$4 sm:$0xff]  }
 0x74f   : > { %10260 = vmatprep.mubr.bf16.mxu0 %v18405_v51  ;;  %10311 = vmatpush1.bf16.msra.mxu1 %v14990_v44  ;;  %v15067_v44 = vld [vmem:[%s19741_s9 + $0xb04] ss:$48 sps:$4 sm:$0xff]  }
 0x750   : > { %10342 = vmatprep.mubr.bf16.mxu1 %v18405_v51  ;;  %10230 = vmatprep.subr.bf16.mxu0 %v14995_v8  ;;  %v15007_v51 = vld [vmem:[%s19741_s9 + $0x744] ss:$48 sps:$4 sm:$0xff]   ;;  %v15070_v8 = vld [vmem:[%s19741_s9 + $0xb0c] ss:$48 sps:$4 sm:$0xff]  }
 0x751   : > { %10312 = vmatprep.subr.bf16.mxu1 %v14998_v36  ;;  %v19355_v36 = vld [vmem:[%s19742_s10] sm:$0xff] }
 0x752   : > { %10231 = vmatpush1.bf16.msra.mxu0 %v14993_v62  ;;  %v15065_v62 = vld [vmem:[%s19741_s9 + $0xb00] ss:$48 sps:$4 sm:$0xff]  }
 0x753   : > { %10313 = vmatpush1.bf16.msra.mxu1 %v14996_v7  ;;  %10232 = vmatprep.subr.bf16.mxu0 %v15001_v37  ;;  %v15068_v7 = vld [vmem:[%s19741_s9 + $0xb08] ss:$48 sps:$4 sm:$0xff]   ;;  %v15073_v37 = vld [vmem:[%s19741_s9 + $0xb64] ss:$48 sps:$4 sm:$0xff]  }
 0x754   : > { %10314 = vmatprep.subr.bf16.mxu1 %v15004_v47  ;;  %v15076_v47 = vld [vmem:[%s19741_s9 + $0xb6c] ss:$48 sps:$4 sm:$0xff]  }
 0x756   : > { %10233 = vmatpush1.bf16.msra.mxu0 %v14999_v41  ;;  %v7886_v41 = vrot.slane %v19355_v36, %v15557_v31 }
 0x757   : > { %10315 = vmatpush1.bf16.msra.mxu1 %v15002_v38  ;;  %10234 = vmatprep.subr.bf16.mxu0 %v15007_v51  ;;  %v7894_v38 = vrot.slane %v19355_v36, %v15606_v11  ;;  %v15071_v51 = vld [vmem:[%s19741_s9 + $0xb60] ss:$48 sps:$4 sm:$0xff]  }
 0x758   : > { %10316 = vmatprep.subr.bf16.mxu1 %v15010_v39  ;;  %v15074_v39 = vld [vmem:[%s19741_s9 + $0xb68] ss:$48 sps:$4 sm:$0xff]  }
 0x75a   : > { %10235 = vmatpush1.bf16.msra.mxu0 %v15005_v42  ;;  %v15079_v42 = vld [vmem:[%s19741_s9 + $0xbc4] ss:$48 sps:$4 sm:$0xff]  }
 0x75b   : > { %10317 = vmatpush1.bf16.msra.mxu1 %v15008_v43  ;;  %10236 = vmatprep.subr.bf16.mxu0 %v15013_v33  ;;  %v15082_v43 = vld [vmem:[%s19741_s9 + $0xbcc] ss:$48 sps:$4 sm:$0xff]  }
 0x75c   : > { %10318 = vmatprep.subr.bf16.mxu1 %v15016_v45 }
 0x75e   : > { %10237 = vmatpush1.bf16.msra.mxu0 %v15011_v49  ;;  %v15077_v49 = vld [vmem:[%s19741_s9 + $0xbc0] ss:$48 sps:$4 sm:$0xff]  }
 0x75f   : > { %10319 = vmatpush1.bf16.msra.mxu1 %v15014_v50  ;;  %10238 = vmatprep.subr.bf16.mxu0 %v15019_v52  ;;  %v15080_v50 = vld [vmem:[%s19741_s9 + $0xbc8] ss:$48 sps:$4 sm:$0xff]   ;;  %v15083_v52 = vld [vmem:[%s19743_s11 + $0x40] sm:$0xff]  }
 0x760   : > { %v19257_v35 = vpop.f32.mrb[20].mxu0  ;;  %v19259_v27 = vpop.f32.mrb[12].mxu1  ;;  %10320 = vmatprep.subr.bf16.mxu1 %v15022_v32  ;;  %v15084_v32 = vld [vmem:[%s19743_s11 + $0xc0] sm:$0xff]  }
 0x761   : > { %v19264_v57 = vpop.f32.mrb[21].mxu0  ;;  %v19266_v6 = vpop.f32.mrb[13].mxu1 }
 0x762   : > { %v9938_v58 = vpop.f32.mrb[22].mxu0  ;;  %v10020_v0 = vpop.f32.mrb[14].mxu1  ;;  %10239 = vmatpush1.bf16.msra.mxu0 %v15017_v54  ;;  %v13001_v33 = vadd.f32 %v19264_v57, %v7886_v41  ;;  %v13003_v45 = vadd.f32 %v19266_v6, %v7894_v38  ;;  %v15087_v57 = vld [vmem:[%s19743_s11 + $0x48] sm:$0xff]  }
 0x763   : > { %10321 = vmatpush1.bf16.msra.mxu1 %v15020_v48  ;;  %v9939_v4 = vpop.f32.mrb[23].mxu0  ;;  %v10021_v5 = vpop.f32.mrb[15].mxu1  ;;  %10240 = vmatprep.subr.bf16.mxu0 %v15025_v55  ;;  %v15085_v55 = vld [vmem:[%s19743_s11] sm:$0xff]   ;;  %v15088_v58 = vld [vmem:[%s19743_s11 + $0xc8] sm:$0xff]  }
 0x764   : > { %10322 = vmatprep.subr.bf16.mxu1 %v15028_v56  ;;  %v10352_v54 = vmax.f32 %v13001_v33, 0.0  ;;  %v10354_v48 = vmax.f32 %v13003_v45, 0.0  ;;  %v15086_v56 = vld [vmem:[%s19743_s11 + $0x80] sm:$0xff]   ;;  %v15090_v4 = vld [vmem:[%s19743_s11 + $0x88] sm:$0xff]   ;;  %v15091_v5 = vld [vmem:[%s19743_s11 + $0x50] sm:$0xff]  }
 0x765   : > { %v15119_v41 = vld [vmem:[%s19743_s11 + $0x148] sm:$0xff]   ;;  %v15124_v33 = vld [vmem:[%s19743_s11 + $0x1d0] sm:$0xff]  }
 0x766   : > { %10241 = vmatpush1.bf16.msra.mxu0 %v15023_v3  ;;  %v10364_v6 = vpack.c.bf16 %v10352_v54, %v10352_v54  ;;  %v10366_v0 = vpack.c.bf16 %v10354_v48, %v10354_v48  ;;  %v15089_v3 = vld [vmem:[%s19743_s11 + $0x8] sm:$0xff]   ;;  %v15125_v45 = vld [vmem:[%s19743_s11 + $0x110] sm:$0xff]   ;;  %v15130_v54 = vld [vmem:[%s19743_s11 + $0x198] sm:$0xff]  }
 0x767   : > { %10323 = vmatpush1.bf16.msra.mxu1 %v15026_v10  ;;  %10242 = vmatprep.subr.bf16.mxu0 %v15031_v12  ;;  %v15093_v10 = vld [vmem:[%s19743_s11 + $0x10] sm:$0xff]   ;;  %v15131_v48 = vld [vmem:[%s19743_s11 + $0x160] sm:$0xff]  }
 0x768   : > { %10324 = vmatprep.subr.bf16.mxu1 %v15034_v13  ;;  %v15094_v12 = vld [vmem:[%s19743_s11 + $0x90] sm:$0xff]   ;;  %v15095_v13 = vld [vmem:[%s19743_s11 + $0x58] sm:$0xff]  }
 0x76a   : > { %10243 = vmatpush1.bf16.msra.mxu0 %v15029_v46  ;;  %v15096_v46 = vld [vmem:[%s19743_s11 + $0xd8] sm:$0xff]  }
 0x76b   : > { %10325 = vmatpush1.bf16.msra.mxu1 %v15032_v14  ;;  %10244 = vmatprep.subr.bf16.mxu0 %v15037_v24  ;;  %v15097_v14 = vld [vmem:[%s19743_s11 + $0x18] sm:$0xff]  }
 0x76c   : > { %10326 = vmatprep.subr.bf16.mxu1 %v15040_v1  ;;  %v15098_v24 = vld [vmem:[%s19743_s11 + $0x98] sm:$0xff]   ;;  %v15099_v1 = vld [vmem:[%s19743_s11 + $0x60] sm:$0xff]  }
 0x76e   : > { %10245 = vmatpush1.bf16.msra.mxu0 %v15035_v63  ;;  %v15100_v63 = vld [vmem:[%s19743_s11 + $0xe0] sm:$0xff]  }
 0x76f   : > { %10327 = vmatpush1.bf16.msra.mxu1 %v15038_v53  ;;  %10246 = vmatprep.subr.bf16.mxu0 %v15043_v15  ;;  %v15101_v53 = vld [vmem:[%s19743_s11 + $0x20] sm:$0xff]  }
 0x770   : > { %10328 = vmatprep.subr.bf16.mxu1 %v15046_v61  ;;  %v15102_v15 = vld [vmem:[%s19743_s11 + $0xa0] sm:$0xff]   ;;  %v15103_v61 = vld [vmem:[%s19743_s11 + $0x68] sm:$0xff]  }
 0x772   : > { %10247 = vmatpush1.bf16.msra.mxu0 %v15041_v16  ;;  %v15104_v16 = vld [vmem:[%s19743_s11 + $0xe8] sm:$0xff]  }
 0x773   : > { %10329 = vmatpush1.bf16.msra.mxu1 %v15044_v17  ;;  %10248 = vmatprep.subr.bf16.mxu0 %v15049_v18  ;;  %v15105_v17 = vld [vmem:[%s19743_s11 + $0x28] sm:$0xff]   ;;  %v7882_v18 = vrot.slane %v19355_v36, %v15549_v29 }
 0x774   : > { %10330 = vmatprep.subr.bf16.mxu1 %v15052_v19  ;;  %v15106_v19 = vld [vmem:[%s19743_s11 + $0xa8] sm:$0xff]  }
 0x776   : > { %10249 = vmatpush1.bf16.msra.mxu0 %v15047_v20  ;;  %v15107_v20 = vld [vmem:[%s19743_s11 + $0x70] sm:$0xff]  }
 0x777   : > { %10331 = vmatpush1.bf16.msra.mxu1 %v15050_v21  ;;  %10250 = vmatprep.subr.bf16.mxu0 %v15055_v22  ;;  %v7890_v21 = vrot.slane %v19355_v36, %v15600_v9  ;;  %v15108_v22 = vld [vmem:[%s19743_s11 + $0xf0] sm:$0xff]  }
 0x778   : > { %10332 = vmatprep.subr.bf16.mxu1 %v15058_v59  ;;  %v15109_v59 = vld [vmem:[%s19743_s11 + $0x30] sm:$0xff]  }
 0x77a   : > { %10251 = vmatpush1.bf16.msra.mxu0 %v15053_v23  ;;  %v13000_v23 = vadd.f32 %v19257_v35, %v7882_v18  ;;  %v15113_v35 = vld [vmem:[%s19743_s11 + $0x38] sm:$0xff]  }
 0x77b   : > { %10333 = vmatpush1.bf16.msra.mxu1 %v15056_v40  ;;  %10252 = vmatprep.subr.bf16.mxu0 %v15061_v25  ;;  %v15110_v40 = vld [vmem:[%s19743_s11 + $0xb0] sm:$0xff]   ;;  %v15111_v25 = vld [vmem:[%s19743_s11 + $0x78] sm:$0xff]  }
 0x77c   : > { %10334 = vmatprep.subr.bf16.mxu1 %v15064_v26  ;;  %v13002_v26 = vadd.f32 %v19259_v27, %v7890_v21  ;;  %v15115_v27 = vld [vmem:[%s19743_s11 + $0x140] sm:$0xff]  }
 0x77e   : > { %10253 = vmatpush1.bf16.msra.mxu0 %v15059_v30  ;;  %v15112_v30 = vld [vmem:[%s19743_s11 + $0xf8] sm:$0xff]  }
 0x77f   : > { %10335 = vmatpush1.bf16.msra.mxu1 %v15062_v34  ;;  %10254 = vmatprep.subr.bf16.mxu0 %v15067_v44  ;;  %v10351_v34 = vmax.f32 %v13000_v23, 0.0  ;;  %v15114_v44 = vld [vmem:[%s19743_s11 + $0xb8] sm:$0xff]  }
 0x780   : > { %10336 = vmatprep.subr.bf16.mxu1 %v15070_v8  ;;  %v10353_v8 = vmax.f32 %v13002_v26, 0.0 }
 0x782   : > { %10255 = vmatpush1.bf16.msra.mxu0 %v15065_v62  ;;  %v15116_v62 = vld [vmem:[%s19743_s11 + $0x1c0] sm:$0xff]   ;;  %v10365_v38 = vpack.c.bf16 %v10353_v8, %v10353_v8 }
 0x783   : > { %10337 = vmatpush1.bf16.msra.mxu1 %v15068_v7  ;;  %10256 = vmatprep.subr.bf16.mxu0 %v15073_v37  ;;  %v15117_v7 = vld [vmem:[%s19743_s11 + $0x100] sm:$0xff]   ;;  %v10363_v37 = vpack.c.bf16 %v10351_v34, %v10351_v34 }
 0x784   : > { %10338 = vmatprep.subr.bf16.mxu1 %v15076_v47  ;;  %v15118_v47 = vld [vmem:[%s19743_s11 + $0x180] sm:$0xff]  }
 0x786   : > { %10257 = vmatpush1.bf16.msra.mxu0 %v15071_v51  ;;  %v15120_v51 = vld [vmem:[%s19743_s11 + $0x1c8] sm:$0xff]  }
 0x787   : > { %10339 = vmatpush1.bf16.msra.mxu1 %v15074_v39  ;;  %10258 = vmatprep.subr.bf16.mxu0 %v15079_v42  ;;  %v15121_v39 = vld [vmem:[%s19743_s11 + $0x108] sm:$0xff]  }
 0x788   : > { %10340 = vmatprep.subr.bf16.mxu1 %v15082_v43  ;;  %v15122_v42 = vld [vmem:[%s19743_s11 + $0x188] sm:$0xff]   ;;  %v15123_v43 = vld [vmem:[%s19743_s11 + $0x150] sm:$0xff]  }
 0x78a   : > { %10259 = vmatpush1.bf16.msra.mxu0 %v15077_v49  ;;  %v15126_v49 = vld [vmem:[%s19743_s11 + $0x190] sm:$0xff]  }
 0x78b   : > { %10341 = vmatpush1.bf16.msra.mxu1 %v15080_v50  ;;  %12874 = vmatprep.subr.bf16.mxu0 %v15083_v52  ;;  %v15127_v50 = vld [vmem:[%s19743_s11 + $0x158] sm:$0xff]  }
 0x78c   : > { %12896 = vmatprep.subr.bf16.mxu1 %v15084_v32  ;;  %v15128_v52 = vld [vmem:[%s19743_s11 + $0x1d8] sm:$0xff]  }
 0x78d   : > { %10261 = vmatmul.mubr.bf16.vlgmr.msra.gmra.mrb[28].mxu0 %v18597_v60  ;;  %v15129_v32 = vld [vmem:[%s19743_s11 + $0x118] sm:$0xff]  }
 0x78e   : > { %10343 = vmatmul.mubr.bf16.vlgmr.msra.gmra.mrb[20].mxu1 %v18597_v60  ;;  %12875 = vmatpush3.bf16.msra.mxu0 %v15085_v55  ;;  %v15092_v60 = vld [vmem:[%s19743_s11 + $0xd0] sm:$0xff]   ;;  %v15132_v55 = vld [vmem:[%s19743_s11 + $0x1e0] sm:$0xff]  }
 0x78f   : > { %11172 = vmatprep.mubr.bf16.mxu0 %v10364_v6  ;;  %12897 = vmatpush3.bf16.msra.mxu1 %v15086_v56  ;;  %v15133_v56 = vld [vmem:[%s19743_s11 + $0x120] sm:$0xff]   ;;  %v15135_v6 = vld [vmem:[%s19743_s11 + $0x168] sm:$0xff]  }
 0x790   : > { %11212 = vmatprep.mubr.bf16.mxu1 %v10366_v0  ;;  %12876 = vmatprep.subr.bf16.mxu0 %v15087_v57  ;;  %v15134_v57 = vld [vmem:[%s19743_s11 + $0x1a0] sm:$0xff]   ;;  %v15137_v0 = vld [vmem:[%s19743_s11 + $0x128] sm:$0xff]  }
 0x791   : > { %12898 = vmatprep.subr.bf16.mxu1 %v15088_v58  ;;  %v15136_v58 = vld [vmem:[%s19743_s11 + $0x1e8] sm:$0xff]  }
 0x792   : > { %12877 = vmatpush3.bf16.msra.mxu0 %v15089_v3  ;;  %v15138_v3 = vld [vmem:[%s19743_s11 + $0x1a8] sm:$0xff]  }
 0x793   : > { %12899 = vmatpush3.bf16.msra.mxu1 %v15090_v4  ;;  %12878 = vmatprep.subr.bf16.mxu0 %v15091_v5  ;;  %v15139_v4 = vld [vmem:[%s19743_s11 + $0x170] sm:$0xff]  }
 0x794   : > { %12900 = vmatprep.subr.bf16.mxu1 %v15092_v60  ;;  %v15140_v5 = vld [vmem:[%s19743_s11 + $0x1f0] sm:$0xff]  }
 0x795   : > { %v15141_v60 = vld [vmem:[%s19743_s11 + $0x130] sm:$0xff]  }
 0x796   : > { %12879 = vmatpush3.bf16.msra.mxu0 %v15093_v10  ;;  %v15142_v10 = vld [vmem:[%s19743_s11 + $0x1b0] sm:$0xff]  }
 0x797   : > { %12901 = vmatpush3.bf16.msra.mxu1 %v15094_v12  ;;  %12880 = vmatprep.subr.bf16.mxu0 %v15095_v13  ;;  %v15143_v12 = vld [vmem:[%s19743_s11 + $0x178] sm:$0xff]  }
 0x798   : > { %12902 = vmatprep.subr.bf16.mxu1 %v15096_v46  ;;  %v15144_v13 = vld [vmem:[%s19743_s11 + $0x1f8] sm:$0xff]  }
 0x799   : > { %v15145_v46 = vld [vmem:[%s19743_s11 + $0x138] sm:$0xff]  }
 0x79a   : > { %12881 = vmatpush3.bf16.msra.mxu0 %v15097_v14  ;;  %v15146_v14 = vld [vmem:[%s19743_s11 + $0x1b8] sm:$0xff]  }
 0x79b   : > { %12903 = vmatpush3.bf16.msra.mxu1 %v15098_v24  ;;  %12882 = vmatprep.subr.bf16.mxu0 %v15099_v1  ;;  %v15153_v24 = vld [vmem:[%s19743_s11 + $0x240] sm:$0xff]   ;;  %v7897_v1 = vsub.s32 4, %v15546_v28 }
 0x79c   : > { %12904 = vmatprep.subr.bf16.mxu1 %v15100_v63  ;;  %v7905_v63 = vsub.s32 6, %v15546_v28 }
 0x79e   : > { %12883 = vmatpush3.bf16.msra.mxu0 %v15101_v53  ;;  %v7901_v53 = vsub.s32 5, %v15546_v28 }
 0x79f   : > { %12905 = vmatpush3.bf16.msra.mxu1 %v15102_v15  ;;  %12884 = vmatprep.subr.bf16.mxu0 %v15103_v61  ;;  %v7909_v15 = vsub.s32 7, %v15546_v28  ;;  %v7898_v61 = vrot.slane %v19355_v36, %v7897_v1 }
 0x7a0   : > { %12906 = vmatprep.subr.bf16.mxu1 %v15104_v16  ;;  %v7906_v16 = vrot.slane %v19355_v36, %v7905_v63 }
 0x7a1   : > { %v7910_v18 = vrot.slane %v19355_v36, %v7909_v15 }
 0x7a2   : > { %12885 = vmatpush3.bf16.msra.mxu0 %v15105_v17  ;;  %v7902_v17 = vrot.slane %v19355_v36, %v7901_v53  ;;  %v15154_v36 = vld [vmem:[%s19743_s11 + $0x200] sm:$0xff]  }
 0x7a3   : > { %12907 = vmatpush3.bf16.msra.mxu1 %v15106_v19  ;;  %12886 = vmatprep.subr.bf16.mxu0 %v15107_v20 }
 0x7a4   : > { %12908 = vmatprep.subr.bf16.mxu1 %v15108_v22 }
 0x7a6   : > { %12887 = vmatpush3.bf16.msra.mxu0 %v15109_v59 }
 0x7a7   : > { %12909 = vmatpush3.bf16.msra.mxu1 %v15110_v40  ;;  %12888 = vmatprep.subr.bf16.mxu0 %v15111_v25 }
 0x7a8   : > { %12910 = vmatprep.subr.bf16.mxu1 %v15112_v30 }
 0x7aa   : > { %12889 = vmatpush3.bf16.msra.mxu0 %v15113_v35 }
 0x7ab   : > { %12911 = vmatpush3.bf16.msra.mxu1 %v15114_v44  ;;  %12918 = vmatprep.subr.bf16.mxu0 %v15115_v27 }
 0x7ac   : > { %12940 = vmatprep.subr.bf16.mxu1 %v15116_v62 }
 0x7ad   : > { %11173 = vmatmul.mubr.bf16.vlgmr.msra.gmra.mrb[32].mxu0 %v10363_v37 }
 0x7ae   : > { %11213 = vmatmul.mubr.bf16.vlgmr.msra.gmra.mrb[24].mxu1 %v10365_v38  ;;  %12919 = vmatpush3.bf16.msra.mxu0 %v15117_v7 }
 0x7af   : > { %12941 = vmatpush3.bf16.msra.mxu1 %v15118_v47  ;;  %12920 = vmatprep.subr.bf16.mxu0 %v15119_v41  ;;  %v15147_v47 = vld [vmem:[%s19743_s11 + $0x280] sm:$0xff]   ;;  %v15156_v41 = vld [vmem:[%s19743_s11 + $0x248] sm:$0xff]  }
 0x7b0   : > { %12942 = vmatprep.subr.bf16.mxu1 %v15120_v51  ;;  %v15157_v51 = vld [vmem:[%s19743_s11 + $0x208] sm:$0xff]  }
 0x7b2   : > { %12921 = vmatpush3.bf16.msra.mxu0 %v15121_v39  ;;  %v15148_v39 = vld [vmem:[%s19743_s11 + $0x288] sm:$0xff]  }
 0x7b3   : > { %12943 = vmatpush3.bf16.msra.mxu1 %v15122_v42  ;;  %12922 = vmatprep.subr.bf16.mxu0 %v15123_v43  ;;  %v15159_v42 = vld [vmem:[%s19743_s11 + $0x250] sm:$0xff]  }
 0x7b4   : > { %12944 = vmatprep.subr.bf16.mxu1 %v15124_v33  ;;  %v15160_v43 = vld [vmem:[%s19743_s11 + $0x210] sm:$0xff]  }
 0x7b5   : > { %v15149_v33 = vld [vmem:[%s19743_s11 + $0x290] sm:$0xff]  }
 0x7b6   : > { %12923 = vmatpush3.bf16.msra.mxu0 %v15125_v45  ;;  %v15162_v45 = vld [vmem:[%s19743_s11 + $0x258] sm:$0xff]  }
 0x7b7   : > { %12945 = vmatpush3.bf16.msra.mxu1 %v15126_v49  ;;  %12924 = vmatprep.subr.bf16.mxu0 %v15127_v50  ;;  %v15163_v49 = vld [vmem:[%s19743_s11 + $0x218] sm:$0xff]  }
 0x7b8   : > { %12946 = vmatprep.subr.bf16.mxu1 %v15128_v52  ;;  %v15150_v50 = vld [vmem:[%s19743_s11 + $0x298] sm:$0xff]   ;;  %v15165_v52 = vld [vmem:[%s19743_s11 + $0x260] sm:$0xff]  }
 0x7ba   : > { %12925 = vmatpush3.bf16.msra.mxu0 %v15129_v32  ;;  %v15166_v32 = vld [vmem:[%s19743_s11 + $0x220] sm:$0xff]  }
 0x7bb   : > { %12947 = vmatpush3.bf16.msra.mxu1 %v15130_v54  ;;  %12926 = vmatprep.subr.bf16.mxu0 %v15131_v48  ;;  %v15151_v54 = vld [vmem:[%s19743_s11 + $0x2a0] sm:$0xff]   ;;  %v15168_v48 = vld [vmem:[%s19743_s11 + $0x268] sm:$0xff]  }
 0x7bc   : > { %12948 = vmatprep.subr.bf16.mxu1 %v15132_v55  ;;  %v15169_v55 = vld [vmem:[%s19743_s11 + $0x228] sm:$0xff]  }
 0x7be   : > { %12927 = vmatpush3.bf16.msra.mxu0 %v15133_v56  ;;  %v15152_v56 = vld [vmem:[%s19743_s11 + $0x2a8] sm:$0xff]  }
 0x7bf   : > { %12949 = vmatpush3.bf16.msra.mxu1 %v15134_v57  ;;  %12928 = vmatprep.subr.bf16.mxu0 %v15135_v6  ;;  %v15171_v57 = vld [vmem:[%s19743_s11 + $0x270] sm:$0xff]  }
 0x7c0   : > { %12950 = vmatprep.subr.bf16.mxu1 %v15136_v58  ;;  %v15172_v6 = vld [vmem:[%s19743_s11 + $0x230] sm:$0xff]  }
 0x7c1   : > { %v15155_v58 = vld [vmem:[%s19743_s11 + $0x2b0] sm:$0xff]  }
 0x7c2   : > { %12929 = vmatpush3.bf16.msra.mxu0 %v15137_v0  ;;  %v15174_v0 = vld [vmem:[%s19743_s11 + $0x278] sm:$0xff]  }
 0x7c3   : > { %12951 = vmatpush3.bf16.msra.mxu1 %v15138_v3  ;;  %12930 = vmatprep.subr.bf16.mxu0 %v15139_v4  ;;  %v15175_v3 = vld [vmem:[%s19743_s11 + $0x238] sm:$0xff]  }
 0x7c4   : > { %12952 = vmatprep.subr.bf16.mxu1 %v15140_v5  ;;  %v15158_v4 = vld [vmem:[%s19743_s11 + $0x2b8] sm:$0xff]   ;;  %v15161_v5 = vld [vmem:[%s19743_s11 + $0x2c0] sm:$0xff]  }
 0x7c6   : > { %12931 = vmatpush3.bf16.msra.mxu0 %v15141_v60  ;;  %v15164_v60 = vld [vmem:[%s19743_s11 + $0x2c8] sm:$0xff]  }
 0x7c7   : > { %12953 = vmatpush3.bf16.msra.mxu1 %v15142_v10  ;;  %12932 = vmatprep.subr.bf16.mxu0 %v15143_v12  ;;  %v15167_v10 = vld [vmem:[%s19743_s11 + $0x2d0] sm:$0xff]   ;;  %v15170_v12 = vld [vmem:[%s19743_s11 + $0x2d8] sm:$0xff]  }
 0x7c8   : > { %12954 = vmatprep.subr.bf16.mxu1 %v15144_v13  ;;  %v15173_v13 = vld [vmem:[%s19743_s11 + $0x2e0] sm:$0xff]  }
 0x7ca   : > { %12933 = vmatpush3.bf16.msra.mxu0 %v15145_v46  ;;  %v15176_v46 = vld [vmem:[%s19743_s11 + $0x2e8] sm:$0x3f]  }
 0x7cb   : > { %12955 = vmatpush3.bf16.msra.mxu1 %v15146_v14  ;;  %12962 = vmatprep.subr.bf16.mxu0 %v15153_v24  ;;  %v11138_v14 = vsel %vm745_vm1, %v15176_v46, 0  ;;  %v7876_v24 = vld [vmem:[%s19742_s10 + $0x8] sm:$0xf] }
 0x7cc   : > { %11340 = vmatprep.subr.bf16.mxu1 %v15189_v2  ;;  %v7914_v1 = vrot.slane %v7876_v24, %v15549_v29  ;;  %v7922_v63 = vrot.slane %v7876_v24, %v15600_v9  ;;  %v7918_v53 = vrot.slane %v7876_v24, %v15557_v31  ;;  %v7926_v15 = vrot.slane %v7876_v24, %v15606_v11 }
 0x7e0   : > { %v10098_v19 = vpop.f32.mrb[24].mxu0 }
 0x7e1   : > { %v13004_v20 = vadd.f32 %v10098_v19, %v7898_v61  ;;  %v10180_v21 = vpop.f32.mrb[16].mxu1  ;;  %v10100_v22 = vpop.f32.mrb[25].mxu0 }
 0x7e2   : > { %v13006_v59 = vadd.f32 %v10180_v21, %v7906_v16  ;;  %v13005_v23 = vadd.f32 %v10100_v22, %v7902_v17  ;;  %v10182_v40 = vpop.f32.mrb[17].mxu1  ;;  %v10102_v25 = vpop.f32.mrb[26].mxu0 }
 0x7e3   : > { %v10355_v26 = vmax.f32 %v13004_v20, 0.0  ;;  %v13007_v30 = vadd.f32 %v10182_v40, %v7910_v18  ;;  %v10184_v35 = vpop.f32.mrb[18].mxu1  ;;  %v10103_v28 = vpop.f32.mrb[27].mxu0 }
 0x7e4   : > { %v10357_v34 = vmax.f32 %v13006_v59, 0.0  ;;  %v10356_v44 = vmax.f32 %v13005_v23, 0.0  ;;  %v10185_v27 = vpop.f32.mrb[19].mxu1 }
 0x7e5   : > { %v10358_v8 = vmax.f32 %v13007_v30, 0.0  ;;  %v10367_v7 = vpack.c.bf16 %v10355_v26, %v10355_v26 }
 0x7e6   : > { %v10368_v62 = vpack.c.bf16 %v10356_v44, %v10356_v44  ;;  %v10369_v38 = vpack.c.bf16 %v10357_v34, %v10357_v34  ;;  %v12773_v44 = vld [vmem:[%s19744_s12] ss:$0 sm:$0xff] }
 0x7e7   : > { %v10370_v37 = vpack.c.bf16 %v10358_v8, %v10358_v8 }
 0x7e8   : > { %11252 = vmatprep.mubr.bf16.mxu0 %v10368_v62 }
 0x7e9   : > { %11292 = vmatprep.mubr.bf16.mxu1 %v10370_v37  ;;  %11253 = vmatmul.mubr.bf16.vlgmr.msra.gmra.mrb[36].mxu0 %v10367_v7 }
 0x7ea   : > { %11293 = vmatmul.mubr.bf16.vlgmr.msra.gmra.mrb[28].mxu1 %v10369_v38  ;;  %12963 = vmatpush3.bf16.msra.mxu0 %v15154_v36 }
 0x7eb   : > { %11341 = vmatpush1.bf16.msra.mxu1 %v15147_v47  ;;  %12964 = vmatprep.subr.bf16.mxu0 %v15156_v41 }
 0x7ec   : > { %11342 = vmatprep.subr.bf16.mxu1 %v15189_v2 }
 0x7ee   : > { %12965 = vmatpush3.bf16.msra.mxu0 %v15157_v51 }
 0x7ef   : > { %11343 = vmatpush1.bf16.msra.mxu1 %v15148_v39  ;;  %12966 = vmatprep.subr.bf16.mxu0 %v15159_v42 }
 0x7f0   : > { %11344 = vmatprep.subr.bf16.mxu1 %v15189_v2 }
 0x7f2   : > { %12967 = vmatpush3.bf16.msra.mxu0 %v15160_v43 }
 0x7f3   : > { %11345 = vmatpush1.bf16.msra.mxu1 %v15149_v33  ;;  %12968 = vmatprep.subr.bf16.mxu0 %v15162_v45 }
 0x7f4   : > { %11346 = vmatprep.subr.bf16.mxu1 %v15189_v2 }
 0x7f6   : > { %12969 = vmatpush3.bf16.msra.mxu0 %v15163_v49 }
 0x7f7   : > { %11347 = vmatpush1.bf16.msra.mxu1 %v15150_v50  ;;  %12970 = vmatprep.subr.bf16.mxu0 %v15165_v52 }
 0x7f8   : > { %11348 = vmatprep.subr.bf16.mxu1 %v15189_v2 }
 0x7fa   : > { %12971 = vmatpush3.bf16.msra.mxu0 %v15166_v32 }
 0x7fb   : > { %11349 = vmatpush1.bf16.msra.mxu1 %v15151_v54  ;;  %12972 = vmatprep.subr.bf16.mxu0 %v15168_v48 }
 0x7fc   : > { %11350 = vmatprep.subr.bf16.mxu1 %v15189_v2 }
 0x7fe   : > { %12973 = vmatpush3.bf16.msra.mxu0 %v15169_v55 }
 0x7ff   : > { %11351 = vmatpush1.bf16.msra.mxu1 %v15152_v56  ;;  %12974 = vmatprep.subr.bf16.mxu0 %v15171_v57 }
 0x800   : > { %11352 = vmatprep.subr.bf16.mxu1 %v15189_v2 }
 0x802   : > { %12975 = vmatpush3.bf16.msra.mxu0 %v15172_v6 }
 0x803   : > { %11353 = vmatpush1.bf16.msra.mxu1 %v15155_v58  ;;  %12976 = vmatprep.subr.bf16.mxu0 %v15174_v0 }
 0x804   : > { %11354 = vmatprep.subr.bf16.mxu1 %v15189_v2 }
 0x806   : > { %12977 = vmatpush3.bf16.msra.mxu0 %v15175_v3 }
 0x807   : > { %11355 = vmatpush1.bf16.msra.mxu1 %v15158_v4 }
 0x808   : > { %11356 = vmatprep.subr.bf16.mxu1 %v15189_v2 }
 0x80b   : > { %11357 = vmatpush1.bf16.msra.mxu1 %v15161_v5 }
 0x80c   : > { %11358 = vmatprep.subr.bf16.mxu1 %v15189_v2 }
 0x80f   : > { %11359 = vmatpush1.bf16.msra.mxu1 %v15164_v60 }
 0x810   : > { %11360 = vmatprep.subr.bf16.mxu1 %v15189_v2 }
 0x813   : > { %11361 = vmatpush1.bf16.msra.mxu1 %v15167_v10 }
 0x814   : > { %11362 = vmatprep.subr.bf16.mxu1 %v15189_v2 }
 0x817   : > { %11363 = vmatpush1.bf16.msra.mxu1 %v15170_v12 }
 0x818   : > { %11364 = vmatprep.subr.bf16.mxu1 %v15189_v2 }
 0x81b   : > { %11365 = vmatpush1.bf16.msra.mxu1 %v15173_v13  ;;  %v12869_v13 = vld [vmem:[%s19745_s13] ss:$0 sm:$0xff] }
 0x81c   : > { %11366 = vmatprep.subr.bf16.mxu1 %v15189_v2 }
 0x81f   : > { %11367 = vmatpush1.bf16.msra.mxu1 %v11138_v14  ;;  %v12870_v14 = vld [vmem:[%s19746_s14] ss:$0 sm:$0xff] }
 0x860   : > { %v10262_v61 = vpop.f32.mrb[28].mxu0 }
 0x861   : > { %v13008_v16 = vadd.f32 %v10262_v61, %v7914_v1  ;;  %v10344_v17 = vpop.f32.mrb[20].mxu1  ;;  %v10264_v18 = vpop.f32.mrb[29].mxu0 }
 0x862   : > { %v13010_v2 = vadd.f32 %v10344_v17, %v7922_v63  ;;  %v13009_v19 = vadd.f32 %v10264_v18, %v7918_v53  ;;  %v10346_v20 = vpop.f32.mrb[21].mxu1  ;;  %v10266_v21 = vpop.f32.mrb[30].mxu0 }
 0x863   : > { %v10359_v22 = vmax.f32 %v13008_v16, 0.0  ;;  %v13011_v59 = vadd.f32 %v10346_v20, %v7926_v15  ;;  %v10348_v23 = vpop.f32.mrb[22].mxu1  ;;  %v10267_v40 = vpop.f32.mrb[31].mxu0 }
 0x864   : > { %v10361_v25 = vmax.f32 %v13010_v2, 0.0  ;;  %v10360_v29 = vmax.f32 %v13009_v19, 0.0  ;;  %v10349_v26 = vpop.f32.mrb[23].mxu1 }
 0x865   : > { %v10362_v9 = vmax.f32 %v13011_v59, 0.0  ;;  %v10371_v31 = vpack.c.bf16 %v10359_v22, %v10359_v22 }
 0x866   : > { %v10372_v30 = vpack.c.bf16 %v10360_v29, %v10360_v29  ;;  %v10373_v35 = vpack.c.bf16 %v10361_v25, %v10361_v25 }
 0x867   : > { %v10374_v11 = vpack.c.bf16 %v10362_v9, %v10362_v9 }
 0x868   : > { %11332 = vmatprep.mubr.bf16.mxu0 %v10372_v30 }
 0x869   : > { %12868 = vmatprep.mubr.msk.bf16.mxu1 %vm11133_vm5, %v10374_v11  ;;  %11333 = vmatmul.mubr.bf16.vlgmr.msra.gmra.mrb[40].mxu0 %v10371_v31 }
 0x86a   : > { %11373 = vmatmul.mubr.bf16.vlgmr.msra.gmra.mrb[32].mxu1 %v10373_v35 }
 0x880   : > { %v12890_v28 = vpop.f32.mrb[32].mxu0 }
 0x881   : > { %v12912_v34 = vpop.f32.mrb[24].mxu1  ;;  %v12891_v27 = vpop.f32.mrb[33].mxu0 }
 0x882   : > { %v12892_v8 = vadd.f32 %v12891_v27, %v12890_v28  ;;  %v12913_v62 = vpop.f32.mrb[25].mxu1  ;;  %v12893_v36 = vpop.f32.mrb[34].mxu0 }
 0x883   : > { %v12914_v7 = vadd.f32 %v12913_v62, %v12912_v34  ;;  %v12915_v37 = vpop.f32.mrb[26].mxu1  ;;  %v12894_v47 = vpop.f32.mrb[35].mxu0 }
 0x884   : > { %v11175_v41 = vadd.f32 %v12892_v8, %v12773_v44  ;;  %v12916_v38 = vpop.f32.mrb[27].mxu1 }
 0x886   : > { %v11215_v51 = vadd.f32 %v12914_v7, %v11175_v41 }
 0x8bc   : > { %v12934_v39 = vpop.f32.mrb[36].mxu0 }
 0x8bd   : > { %v12956_v42 = vpop.f32.mrb[28].mxu1  ;;  %v12935_v43 = vpop.f32.mrb[37].mxu0 }
 0x8be   : > { %v12936_v33 = vadd.f32 %v12935_v43, %v12934_v39  ;;  %v12957_v45 = vpop.f32.mrb[29].mxu1  ;;  %v12937_v49 = vpop.f32.mrb[38].mxu0 }
 0x8bf   : > { %v12958_v50 = vadd.f32 %v12957_v45, %v12956_v42  ;;  %v12959_v52 = vpop.f32.mrb[30].mxu1  ;;  %v12938_v32 = vpop.f32.mrb[39].mxu0 }
 0x8c0   : > { %v11255_v54 = vadd.f32 %v12936_v33, %v11215_v51  ;;  %v12960_v48 = vpop.f32.mrb[31].mxu1 }
 0x8c2   : > { %v11295_v55 = vadd.f32 %v12958_v50, %v11255_v54 }
 0x93c   : > { %v12978_v56 = vpop.f32.mrb[40].mxu0 }
 0x93d   : > { %v11374_v57 = vpop.f32.mrb[32].mxu1  ;;  %v12979_v6 = vpop.f32.mrb[41].mxu0 }
 0x93e   : > { %v12980_v58 = vadd.f32 %v12979_v6, %v12978_v56  ;;  %v11376_v0 = vpop.f32.mrb[33].mxu1  ;;  %v12981_v3 = vpop.f32.mrb[42].mxu0 }
 0x93f   : > { %v11377_v4 = vpop.f32.mrb[34].mxu1  ;;  %v12982_v5 = vpop.f32.mrb[43].mxu0 }
 0x940   : > { %v11335_v60 = vadd.f32 %v12980_v58, %v11295_v55  ;;  %v11378_v10 = vpop.f32.mrb[35].mxu1 }
 0x942   : > { %v11375_v12 = vadd.f32 %v11374_v57, %v11335_v60 }
 0x944   : > { %v11380_v46 = vmax.f32 %v11375_v12, 0.0 }
 0x946   : > { %v11388_v24 = vmul.f32 %v12869_v13, %v11380_v46 }
 0x948   : > { %v11396_v1 = vadd.f32 %v12870_v14, %v11388_v24 }
 0x94a   : > { %v11398_v63 = vsel %vm11397_vm6, %v11396_v1, -inf }
 0x94b   : > { %11399 = vmax.xlane.f32.xlu0 %v11398_v63 }
 0x9d8   : > { %v11400_v53 = vpop.xlane.xlu0 %11399 }
 0x9d9   : > { %v11401_v15 = vsub.f32 %v11396_v1, %v11400_v53 }
 0x9db   : > { %v11402_v61 = vmul.f32 1.442695, %v11401_v15 }
 0x9dd   : > { %15177 = vpow2.f32 %v11402_v61 }
 0x9e7   : > { %v15178_v16 = vpop.eup %15177 }
 0x9e8   : > { %v11404_v17 = vsel %vm11397_vm6, %v15178_v16, 0.0 }
 0x9e9   : > { %11405 = vadd.xlane.f32.xlu0 %v11404_v17 }
 0xa76   : > { %v11406_v18 = vpop.xlane.xlu0 %11405 }
 0xa77   : > { %15179 = vrcp.f32 %v11406_v18 }
 0xa81   : > { %v15180_v2 = vpop.eup %15179 }
 0xa82   : > { %v11408_v19 = vmul.f32 %v15180_v2, %v15178_v16 }
 0xa84   : > { %11409 = vst.msk [vmem:[%s492_s26] sm:$0x3f] %vm11397_vm6, %v11408_v19 }
 0xa85 PF: > { %s25_s18 = sadd.s32 1, %s15187_s18  }
 0xa86   : > { %p22_p4 = scmp.ge.s32.totalorder %s25_s18, 4  }
 0xa88   :  { %24 = sbr.rel (!%p22_p4) target bundleno = 1 (0x1), region = 110 }

</bundles_post_ra>
